<compile_context>
chip_gen: v5e
topology: v5e:2x2
jax: 0.10.0
libtpu: 0.0.40
codegen_flags: <defaults>
</compile_context>

<pallas_src>
import jax
import jax.numpy as jnp
from jax.experimental import pallas as pl
from jax.experimental.pallas import tpu as pltpu


def _round_up(n, m):
    return (n + m - 1) // m * m


def _tpu_vmem_capacity_bytes():
    try:
        return int(pltpu.get_tpu_info().vmem_capacity_bytes)
    except Exception:
        return 64 * 1024 * 1024  # conservative (v7x per-TC physical VMEM)


def repa_kernel(x_ref, w1_ref, b1_ref, w2_ref, b2_ref, w3_ref, b3_ref, o_ref):
    """One token tile -> Linear/SiLU/Linear/SiLU/Linear, all on the MXU."""
    x = x_ref[...]  # (tm, Dp) bf16

    # Layer 1: Linear(hidden -> projector), f32 accumulate, SiLU in f32 (EUP).
    h1 = jnp.dot(x, w1_ref[...], preferred_element_type=jnp.float32) + b1_ref[...]
    h1 = (h1 * jax.nn.sigmoid(h1)).astype(jnp.bfloat16)

    # Layer 2: Linear(projector -> projector) + SiLU.
    h2 = jnp.dot(h1, w2_ref[...], preferred_element_type=jnp.float32) + b2_ref[...]
    h2 = (h2 * jax.nn.sigmoid(h2)).astype(jnp.bfloat16)

    # Layer 3: Linear(projector -> z_dim); store in the output's final dtype.
    out = jnp.dot(h2, w3_ref[...], preferred_element_type=jnp.float32) + b3_ref[...]
    o_ref[...] = out.astype(o_ref.dtype)


def prepare_params(params):
    """Pad feature dims to multiples of 128 and cast weights to bf16 ONCE.

    This is the per-model setup step; repa_forward reuses the result so the
    per-call hot path does not re-read/re-write the full weight set.
    Zero padding is inert through the MLP (silu(0)=0, padded rows/cols zero).
    """
    w1, b1, w2, b2, w3, b3 = params
    D, P = w1.shape
    Z = w3.shape[1]
    Dp, Pp, Zp = _round_up(D, 128), _round_up(P, 128), _round_up(Z, 128)
    return dict(
        D=D, P=P, Z=Z, Dp=Dp, Pp=Pp, Zp=Zp,
        w1=jnp.pad(w1, ((0, Dp - D), (0, Pp - P))).astype(jnp.bfloat16),
        w2=jnp.pad(w2, ((0, Pp - P), (0, Pp - P))).astype(jnp.bfloat16),
        w3=jnp.pad(w3, ((0, Pp - P), (0, Zp - Z))).astype(jnp.bfloat16),
        b1=jnp.pad(b1, (0, Pp - P)).reshape(1, Pp).astype(jnp.float32),
        b2=jnp.pad(b2, (0, Pp - P)).reshape(1, Pp).astype(jnp.float32),
        b3=jnp.pad(b3, (0, Zp - Z)).reshape(1, Zp).astype(jnp.float32),
    )


def repa_forward(x, prepared, *, tile_m=None):
    """x: (B, T, D) -> (B, T, z_dim). Hot path (3 matmuls + SiLU) in Pallas."""
    B, T, D = x.shape
    assert D == prepared["D"], (D, prepared["D"])
    Dp, Pp, Zp = prepared["Dp"], prepared["Pp"], prepared["Zp"]
    Z = prepared["Z"]
    M = B * T

    # Per-generation tuning: bigger tiles where VMEM allows, and leave
    # ~25% headroom below physical VMEM for compiler scratch / DMA bookkeeping.
    vmem_cap = _tpu_vmem_capacity_bytes()
    if tile_m is None:
        tile_m = 512 if vmem_cap >= 128 * 1024 * 1024 else 256
    vmem_limit = min(vmem_cap * 3 // 4, 96 * 1024 * 1024)

    # Token tile: multiple of 16 rows (bf16 sublane packing); ensure >= 2 tiles
    # when possible so v7x's two TensorCores both get work on the parallel axis.
    tm = min(tile_m, _round_up(M, 16))
    if M > 16 and _round_up(M, tm) == tm:
        tm = _round_up((M + 1) // 2, 16)
    Mp = _round_up(M, tm)

    # Activation prep: pad/cast only when it is not a no-op.
    x2d = x.reshape(M, D)
    if Mp != M or Dp != D:
        x2d = jnp.pad(x2d, ((0, Mp - M), (0, Dp - D)))
    if x2d.dtype != jnp.bfloat16:
        x2d = x2d.astype(jnp.bfloat16)

    resident = lambda i: (0, 0)  # constant index_map: weights stay in VMEM

    out2d = pl.pallas_call(
        repa_kernel,
        out_shape=jax.ShapeDtypeStruct((Mp, Zp), x.dtype),  # final dtype directly
        grid_spec=pltpu.PrefetchScalarGridSpec(
            num_scalar_prefetch=0,
            grid=(Mp // tm,),
            in_specs=[
                pl.BlockSpec((tm, Dp), lambda i: (i, 0)),                        # x tile
                pl.BlockSpec((Dp, Pp), resident, pipeline_mode=pl.Buffered(1)),  # w1
                pl.BlockSpec((1, Pp), resident, pipeline_mode=pl.Buffered(1)),   # b1
                pl.BlockSpec((Pp, Pp), resident, pipeline_mode=pl.Buffered(1)),  # w2
                pl.BlockSpec((1, Pp), resident, pipeline_mode=pl.Buffered(1)),   # b2
                pl.BlockSpec((Pp, Zp), resident, pipeline_mode=pl.Buffered(1)),  # w3
                pl.BlockSpec((1, Zp), resident, pipeline_mode=pl.Buffered(1)),   # b3
            ],
            out_specs=pl.BlockSpec((tm, Zp), lambda i: (i, 0)),  # lane-dense output
        ),
        compiler_params=pltpu.CompilerParams(
            dimension_semantics=("parallel",),   # token tiles shard across TCs
            vmem_limit_bytes=vmem_limit,
        ),
    )(x2d, prepared["w1"], prepared["b1"], prepared["w2"], prepared["b2"],
      prepared["w3"], prepared["b3"])

    if Mp != M or Zp != Z:
        out2d = out2d[:M, :Z]
    return out2d.reshape(B, T, Z)


def init_params(key, hidden_size, projector_dim, z_dim, dtype=jnp.float32):
    """Deterministic init matching nn.Linear shapes (weights stored as (in, out))."""
    ks = jax.random.split(key, 6)

    def linear_init(kw, kb, fan_in, fan_out):
        bound = 1.0 / jnp.sqrt(fan_in)
        w = jax.random.uniform(kw, (fan_in, fan_out), dtype, -bound, bound)
        b = jax.random.uniform(kb, (fan_out,), dtype, -bound, bound)
        return w, b

    w1, b1 = linear_init(ks[0], ks[1], hidden_size, projector_dim)
    w2, b2 = linear_init(ks[2], ks[3], projector_dim, projector_dim)
    w3, b3 = linear_init(ks[4], ks[5], projector_dim, z_dim)
    return (w1, b1, w2, b2, w3, b3)


def repa_reference(x, params):
    """Pure-JAX f32 reference of the PyTorch forward (semantics check)."""
    w1, b1, w2, b2, w3, b3 = params
    B, T, D = x.shape
    h = x.reshape(-1, D)
    h = jax.nn.silu(h @ w1 + b1)
    h = jax.nn.silu(h @ w2 + b2)
    h = h @ w3 + b3
    return h.reshape(B, T, -1)


if __name__ == "__main__":
    # Small shapes consistent with the module: (B, T, hidden) -> (B, T, z_dim).
    # Non-128-multiple feature dims deliberately exercise the padding path.
    B, T = 2, 256
    hidden_size, projector_dim, z_dim = 96, 256, 80

    key = jax.random.PRNGKey(0)
    kx, kp = jax.random.split(key)
    x = jax.random.normal(kx, (B, T, hidden_size), dtype=jnp.float32)
    params = init_params(kp, hidden_size, projector_dim, z_dim)

    prepared = prepare_params(params)   # one-time weight pad + bf16 cast
    out = repa_forward(x, prepared)
    out = jax.block_until_ready(out)

    ref = repa_reference(x, params)
    assert out.shape == (B, T, z_dim), out.shape
    # bf16 matmul operands with f32 accumulation: allow bf16-level tolerance.
    assert jnp.allclose(out, ref, atol=5e-2, rtol=5e-2), float(
        jnp.max(jnp.abs(out - ref))
    )

    print("KERNEL_OK")
</pallas_src>

<mosaic_0001>
module attributes {stable_mosaic.version = 11 : i64} {
  func.func @repa_kernel(%arg0: i32, %arg1: memref<256x128xbf16, #tpu.memory_space<vmem>>, %arg2: memref<128x256xbf16, #tpu.memory_space<vmem>>, %arg3: memref<1x256xf32, #tpu.memory_space<vmem>>, %arg4: memref<256x256xbf16, #tpu.memory_space<vmem>>, %arg5: memref<1x256xf32, #tpu.memory_space<vmem>>, %arg6: memref<256x128xbf16, #tpu.memory_space<vmem>>, %arg7: memref<1x128xf32, #tpu.memory_space<vmem>>, %arg8: memref<256x128xf32, #tpu.memory_space<vmem>>) attributes {dimension_semantics = [#tpu.dimension_semantics<parallel>], iteration_bounds = array<i64: 2>, scalar_prefetch = 0 : i64, scratch_operands = 0 : i64, tpu.core_type = #tpu.core_type<tc>, window_params = [{transform_indices = @transform_0, window_bounds = array<i64: 256, 128>}, {pipeline_mode = #tpu.pipeline_mode<synchronous>, transform_indices = @transform_1, window_bounds = array<i64: 128, 256>}, {pipeline_mode = #tpu.pipeline_mode<synchronous>, transform_indices = @transform_2, window_bounds = array<i64: 1, 256>}, {pipeline_mode = #tpu.pipeline_mode<synchronous>, transform_indices = @transform_3, window_bounds = array<i64: 256, 256>}, {pipeline_mode = #tpu.pipeline_mode<synchronous>, transform_indices = @transform_4, window_bounds = array<i64: 1, 256>}, {pipeline_mode = #tpu.pipeline_mode<synchronous>, transform_indices = @transform_5, window_bounds = array<i64: 256, 128>}, {pipeline_mode = #tpu.pipeline_mode<synchronous>, transform_indices = @transform_6, window_bounds = array<i64: 1, 128>}, {transform_indices = @transform_7, window_bounds = array<i64: 256, 128>}]} {
    %c0 = arith.constant 0 : index
    %c0_0 = arith.constant 0 : index
    %0 = vector.load %arg1[%c0, %c0_0] : memref<256x128xbf16, #tpu.memory_space<vmem>>, vector<256x128xbf16>
    %c0_1 = arith.constant 0 : index
    %c0_2 = arith.constant 0 : index
    %1 = vector.load %arg2[%c0_1, %c0_2] : memref<128x256xbf16, #tpu.memory_space<vmem>>, vector<128x256xbf16>
    %cst = arith.constant dense<0.000000e+00> : vector<256x256xf32>
    %2 = tpu.matmul %0, %1, %cst {dimension_numbers = #tpu.dot_dimension_numbers<[1], [0], [0], [1], [0, 0, 1, 1], [], []>} : vector<256x128xbf16>, vector<128x256xbf16>, vector<256x256xf32> -> vector<256x256xf32>
    %c0_3 = arith.constant 0 : index
    %c0_4 = arith.constant 0 : index
    %3 = vector.load %arg3[%c0_3, %c0_4] : memref<1x256xf32, #tpu.memory_space<vmem>>, vector<1x256xf32>
    %4 = vector.broadcast %3 : vector<1x256xf32> to vector<256x256xf32>
    %5 = arith.addf %2, %4 : vector<256x256xf32>
    %6 = arith.negf %5 : vector<256x256xf32>
    %7 = math.exp %6 : vector<256x256xf32>
    %cst_5 = arith.constant 1.000000e+00 : f32
    %8 = vector.broadcast %cst_5 : f32 to vector<256x256xf32>
    %9 = arith.addf %8, %7 : vector<256x256xf32>
    %10 = arith.divf %8, %9 : vector<256x256xf32>
    %11 = arith.mulf %5, %10 : vector<256x256xf32>
    %12 = arith.truncf %11 : vector<256x256xf32> to vector<256x256xbf16>
    %c0_6 = arith.constant 0 : index
    %c0_7 = arith.constant 0 : index
    %13 = vector.load %arg4[%c0_6, %c0_7] : memref<256x256xbf16, #tpu.memory_space<vmem>>, vector<256x256xbf16>
    %cst_8 = arith.constant dense<0.000000e+00> : vector<256x256xf32>
    %14 = tpu.matmul %12, %13, %cst_8 {dimension_numbers = #tpu.dot_dimension_numbers<[1], [0], [0], [1], [0, 0, 1, 1], [], []>} : vector<256x256xbf16>, vector<256x256xbf16>, vector<256x256xf32> -> vector<256x256xf32>
    %c0_9 = arith.constant 0 : index
    %c0_10 = arith.constant 0 : index
    %15 = vector.load %arg5[%c0_9, %c0_10] : memref<1x256xf32, #tpu.memory_space<vmem>>, vector<1x256xf32>
    %16 = vector.broadcast %15 : vector<1x256xf32> to vector<256x256xf32>
    %17 = arith.addf %14, %16 : vector<256x256xf32>
    %18 = arith.negf %17 : vector<256x256xf32>
    %19 = math.exp %18 : vector<256x256xf32>
    %cst_11 = arith.constant 1.000000e+00 : f32
    %20 = vector.broadcast %cst_11 : f32 to vector<256x256xf32>
    %21 = arith.addf %20, %19 : vector<256x256xf32>
    %22 = arith.divf %20, %21 : vector<256x256xf32>
    %23 = arith.mulf %17, %22 : vector<256x256xf32>
    %24 = arith.truncf %23 : vector<256x256xf32> to vector<256x256xbf16>
    %c0_12 = arith.constant 0 : index
    %c0_13 = arith.constant 0 : index
    %25 = vector.load %arg6[%c0_12, %c0_13] : memref<256x128xbf16, #tpu.memory_space<vmem>>, vector<256x128xbf16>
    %cst_14 = arith.constant dense<0.000000e+00> : vector<256x128xf32>
    %26 = tpu.matmul %24, %25, %cst_14 {dimension_numbers = #tpu.dot_dimension_numbers<[1], [0], [0], [1], [0, 0, 1, 1], [], []>} : vector<256x256xbf16>, vector<256x128xbf16>, vector<256x128xf32> -> vector<256x128xf32>
    %c0_15 = arith.constant 0 : index
    %c0_16 = arith.constant 0 : index
    %27 = vector.load %arg7[%c0_15, %c0_16] : memref<1x128xf32, #tpu.memory_space<vmem>>, vector<1x128xf32>
    %28 = vector.broadcast %27 : vector<1x128xf32> to vector<256x128xf32>
    %29 = arith.addf %26, %28 : vector<256x128xf32>
    %c0_17 = arith.constant 0 : index
    %c0_18 = arith.constant 0 : index
    %30 = vector.load %arg8[%c0_17, %c0_18] : memref<256x128xf32, #tpu.memory_space<vmem>>, vector<256x128xf32>
    tpu.vector_store %arg8[%c0_17, %c0_18], %29 {strides = array<i32>} : memref<256x128xf32, #tpu.memory_space<vmem>>, vector<256x128xf32>,
    return
  }
  func.func @transform_0(%arg0: i32) -> (i32, i32) {
    %c0_i32 = arith.constant 0 : i32
    %c0_i32_0 = arith.constant 0 : i32
    return %arg0, %c0_i32 : i32, i32
  }
  func.func @transform_1(%arg0: i32) -> (i32, i32) {
    %c0_i32 = arith.constant 0 : i32
    %c0_i32_0 = arith.constant 0 : i32
    %c0_i32_1 = arith.constant 0 : i32
    return %c0_i32, %c0_i32_0 : i32, i32
  }
  func.func @transform_2(%arg0: i32) -> (i32, i32) {
    %c0_i32 = arith.constant 0 : i32
    %c0_i32_0 = arith.constant 0 : i32
    %c0_i32_1 = arith.constant 0 : i32
    return %c0_i32, %c0_i32_0 : i32, i32
  }
  func.func @transform_3(%arg0: i32) -> (i32, i32) {
    %c0_i32 = arith.constant 0 : i32
    %c0_i32_0 = arith.constant 0 : i32
    %c0_i32_1 = arith.constant 0 : i32
    return %c0_i32, %c0_i32_0 : i32, i32
  }
  func.func @transform_4(%arg0: i32) -> (i32, i32) {
    %c0_i32 = arith.constant 0 : i32
    %c0_i32_0 = arith.constant 0 : i32
    %c0_i32_1 = arith.constant 0 : i32
    return %c0_i32, %c0_i32_0 : i32, i32
  }
  func.func @transform_5(%arg0: i32) -> (i32, i32) {
    %c0_i32 = arith.constant 0 : i32
    %c0_i32_0 = arith.constant 0 : i32
    %c0_i32_1 = arith.constant 0 : i32
    return %c0_i32, %c0_i32_0 : i32, i32
  }
  func.func @transform_6(%arg0: i32) -> (i32, i32) {
    %c0_i32 = arith.constant 0 : i32
    %c0_i32_0 = arith.constant 0 : i32
    %c0_i32_1 = arith.constant 0 : i32
    return %c0_i32, %c0_i32_0 : i32, i32
  }
  func.func @transform_7(%arg0: i32) -> (i32, i32) {
    %c0_i32 = arith.constant 0 : i32
    %c0_i32_0 = arith.constant 0 : i32
    return %arg0, %c0_i32 : i32, i32
  }
}

</mosaic_0001>

<bundles_post_ra>
// kernel: tpu_custom_call.1
= control target key start
LH: loop header
LB: loop body
LE: loop exit
PB: predicated region body
PF: predicated region fallthrough
CT: control target
= control target key end

     0   :  { %s10211_s0 = inlined_call_operand.hbm [shape: bf16[512,128], index: 0, kind: input, shape index: {}]   ;;  %s10212_s1 = inlined_call_operand.hbm [shape: bf16[128,256], index: 1, kind: input, shape index: {}]   ;;  %s10213_s2 = inlined_call_operand.hbm [shape: f32[1,256], index: 2, kind: input, shape index: {}]   ;;  %s10214_s3 = inlined_call_operand.hbm [shape: bf16[256,256], index: 3, kind: input, shape index: {}]   ;;  %s10215_s4 = inlined_call_operand.vmem [shape: f32[1,256], index: 4, kind: input, shape index: {}]   ;;  %s10216_s5 = inlined_call_operand.hbm [shape: bf16[256,128], index: 5, kind: input, shape index: {}]   ;;  %s10217_s6 = inlined_call_operand.vmem [shape: f32[1,128], index: 6, kind: input, shape index: {}]   ;;  %s10218_s7 = inlined_call_operand.hbm [shape: f32[512,128], index: 7, kind: output, shape index: {}]  }
   0x1   :  { %10237 = sst [smem:[#allocation29_spill]] %s10212_s1 }
   0x2   :  { %12 = vsyncpa [#allocation3], 0 }
   0x3   :  { %14 = vsyncpa [#allocation3 + $0x1], 0 }
   0x4   :  { %15 = vsyncpa [#allocation6], 0 }
   0x5   :  { %16 = vsyncpa [#allocation9], 0 }
   0x6   :  { %17 = vsyncpa [#allocation4], 0 }
   0x7   :  { %19 = vsyncpa [#allocation4 + $0x1], 0  ;;  %s5856_s24 = smov 0   ;;  %s5858_s25 = smov 0  }
   0x8   :  { %s5860_s26 = smov 0   ;;  %s5862_s27 = smov 0  }
   0x9 LB: > { %s5877_s28 = sadd.s32 4294967295, %s5804_s27   ;;  %s4420_s29 = sadd.s32 4294967294, %s5804_s27   ;;  %s5804_s27 = sphi %s5862_s27, %s10584_s27   ;;  %s5800_s26 = sphi %s5860_s26, %s10583_s26   ;;  %s5796_s25 = sphi %s5858_s25, %s10582_s25   ;;  %s5792_s24 = sphi %s5856_s24, %s10581_s24  }
   0xa   : > { %p45_p0 = scmp.ne.s32.totalorder %s5796_s25, %s5792_s24  ;;  %p46_p1 = scmp.eq.s32.totalorder %s5877_s28, 0 }
   0xb   : > { %p195_p2 = scmp.eq.s32.totalorder %s5877_s28, 1  ;;  %p201_p3 = scmp.eq.s32.totalorder %s4420_s29, 1 }
   0xc   : > { %p5886_p4 = por %p46_p1, %p45_p0  ;;  %p4421_p5 = scmp.ge.s32.totalorder %s5804_s27, 1 }
   0xd   : > { %p5891_p6 = por %p201_p3, %p45_p0  ;;  %p208_p7 = scmp.lt.s32.totalorder %s5804_s27, 3 }
   0xe   : > { %s10240_s1 = sld [smem:[#allocation29_spill]]  ;;  %s5806_s13 = smov [#allocation5]  }
   0xf   : > { %p5899_p8 = pnand %p4421_p5, %p208_p7  ;;  %s221_s14 = sshll.u32 %s5806_s13, 4  ;;  %s222_s14 = int_to_ptr.vmem [resolvable:$true] %s221_s14 }
  0x10   : > { %s245_s18 = sshll.u32 %s10214_s3, 4  ;;  %s5807_s19 = smov 128   ;;  %s246_s18 = int_to_ptr.hbm [resolvable:$true] %s245_s18 }
  0x11   : > { %p4992_p9 = pneg %p5899_p8  ;;  %s5808_s20 = smov 8  }
  0x12   : > { %s5809_s21 = smov [#allocation8]   ;;  %s234_s9 = sshll.u32 %s10213_s2, 4  ;;  %s235_s9 = int_to_ptr.hbm [resolvable:$true] %s234_s9 }
  0x13   : > { %p5907_p10 = pnand %p4992_p9, %p46_p1  ;;  %s247_s22 = sshll.u32 %s5809_s21, 4  ;;  %s248_s22 = int_to_ptr.vmem [resolvable:$true] %s247_s22 }
  0x14   : > { %s219_s11 = sshll.u32 %s10240_s1, 4  ;;  %s262_s16 = sshll.u32 %s10216_s5, 4  ;;  %s220_s11 = int_to_ptr.hbm [resolvable:$true] %s219_s11  ;;  %s263_s16 = int_to_ptr.hbm [resolvable:$true] %s262_s16 }
  0x15   : > { %4995 = dma.hbm_to_vmem [thread:$0]  (!%p5907_p10), %s220_s11, 2048, %s222_s14, [#allocation6], %s5807_s19, %s5807_s19, %s5808_s20  }
  0x16   : > { %5001 = dma.hbm_to_vmem [thread:$0]  (!%p5907_p10), %s246_s18, 4096, %s248_s22, [#allocation9], %s5807_s19, %s5807_s19, %s5808_s20  }
  0x17   : > { %s5810_s11 = smov [#allocation7]   ;;  %s5811_s17 = smov [#allocation10]  }
  0x18   : > { %s236_s14 = sshll.u32 %s5810_s11, 4  ;;  %s264_s18 = sshll.u32 %s5811_s17, 4  ;;  %s237_s14 = int_to_ptr.vmem [resolvable:$true] %s236_s14  ;;  %s265_s18 = int_to_ptr.vmem [resolvable:$true] %s264_s18 }
  0x19   : > { %4998 = dma.hbm_to_vmem [thread:$0]  (!%p5907_p10), %s235_s9, 32, %s237_s14, [#allocation6]  }
  0x1a   : > { %s10219_s19 = smov 64   ;;  %s10220_s20 = smov 4  }
  0x1b   : > { %5004 = dma.hbm_to_vmem [thread:$0]  (!%p5907_p10), %s263_s16, 2048, %s265_s18, [#allocation9], %s10219_s19, %s10219_s19, %s10220_s20  }
  0x1c   : > { %s5933_s21 = sadd.s32 1, %s5804_s27   ;;  %s32_s23 = sadd.s32 1, %s5800_s26 }
  0x1d   : > { %s29_s22 = ssub.s32 %s5804_s27, %s5933_s21  ;;  %p39_p13 = scmp.ne.s32.totalorder %s5800_s26, %s5796_s25 }
  0x1e   : > { %p30_p12 = scmp.eq.s32.totalorder %s29_s22, 0  ;;  %p40_p0 = scmp.eq.s32.totalorder %s5804_s27, 0 }
  0x1f   : > { %p5946_p5 = por %p195_p2, %p39_p13  ;;  %p5017_p7 = scmp.lt.s32.totalorder %s5804_s27, 2 }
  0x20   : > { %s5942_s29 = scalar_select %p30_p12, %s5800_s26, %s32_s23  }
  0x21   : > { %p41_p3 = por %p40_p0, %p39_p13  ;;  %s281_s15 = sand.u32 1, %s5800_s26  }
  0x22   : > { %s4427_s10 = sshll.u32 %s281_s15, 7  ;;  %s4890_s13 = sshll.u32 %s5804_s27, 7 }
  0x23   : > { %s290_s14 = scalar_lea.hbm %s10211_s0, %s4890_s13  ;;  %s285_s17 = scalar_lea.vmem [#allocation2], %s4427_s10 }
  0x24   : > { %s293_s18 = sshll.u32 %s285_s17, 4  ;;  %s291_s22 = sshll.u32 %s290_s14, 4  ;;  %s294_s18 = int_to_ptr.vmem [resolvable:$true] %s293_s18  ;;  %s292_s22 = int_to_ptr.hbm [resolvable:$true] %s291_s22 }
  0x25   : > { %p5956_p9 = pnand %p5017_p7, %p41_p3  ;;  %s282_s19 = scalar_lea.sflag [#allocation3], %s281_s15 }
  0x26   : > { %s5700_s20 = sshra.s32 %s292_s22, 4  ;;  %s5707_s16 = scalar_lea.hbm %s10211_s0, 256  ;;  %s5701_s20 = int_to_ptr.hbm [resolvable:$true] %s5700_s20 }
  0x27   : > { %s5702_s1 = scalar_lea.hbm %s5701_s20, 128  ;;  %p5704_p10 = pneg %p5956_p9 }
  0x28   : > { %p5703_p2 = scmp.ne.s32.totalorder %s5701_s20, %s5702_s1  ;;  %p5708_p0 = scmp.lt.s32.totalorder %s5701_s20, %s10211_s0 }
  0x29   : > { %p5709_p3 = scmp.lt.s32.totalorder %s5707_s16, %s5702_s1 }
  0x2a   : > { %p5705_p12 = pnand %p5704_p10, %p5703_p2 }
  0x2b   : > { %p5710_p7 = por %p5709_p3, %p5708_p0 }
  0x2c   : > { %p5706_p13 = pneg %p5705_p12 }
  0x2e   : > { %p5711_p11 = pnand %p5710_p7, %p5706_p13 }
  0x30   : > { %5714 = shalt.err (!%p5711_p11)
}
  0x31   : > { %s10245_s15 = smov 4   ;;  %s10246_s17 = smov 64  }
  0x32   : > { %5008 = dma.hbm_to_vmem [thread:$0]  (!%p5956_p9), %s292_s22, 2048, %s294_s18, %s282_s19, %s10246_s17, %s10246_s17, %s10245_s15  }
  0x33   : > { %305 = sbr.rel (%p5899_p8) target bundleno = 1045 (0x415), region = 48 }
  0x38   : > { %s5976_s13 = sand.u32 1, %s5796_s25  }
  0x39   : > { %s4431_s20 = sshll.u32 %s5976_s13, 7  ;;  %s308_s1 = scalar_lea.sflag [#allocation3], %s5976_s13 }
  0x3a   : > { %s5980_s10 = scalar_lea.vmem [#allocation2], %s4431_s20 }
  0x3b   : > { %5775 = dma.done.wait (%p5886_p4), %s308_s1, 2048  }
  0x3c   : > { %5777 = vsyncadd (%p5886_p4), %s308_s1, 4294965248 }
  0x3d   : > { %5779 = dma.done.wait (%p46_p1), [#allocation6], 2080  }
  0x3e   : > { %5781 = vsyncadd (%p46_p1), [#allocation6], 4294965216 }
  0x3f   : > { %5783 = dma.done.wait (%p46_p1), [#allocation9], 6144  }
  0x40   : > { %5785 = vsyncadd (%p46_p1), [#allocation9], 4294961152  ;;  %v4559_v0 = vld [vmem:[#allocation5 + $0x70] sm:$0xf]  ;;  %v4922_v1 = vld [vmem:[#allocation5 + $0x74] sm:$0xf0] }
  0x41   : > { %v4921_v2 = vld [vmem:[#allocation5 + $0x74] sm:$0xf]  ;;  %v4560_v3 = vor.u32 %v4922_v1, %v4559_v0  ;;  %v4561_v4 = vld [vmem:[#allocation5 + $0x78] sm:$0xf0]  ;;  %v4551_v5 = vld [vmem:[#allocation5 + $0x60] sm:$0xf] }
  0x42   : > { %v4920_v6 = vld [vmem:[#allocation5 + $0x64] sm:$0xf0]  ;;  %v4564_v7 = vor.u32 %v4921_v2, %v4561_v4  ;;  %v4919_v8 = vld [vmem:[#allocation5 + $0x64] sm:$0xf]  ;;  %v4553_v9 = vld [vmem:[#allocation5 + $0x68] sm:$0xf0] }
  0x43   : > { %595 = vmatpush.bf16.msra.mxu0 %v4560_v3  ;;  %v4552_v10 = vor.u32 %v4920_v6, %v4551_v5  ;;  %v4556_v11 = vor.u32 %v4919_v8, %v4553_v9  ;;  %v4543_v12 = vld [vmem:[#allocation5 + $0x50] sm:$0xf]  ;;  %v4918_v13 = vld [vmem:[#allocation5 + $0x54] sm:$0xf0]  ;;  %v4917_v14 = vld [vmem:[#allocation5 + $0x54] sm:$0xf] }
  0x44   : > { %684 = vmatpush.bf16.msra.mxu1 %v4564_v7  ;;  %v4545_v15 = vld [vmem:[#allocation5 + $0x58] sm:$0xf0]  ;;  %v4544_v16 = vor.u32 %v4918_v13, %v4543_v12  ;;  %v4535_v18 = vld [vmem:[#allocation5 + $0x40] sm:$0xf]  ;;  %v4916_v19 = vld [vmem:[#allocation5 + $0x44] sm:$0xf0] }
  0x45   : > { %v4548_v17 = vor.u32 %v4917_v14, %v4545_v15  ;;  %v4915_v20 = vld [vmem:[#allocation5 + $0x44] sm:$0xf]  ;;  %v4537_v21 = vld [vmem:[#allocation5 + $0x48] sm:$0xf0]  ;;  %v4536_v22 = vor.u32 %v4916_v19, %v4535_v18  ;;  %v4527_v24 = vld [vmem:[#allocation5 + $0x30] sm:$0xf] }
  0x46   : > { %v4540_v23 = vor.u32 %v4915_v20, %v4537_v21  ;;  %v4914_v25 = vld [vmem:[#allocation5 + $0x34] sm:$0xf0]  ;;  %v4913_v26 = vld [vmem:[#allocation5 + $0x34] sm:$0xf]  ;;  %v4529_v27 = vld [vmem:[#allocation5 + $0x38] sm:$0xf0] }
  0x47   : > { %596 = vmatpush.bf16.msra.mxu0 %v4552_v10  ;;  %v4528_v28 = vor.u32 %v4914_v25, %v4527_v24  ;;  %v4532_v29 = vor.u32 %v4913_v26, %v4529_v27  ;;  %v4519_v30 = vld [vmem:[#allocation5 + $0x20] sm:$0xf]  ;;  %v4912_v31 = vld [vmem:[#allocation5 + $0x24] sm:$0xf0]  ;;  %v4911_v32 = vld [vmem:[#allocation5 + $0x24] sm:$0xf] }
  0x48   : > { %685 = vmatpush.bf16.msra.mxu1 %v4556_v11  ;;  %v4521_v33 = vld [vmem:[#allocation5 + $0x28] sm:$0xf0]  ;;  %v4520_v34 = vor.u32 %v4912_v31, %v4519_v30  ;;  %v4511_v36 = vld [vmem:[#allocation5 + $0x10] sm:$0xf]  ;;  %v4910_v37 = vld [vmem:[#allocation5 + $0x14] sm:$0xf0] }
  0x49   : > { %v4524_v35 = vor.u32 %v4911_v32, %v4521_v33  ;;  %v4909_v38 = vld [vmem:[#allocation5 + $0x14] sm:$0xf]  ;;  %v4513_v39 = vld [vmem:[#allocation5 + $0x18] sm:$0xf0]  ;;  %v4512_v40 = vor.u32 %v4910_v37, %v4511_v36  ;;  %v4503_v42 = vld [vmem:[#allocation5] sm:$0xf] }
  0x4a   : > { %v4516_v41 = vor.u32 %v4909_v38, %v4513_v39  ;;  %v4908_v43 = vld [vmem:[#allocation5 + $0x4] sm:$0xf0]  ;;  %v4907_v44 = vld [vmem:[#allocation5 + $0x4] sm:$0xf]  ;;  %v4505_v45 = vld [vmem:[#allocation5 + $0x8] sm:$0xf0] }
  0x4b   : > { %597 = vmatpush.bf16.msra.mxu0 %v4544_v16  ;;  %v4937_v46 = vld [vmem:[#allocation8 + $0x74] sm:$0xf]  ;;  %v4689_v47 = vld [vmem:[#allocation8 + $0x78] sm:$0xf0]  ;;  %v4504_v50 = vor.u32 %v4908_v43, %v4503_v42  ;;  %v4508_v51 = vor.u32 %v4907_v44, %v4505_v45  ;;  %v4935_v55 = vld [vmem:[#allocation8 + $0x64] sm:$0xf] }
  0x4c   : > { %686 = vmatpush.bf16.msra.mxu1 %v4548_v17  ;;  %v4953_v48 = vld [vmem:[#allocation8 + $0xf4] sm:$0xf]  ;;  %v4753_v49 = vld [vmem:[#allocation8 + $0xf8] sm:$0xf0]  ;;  %v4692_v52 = vor.u32 %v4937_v46, %v4689_v47  ;;  %v4681_v56 = vld [vmem:[#allocation8 + $0x68] sm:$0xf0] }
  0x4d   : > { %v4756_v53 = vor.u32 %v4953_v48, %v4753_v49  ;;  %v4891_v54 = vld [vmem:[%s5980_s10] sm:$0xff]  ;;  %v4684_v58 = vor.u32 %v4935_v55, %v4681_v56  ;;  %v4745_v59 = vld [vmem:[#allocation8 + $0xe8] sm:$0xf0]  ;;  %v4933_v63 = vld [vmem:[#allocation8 + $0x54] sm:$0xf]  ;;  %s4436_s16 = sshll.u32 %s5976_s13, 8 }
  0x4e   : > { %v4951_v57 = vld [vmem:[#allocation8 + $0xe4] sm:$0xf]  ;;  %v4893_v62 = vld [vmem:[%s5980_s10 + $0x10] sm:$0xff]  ;;  %v4673_v0 = vld [vmem:[#allocation8 + $0x58] sm:$0xf0]  ;;  %s9752_s11 = scalar_lea.vmem [#allocation11], %s4436_s16 }
  0x4f   : > { %598 = vmatpush.bf16.msra.mxu0 %v4536_v22  ;;  %v4748_v60 = vor.u32 %v4951_v57, %v4745_v59  ;;  %v4892_v61 = vld [vmem:[%s5980_s10 + $0x8] sm:$0xff]  ;;  %v4949_v1 = vld [vmem:[#allocation8 + $0xd4] sm:$0xf]  ;;  %v4676_v2 = vor.u32 %v4933_v63, %v4673_v0  ;;  %v4737_v3 = vld [vmem:[#allocation8 + $0xd8] sm:$0xf0]  ;;  %s4971_s17 = sshll.u32 %s5877_s28, 8 }
  0x50   : > { %687 = vmatpush.bf16.msra.mxu1 %v4540_v23  ;;  %v4740_v4 = vor.u32 %v4949_v1, %v4737_v3  ;;  %v4894_v5 = vld [vmem:[%s5980_s10 + $0x18] sm:$0xff]  ;;  %v4895_v6 = vld [vmem:[%s5980_s10 + $0x20] sm:$0xff]  ;;  %v4665_v8 = vld [vmem:[#allocation8 + $0x48] sm:$0xf0]  ;;  %s4306_s30 = sshll.u32 %s9752_s11, 4  ;;  %s4294_s19 = scalar_lea.sflag [#allocation4], %s5976_s13  ;;  %s4307_s30 = int_to_ptr.vmem [resolvable:$true] %s4306_s30 }
  0x51   : > { %v4931_v7 = vld [vmem:[#allocation8 + $0x44] sm:$0xf]  ;;  %v4729_v11 = vld [vmem:[#allocation8 + $0xc8] sm:$0xf0]  ;;  %v4687_v15 = vld [vmem:[#allocation8 + $0x70] sm:$0xf] }
  0x52   : > { %v4947_v9 = vld [vmem:[#allocation8 + $0xc4] sm:$0xf]  ;;  %v4668_v10 = vor.u32 %v4931_v7, %v4665_v8  ;;  %v4897_v14 = vld [vmem:[%s5980_s10 + $0x30] sm:$0xff]  ;;  %v4938_v16 = vld [vmem:[#allocation8 + $0x74] sm:$0xf0]  ;;  %s5750_s16 = scalar_lea.hbm %s10218_s7, 512 }
  0x53   : > { %599 = vmatpush.bf16.msra.mxu0 %v4528_v28  ;;  %v4732_v12 = vor.u32 %v4947_v9, %v4729_v11  ;;  %v4896_v13 = vld [vmem:[%s5980_s10 + $0x28] sm:$0xff]  ;;  %v4751_v17 = vld [vmem:[#allocation8 + $0xf0] sm:$0xf]  ;;  %v4688_v18 = vor.u32 %v4938_v16, %v4687_v15  ;;  %v4954_v19 = vld [vmem:[#allocation8 + $0xf4] sm:$0xf0] }
  0x54   : > { %688 = vmatpush.bf16.msra.mxu1 %v4532_v29  ;;  %v4752_v20 = vor.u32 %v4954_v19, %v4751_v17  ;;  %v4898_v21 = vld [vmem:[%s5980_s10 + $0x38] sm:$0xff]  ;;  %v4679_v22 = vld [vmem:[#allocation8 + $0x60] sm:$0xf]  ;;  %v4936_v23 = vld [vmem:[#allocation8 + $0x64] sm:$0xf0] }
  0x55   : > { %2283 = vmatpush.bf16.msra.mxu2 %v4688_v18  ;;  %v4743_v24 = vld [vmem:[#allocation8 + $0xe0] sm:$0xf]  ;;  %v4680_v25 = vor.u32 %v4936_v23, %v4679_v22  ;;  %v4952_v26 = vld [vmem:[#allocation8 + $0xe4] sm:$0xf0]  ;;  %v4671_v28 = vld [vmem:[#allocation8 + $0x50] sm:$0xf] }
  0x56   : > { %2372 = vmatpush.bf16.msra.mxu3 %v4752_v20  ;;  %v4744_v27 = vor.u32 %v4952_v26, %v4743_v24  ;;  %v4934_v29 = vld [vmem:[#allocation8 + $0x54] sm:$0xf0]  ;;  %v4735_v31 = vld [vmem:[#allocation8 + $0xd0] sm:$0xf]  ;;  %v4932_v36 = vld [vmem:[#allocation8 + $0x44] sm:$0xf0] }
  0x57   : > { %600 = vmatpush.bf16.msra.mxu0 %v4520_v34  ;;  %v4672_v30 = vor.u32 %v4934_v29, %v4671_v28  ;;  %v4950_v32 = vld [vmem:[#allocation8 + $0xd4] sm:$0xf0]  ;;  %v413_v34 = vld [vmem:[#allocation7] sm:$0x3]  ;;  %v4727_v37 = vld [vmem:[#allocation8 + $0xc0] sm:$0xf] }
  0x58   : > { %689 = vmatpush.bf16.msra.mxu1 %v4524_v35  ;;  %v4736_v33 = vor.u32 %v4950_v32, %v4735_v31  ;;  %v4663_v35 = vld [vmem:[#allocation8 + $0x40] sm:$0xf]  ;;  %v4948_v39 = vld [vmem:[#allocation8 + $0xc4] sm:$0xf0]  ;;  %v4655_v42 = vld [vmem:[#allocation8 + $0x30] sm:$0xf] }
  0x59   : > { %2284 = vmatpush.bf16.msra.mxu2 %v4680_v25  ;;  %v4664_v38 = vor.u32 %v4932_v36, %v4663_v35  ;;  %v4930_v43 = vld [vmem:[#allocation8 + $0x34] sm:$0xf0]  ;;  %v4719_v44 = vld [vmem:[#allocation8 + $0xb0] sm:$0xf]  ;;  %v6004_v45 = vperm.slane %v413_v34, 1  ;;  %v4899_v48 = vld [vmem:[%s5980_s10 + $0x40] sm:$0xff] }
  0x5a   : > { %2373 = vmatpush.bf16.msra.mxu3 %v4744_v27  ;;  %v4656_v46 = vor.u32 %v4930_v43, %v4655_v42  ;;  %v4946_v47 = vld [vmem:[#allocation8 + $0xb4] sm:$0xf0]  ;;  %v4721_v57 = vld [vmem:[#allocation8 + $0xb8] sm:$0xf0]  ;;  %v4928_v59 = vld [vmem:[#allocation8 + $0x24] sm:$0xf0] }
  0x5b   : > { %601 = vmatpush.bf16.msra.mxu0 %v4512_v40  ;;  %v4728_v40 = vor.u32 %v4948_v39, %v4727_v37  ;;  %v4720_v49 = vor.u32 %v4946_v47, %v4719_v44  ;;  %v4711_v63 = vld [vmem:[#allocation8 + $0xa0] sm:$0xf]  ;;  %v4944_v0 = vld [vmem:[#allocation8 + $0xa4] sm:$0xf0]  ;;  %v4703_v7 = vld [vmem:[#allocation8 + $0x90] sm:$0xf] }
  0x5c   : > { %690 = vmatpush.bf16.msra.mxu1 %v4516_v41  ;;  %v6002_v41 = vperm.slane %v413_v34, 0  ;;  %v4942_v8 = vld [vmem:[#allocation8 + $0x94] sm:$0xf0]  ;;  %v4924_v15 = vld [vmem:[#allocation8 + $0x4] sm:$0xf0] }
  0x5d   : > { %2285 = vmatpush.bf16.msra.mxu2 %v4672_v30  ;;  %v4704_v9 = vor.u32 %v4942_v8, %v4703_v7  ;;  %v4695_v16 = vld [vmem:[#allocation8 + $0x80] sm:$0xf]  ;;  %v4940_v20 = vld [vmem:[#allocation8 + $0x84] sm:$0xf0] }
  0x5e   : > { %2374 = vmatpush.bf16.msra.mxu3 %v4736_v33  ;;  %v4696_v24 = vor.u32 %v4940_v20, %v4695_v16  ;;  %v4900_v26 = vld [vmem:[%s5980_s10 + $0x48] sm:$0xff] }
  0x5f   : > { %602 = vmatpush.bf16.msra.mxu0 %v4504_v50 }
  0x60   : > { %691 = vmatpush.bf16.msra.mxu1 %v4508_v51  ;;  %v4929_v51 = vld [vmem:[#allocation8 + $0x34] sm:$0xf] }
  0x61   : > { %2286 = vmatpush.bf16.msra.mxu2 %v4664_v38 }
  0x62   : > { %603 = vmatmul.bf16.vlgmr.msra.gmra.mxu0 %v4891_v54  ;;  %2375 = vmatpush.bf16.msra.mxu3 %v4728_v40 }
  0x63   : > { %2461 = vmatpush.bf16.msrb.mxu0 %v4692_v52  ;;  %692 = vmatmul.bf16.vlgmr.msra.gmra.mxu1 %v4891_v54  ;;  %v4657_v52 = vld [vmem:[#allocation8 + $0x38] sm:$0xf0] }
  0x64   : > { %2550 = vmatpush.bf16.msrb.mxu1 %v4756_v53  ;;  %v4945_v53 = vld [vmem:[#allocation8 + $0xb4] sm:$0xf]  ;;  %v4660_v56 = vor.u32 %v4929_v51, %v4657_v52 }
  0x65   : > { %2287 = vmatpush.bf16.msra.mxu2 %v4656_v46 }
  0x66   : > { %2376 = vmatpush.bf16.msra.mxu3 %v4720_v49 }
  0x67   : > { %2462 = vmatpush.bf16.msrb.mxu0 %v4684_v58  ;;  %v4647_v58 = vld [vmem:[#allocation8 + $0x20] sm:$0xf] }
  0x68   : > { %2551 = vmatpush.bf16.msrb.mxu1 %v4748_v60 }
  0x6b   : > { %2463 = vmatpush.bf16.msrb.mxu0 %v4676_v2  ;;  %v4712_v2 = vor.u32 %v4944_v0, %v4711_v63 }
  0x6c   : > { %2552 = vmatpush.bf16.msrb.mxu1 %v4740_v4  ;;  %v4639_v4 = vld [vmem:[#allocation8 + $0x10] sm:$0xf] }
  0x6d   : > { %2377 = vmatpush.bf16.msra.mxu3 %v4712_v2 }
  0x6f   : > { %2464 = vmatpush.bf16.msrb.mxu0 %v4668_v10 }
  0x70   : > { %2553 = vmatpush.bf16.msrb.mxu1 %v4732_v12 }
  0x71   : > { %2378 = vmatpush.bf16.msra.mxu3 %v4704_v9 }
  0x72   : > { %608 = vmatmul.bf16.gmra.mxu0 %v4892_v61 }
  0x73   : > { %697 = vmatmul.bf16.gmra.mxu1 %v4892_v61  ;;  %v4724_v61 = vor.u32 %v4945_v53, %v4721_v57  ;;  %2465 = vmatpush.bf16.msrb.mxu0 %v4660_v56 }
  0x75   : > { %2554 = vmatpush.bf16.msrb.mxu1 %v4724_v61  ;;  %2379 = vmatpush.bf16.msra.mxu3 %v4696_v24  ;;  %v4649_v24 = vld [vmem:[#allocation8 + $0x28] sm:$0xf0] }
  0x82   : > { %613 = vmatmul.bf16.gmra.mxu0 %v4893_v62 }
  0x83   : > { %702 = vmatmul.bf16.gmra.mxu1 %v4893_v62  ;;  %v4648_v62 = vor.u32 %v4928_v59, %v4647_v58 }
  0x85   : > { %2288 = vmatpush.bf16.msra.mxu2 %v4648_v62 }
  0x92   : > { %618 = vmatmul.bf16.gmra.mxu0 %v4894_v5 }
  0x93   : > { %707 = vmatmul.bf16.gmra.mxu1 %v4894_v5  ;;  %v4926_v5 = vld [vmem:[#allocation8 + $0x14] sm:$0xf0] }
  0xa2   : > { %623 = vmatmul.bf16.gmra.mxu0 %v4895_v6 }
  0xa3   : > { %712 = vmatmul.bf16.gmra.mxu1 %v4895_v6  ;;  %v4640_v6 = vor.u32 %v4926_v5, %v4639_v4 }
  0xa5   : > { %2289 = vmatpush.bf16.msra.mxu2 %v4640_v6 }
  0xb2   : > { %628 = vmatmul.bf16.gmra.mxu0 %v4896_v13 }
  0xb3   : > { %717 = vmatmul.bf16.gmra.mxu1 %v4896_v13 }
  0xc2   : > { %633 = vmatmul.bf16.gmra.mxu0 %v4897_v14 }
  0xc3   : > { %722 = vmatmul.bf16.gmra.mxu1 %v4897_v14  ;;  %v4631_v14 = vld [vmem:[#allocation8] sm:$0xf] }
  0xc4   : > { %v4632_v19 = vor.u32 %v4924_v15, %v4631_v14  ;;  %v4927_v15 = vld [vmem:[#allocation8 + $0x24] sm:$0xf] }
  0xc6   : > { %2290 = vmatpush.bf16.msra.mxu2 %v4632_v19  ;;  %v4962_v19 = vld [vmem:[#allocation10 + $0x38] sm:$0xff] }
  0xca   : > { %4083 = vmatpush.bf16.msrb.mxu2 %v4962_v19 }
  0xd2   : > { %638 = vmatmul.bf16.gmra.mxu0 %v4898_v21 }
  0xd3   : > { %727 = vmatmul.bf16.gmra.mxu1 %v4898_v21 }
  0xdf   : > { %v604_v50 = vpop.f32.mrf.mxu0 }
  0xe0   : > { %v6008_v54 = vadd.f32 %v604_v50, %v6002_v41  ;;  %v693_v55 = vpop.f32.mrf.mxu1 }
  0xe1   : > { %v6011_v60 = vadd.f32 %v693_v55, %v6004_v45 }
  0xe2   : > { %v4565_v1 = vmul.f32 -1.442695, %v6008_v54  ;;  %643 = vmatmul.bf16.gmra.mxu0 %v4899_v48 }
  0xe3   : > { %v4566_v3 = vmul.f32 -1.442695, %v6011_v60  ;;  %732 = vmatmul.bf16.gmra.mxu1 %v4899_v48 }
  0xe4   : > { %5066 = vpow2.f32 %v4565_v1  ;;  %v4901_v1 = vld [vmem:[%s5980_s10 + $0x50] sm:$0xff] }
  0xe5   : > { %5068 = vpow2.f32 %v4566_v3 }
  0xe7   : > { %v606_v10 = vpop.f32.mrf.mxu0 }
  0xe8   : > { %v6016_v11 = vadd.f32 %v606_v10, %v6002_v41  ;;  %v695_v12 = vpop.f32.mrf.mxu1 }
  0xe9   : > { %v6019_v13 = vadd.f32 %v695_v12, %v6004_v45 }
  0xea   : > { %v5067_v17 = vpop.eup %5066  ;;  %v4567_v18 = vmul.f32 -1.442695, %v6016_v11 }
  0xeb   : > { %v5069_v21 = vpop.eup %5068  ;;  %v6022_v22 = vadd.f32 1.0, %v5067_v17  ;;  %v4568_v23 = vmul.f32 -1.442695, %v6019_v13 }
  0xec   : > { %v6025_v25 = vadd.f32 1.0, %v5069_v21  ;;  %5070 = vpow2.f32 %v4567_v18 }
  0xed   : > { %5072 = vrcp.f32 %v6022_v22  ;;  %v1038_v53 = vand.u32 2147483647, %v6022_v22  ;;  %v1040_v55 = vand.u32 2147483648, %v6022_v22  ;;  %vm1034_vm0 = vweird.f32 %v6022_v22 }
  0xee   : > { %5074 = vrcp.f32 %v6025_v25  ;;  %v1053_v61 = vand.u32 2147483647, %v6025_v25  ;;  %vm1049_vm2 = vweird.f32 %v6025_v25  ;;  %v1055_v4 = vand.u32 2147483648, %v6025_v25 }
  0xef   : > { %5076 = vpow2.f32 %v4568_v23  ;;  %v609_v27 = vpop.f32.mrf.mxu0  ;;  %vm6080_vm3 = vcmp.eq.f32.partialorder %v1038_v53, 8.507059e+37  ;;  %v1041_v3 = vor.u32 1.1754944e-38, %v1040_v55 }
  0xf0   : > { %v6031_v28 = vadd.f32 %v609_v27, %v6002_v41  ;;  %v698_v29 = vpop.f32.mrf.mxu1  ;;  %vm6097_vm7 = vcmp.eq.f32.partialorder %v1053_v61, 8.507059e+37 }
  0xf1   : > { %v6035_v32 = vadd.f32 %v698_v29, %v6004_v45 }
  0xf2   : > { %v5071_v30 = vpop.eup %5070  ;;  %v4569_v31 = vmul.f32 -1.442695, %v6031_v28  ;;  %648 = vmatmul.bf16.gmra.mxu0 %v4900_v26 }
  0xf3   : > { %v6037_v33 = vpop.eup %5072  ;;  %v6039_v34 = vadd.f32 1.0, %v5071_v30  ;;  %737 = vmatmul.bf16.gmra.mxu1 %v4900_v26  ;;  %v4570_v42 = vmul.f32 -1.442695, %v6035_v32  ;;  %v4943_v26 = vld [vmem:[#allocation8 + $0xa4] sm:$0xf] }
  0xf4   : > { %v6041_v35 = vpop.eup %5074  ;;  %v1030_v36 = vmul.f32 %v6037_v33, %v6022_v22  ;;  %5078 = vpow2.f32 %v4569_v31  ;;  %vm1035_vm1 = vweird.f32 %v6037_v33 }
  0xf5   : > { %v5077_v37 = vpop.eup %5076  ;;  %v1045_v38 = vmul.f32 %v6041_v35, %v6025_v25  ;;  %5080 = vrcp.f32 %v6039_v34  ;;  %v1070_v62 = vand.u32 2147483648, %v6039_v34  ;;  %vm1050_vm4 = vweird.f32 %v6041_v35  ;;  %vm6092_vm6 = vmor %vm1034_vm0, %vm1035_vm1 }
  0xf6   : > { %v1031_v39 = vsub.f32 1.0, %v1030_v36  ;;  %v6048_v40 = vadd.f32 1.0, %v5077_v37  ;;  %vm1064_vm5 = vweird.f32 %v6039_v34  ;;  %v1068_v16 = vand.u32 2147483647, %v6039_v34  ;;  %v4713_v37 = vld [vmem:[#allocation8 + $0xa8] sm:$0xf0]  ;;  %vm6127_vm9 = vmor %vm1049_vm2, %vm1050_vm4 }
  0xf7   : > { %v611_v43 = vpop.f32.mrf.mxu0  ;;  %v1046_v47 = vsub.f32 1.0, %v1045_v38  ;;  %v1071_v17 = vor.u32 1.1754944e-38, %v1070_v62  ;;  %v4652_v36 = vor.u32 %v4927_v15, %v4649_v24 }
  0xf8   : > { %5082 = vrcp.f32 %v6048_v40  ;;  %v6053_v44 = vadd.f32 %v611_v43, %v6002_v41  ;;  %v700_v46 = vpop.f32.mrf.mxu1  ;;  %v1032_v50 = vmul.f32 %v6037_v33, %v1031_v39  ;;  %v1085_v55 = vand.u32 2147483648, %v6048_v40 }
  0xf9   : > { %v6056_v48 = vadd.f32 %v700_v46, %v6004_v45  ;;  %5084 = vpow2.f32 %v4570_v42  ;;  %v1047_v59 = vmul.f32 %v6041_v35, %v1046_v47  ;;  %v1083_v42 = vand.u32 2147483647, %v6048_v40  ;;  %2466 = vmatpush.bf16.msrb.mxu0 %v4652_v36 }
  0xfa   : > { %v5079_v49 = vpop.eup %5078  ;;  %v4571_v51 = vmul.f32 -1.442695, %v6053_v44  ;;  %v1033_v0 = vadd.f32 %v6037_v33, %v1032_v50  ;;  %v4716_v46 = vor.u32 %v4943_v26, %v4713_v37  ;;  %vm1069_vm12 = vcmp.eq.f32.partialorder %v1068_v16, 8.507059e+37 }
  0xfb   : > { %v6060_v52 = vpop.eup %5080  ;;  %v6064_v56 = vadd.f32 1.0, %v5079_v49  ;;  %v4572_v57 = vmul.f32 -1.442695, %v6056_v48  ;;  %v1048_v12 = vadd.f32 %v6041_v35, %v1047_v59  ;;  %v1056_v59 = vor.u32 1.1754944e-38, %v1055_v4 }
  0xfc   : > { %5086 = vpow2.f32 %v4571_v51  ;;  %v1060_v58 = vmul.f32 %v6060_v52, %v6039_v34  ;;  %v1037_v21 = vsel %vm6092_vm6, %v6037_v33, %v1033_v0  ;;  %vm1065_vm8 = vweird.f32 %v6060_v52  ;;  %v4970_v33 = vld [vmem:[#allocation10 + $0x78] sm:$0xff]  ;;  %2555 = vmatpush.bf16.msrb.mxu1 %v4716_v46 }
  0xfd   : > { %5088 = vrcp.f32 %v6064_v56  ;;  %4172 = vmatpush.bf16.msrb.mxu3 %v4970_v33  ;;  %v1042_v51 = vsel %vm6080_vm3, %v1041_v3, %v1037_v21  ;;  %v1052_v25 = vsel %vm6127_vm9, %v6041_v35, %v1048_v12  ;;  %vm6142_vm10 = vmor %vm1064_vm5, %vm1065_vm8  ;;  %vm1079_vm13 = vweird.f32 %v6048_v40 }
  0xfe   : > { %v6073_v63 = vpop.eup %5082  ;;  %v1061_v6 = vsub.f32 1.0, %v1060_v58  ;;  %5090 = vpow2.f32 %v4572_v57  ;;  %vm1084_vm15 = vcmp.eq.f32.partialorder %v1083_v42, 8.507059e+37  ;;  %vm1094_vm1 = vweird.f32 %v6064_v56 }
  0xff   : > { %v614_v5 = vpop.f32.mrf.mxu0  ;;  %v5085_v7 = vpop.eup %5084  ;;  %v1075_v18 = vmul.f32 %v6073_v63, %v6048_v40  ;;  %vm1080_vm11 = vweird.f32 %v6073_v63 }
 0x100   : > { %v6087_v8 = vadd.f32 %v614_v5, %v6002_v41  ;;  %v703_v9 = vpop.f32.mrf.mxu1  ;;  %v1062_v27 = vmul.f32 %v6060_v52, %v1061_v6  ;;  %v6114_v30 = vadd.f32 1.0, %v5085_v7  ;;  %v1057_v5 = vsel %vm6097_vm7, %v1056_v59, %v1052_v25  ;;  %vm1081_vm14 = vmor %vm1079_vm13, %vm1080_vm11 }
 0x101   : > { %v6109_v23 = vadd.f32 %v703_v9, %v6004_v45  ;;  %v1076_v49 = vsub.f32 1.0, %v1075_v18  ;;  %v1086_v6 = vor.u32 1.1754944e-38, %v1085_v55 }
 0x102   : > { %v5087_v20 = vpop.eup %5086  ;;  %v4573_v22 = vmul.f32 -1.442695, %v6087_v8  ;;  %653 = vmatmul.bf16.gmra.mxu0 %v4901_v1  ;;  %v1063_v47 = vadd.f32 %v6060_v52, %v1062_v27  ;;  %v1100_v27 = vand.u32 2147483648, %v6064_v56  ;;  %vm1109_vm9 = vweird.f32 %v6114_v30 }
 0x103   : > { %v6112_v29 = vpop.eup %5088  ;;  %v6116_v31 = vadd.f32 1.0, %v5087_v20  ;;  %742 = vmatmul.bf16.gmra.mxu1 %v4901_v1  ;;  %v4574_v39 = vmul.f32 -1.442695, %v6109_v23  ;;  %v1077_v35 = vmul.f32 %v6073_v63, %v1076_v49 }
 0x104   : > { %v1090_v38 = vmul.f32 %v6112_v29, %v6064_v56  ;;  %5092 = vpow2.f32 %v4573_v22  ;;  %v5091_v50 = vpop.eup %5090  ;;  %v1067_v58 = vsel %vm6142_vm10, %v6060_v52, %v1063_v47  ;;  %v1989_v52 = vmul.f32 %v1042_v51, %v6008_v54 }
 0x105   : > { %5094 = vrcp.f32 %v6116_v31  ;;  %v6154_v62 = vadd.f32 1.0, %v5091_v50  ;;  %v1072_v1 = vsel %vm1069_vm12, %v1071_v17, %v1067_v58  ;;  %v1078_v2 = vadd.f32 %v6073_v63, %v1077_v35 }
 0x106   : > { %5096 = vpow2.f32 %v4574_v39  ;;  %v1091_v34 = vsub.f32 1.0, %v1090_v38  ;;  %v1991_v4 = vmul.f32 %v1072_v1, %v6016_v11  ;;  %v1990_v17 = vmul.f32 %v1057_v5, %v6011_v60 }
 0x107   : > { %5098 = vrcp.f32 %v6114_v30  ;;  %v616_v57 = vpop.f32.mrf.mxu0  ;;  %v1082_v10 = vsel %vm1081_vm14, %v6073_v63, %v1078_v2  ;;  %v4902_v63 = vld [vmem:[%s5980_s10 + $0x58] sm:$0xff]  ;;  %vm1095_vm0 = vweird.f32 %v6112_v29  ;;  %v1098_v39 = vand.u32 2147483647, %v6064_v56 }
 0x108   : > { %v705_v61 = vpop.f32.mrf.mxu1  ;;  %v6157_v0 = vadd.f32 %v616_v57, %v6002_v41  ;;  %v1092_v54 = vmul.f32 %v6112_v29, %v1091_v34  ;;  %v6174_v15 = vpack.c.bf16 %v1991_v4, %v1989_v52  ;;  %v1087_v11 = vsel %vm1084_vm15, %v1086_v6, %v1082_v10  ;;  %vm6205_vm2 = vmor %vm1094_vm1, %vm1095_vm0 }
 0x109   : > { %v6172_v14 = vadd.f32 %v705_v61, %v6004_v45  ;;  %5100 = vrcp.f32 %v6154_v62  ;;  %v1992_v19 = vmul.f32 %v1087_v11, %v6019_v13  ;;  %v1130_v25 = vand.u32 2147483648, %v6116_v31 }
 0x10a   : > { %v5093_v3 = vpop.eup %5092  ;;  %v4575_v9 = vmul.f32 -1.442695, %v6157_v0  ;;  %2291 = vmatmul.bf16.vlgmr.msra.gmra.mxu2 %v6174_v15  ;;  %v1093_v22 = vadd.f32 %v6112_v29, %v1092_v54  ;;  %v1101_v53 = vor.u32 1.1754944e-38, %v1100_v27  ;;  %v1128_v55 = vand.u32 2147483647, %v6116_v31 }
 0x10b   : > { %v6164_v40 = vpop.eup %5094  ;;  %v6166_v7 = vadd.f32 1.0, %v5093_v3  ;;  %v4576_v24 = vmul.f32 -1.442695, %v6172_v14  ;;  %v6195_v36 = vpack.c.bf16 %v1992_v19, %v1990_v17  ;;  %vm1099_vm4 = vcmp.eq.f32.partialorder %v1098_v39, 8.507059e+37 }
 0x10c   : > { %v5097_v12 = vpop.eup %5096  ;;  %v1120_v21 = vmul.f32 %v6164_v40, %v6116_v31  ;;  %v1097_v46 = vsel %vm6205_vm2, %v6112_v29, %v1093_v22  ;;  %vm1125_vm3 = vweird.f32 %v6164_v40  ;;  %vm1124_vm5 = vweird.f32 %v6116_v31 }
 0x10d   : > { %v6176_v16 = vpop.eup %5098  ;;  %5102 = vrcp.f32 %v6166_v7  ;;  %v6183_v18 = vadd.f32 1.0, %v5097_v12  ;;  %2380 = vmatmul.bf16.vlgmr.msra.gmra.mxu3 %v6195_v36  ;;  %v1102_v35 = vsel %vm1099_vm4, %v1101_v53, %v1097_v46  ;;  %vm1126_vm6 = vmor %vm1124_vm5, %vm1125_vm3  ;;  %v1131_v52 = vor.u32 1.1754944e-38, %v1130_v25 }
 0x10e   : > { %5104 = vpow2.f32 %v4575_v9  ;;  %v1105_v60 = vmul.f32 %v6176_v16, %v6114_v30  ;;  %v1121_v42 = vsub.f32 1.0, %v1120_v21  ;;  %v1113_v4 = vand.u32 2147483647, %v6114_v30 }
 0x10f   : > { %v619_v20 = vpop.f32.mrf.mxu0  ;;  %v6203_v33 = vpop.eup %5100  ;;  %5106 = vrcp.f32 %v6183_v18  ;;  %vm1129_vm7 = vcmp.eq.f32.partialorder %v1128_v55, 8.507059e+37  ;;  %v1993_v9 = vmul.f32 %v1102_v35, %v6031_v28  ;;  %vm1110_vm8 = vweird.f32 %v6176_v16 }
 0x110   : > { %v708_v26 = vpop.f32.mrf.mxu1  ;;  %v6198_v13 = vadd.f32 %v619_v20, %v6002_v41  ;;  %v1106_v47 = vsub.f32 1.0, %v1105_v60  ;;  %5108 = vpow2.f32 %v4576_v24  ;;  %v1122_v56 = vmul.f32 %v6164_v40, %v1121_v42  ;;  %vm6266_vm11 = vmor %vm1109_vm9, %vm1110_vm8 }
 0x111   : > { %v6201_v37 = vadd.f32 %v708_v26, %v6004_v45  ;;  %v1135_v29 = vmul.f32 %v6203_v33, %v6154_v62  ;;  %v1115_v10 = vand.u32 2147483648, %v6114_v30  ;;  %vm6255_vm10 = vcmp.eq.f32.partialorder %v1113_v4, 8.507059e+37 }
 0x112   : > { %658 = vmatmul.bf16.gmra.mxu0 %v4902_v63  ;;  %v4577_v49 = vmul.f32 -1.442695, %v6198_v13  ;;  %v1123_v58 = vadd.f32 %v6164_v40, %v1122_v56  ;;  %v1107_v59 = vmul.f32 %v6176_v16, %v1106_v47  ;;  %vm1140_vm12 = vweird.f32 %v6203_v33 }
 0x113   : > { %747 = vmatmul.bf16.gmra.mxu1 %v4902_v63  ;;  %v6211_v43 = vpop.eup %5102  ;;  %v4578_v51 = vmul.f32 -1.442695, %v6201_v37  ;;  %v1136_v6 = vsub.f32 1.0, %v1135_v29  ;;  %v1116_v27 = vor.u32 1.1754944e-38, %v1115_v10  ;;  %v1158_v46 = vand.u32 2147483647, %v6166_v7 }
 0x114   : > { %v5105_v50 = vpop.eup %5104  ;;  %5110 = vpow2.f32 %v4577_v49  ;;  %v1150_v34 = vmul.f32 %v6211_v43, %v6166_v7  ;;  %v1127_v31 = vsel %vm1126_vm6, %v6164_v40, %v1123_v58  ;;  %v1108_v11 = vadd.f32 %v6176_v16, %v1107_v59 }
 0x115   : > { %v6230_v61 = vadd.f32 1.0, %v5105_v50  ;;  %v6234_v2 = vpop.eup %5106  ;;  %5112 = vpow2.f32 %v4578_v51  ;;  %v1132_v12 = vsel %vm1129_vm7, %v1131_v52, %v1127_v31  ;;  %v1137_v63 = vmul.f32 %v6203_v33, %v1136_v6  ;;  %v4925_v52 = vld [vmem:[#allocation8 + $0x14] sm:$0xf] }
 0x116   : > { %v5109_v5 = vpop.eup %5108  ;;  %v1995_v40 = vmul.f32 %v1132_v12, %v6053_v44  ;;  %v1151_v19 = vsub.f32 1.0, %v1150_v34  ;;  %v1165_v28 = vmul.f32 %v6234_v2, %v6183_v18  ;;  %v4903_v44 = vld [vmem:[%s5980_s10 + $0x60] sm:$0xff]  ;;  %v1112_v42 = vsel %vm6266_vm11, %v6176_v16, %v1108_v11  ;;  %v4961_v34 = vld [vmem:[#allocation10 + $0x30] sm:$0xff] }
 0x117   : > { %v621_v57 = vpop.f32.mrf.mxu0  ;;  %5114 = vrcp.f32 %v6230_v61  ;;  %v6270_v38 = vadd.f32 1.0, %v5109_v5  ;;  %v1138_v30 = vadd.f32 %v6203_v33, %v1137_v63  ;;  %v1160_v47 = vand.u32 2147483648, %v6166_v7  ;;  %v4641_v5 = vld [vmem:[#allocation8 + $0x18] sm:$0xf0]  ;;  %4084 = vmatpush.bf16.msrb.mxu2 %v4961_v34  ;;  %v4969_v12 = vld [vmem:[#allocation10 + $0x70] sm:$0xff] }
 0x118   : > { %v710_v1 = vpop.f32.mrf.mxu1  ;;  %v6237_v3 = vadd.f32 %v621_v57, %v6002_v41  ;;  %v6261_v60 = vpack.c.bf16 %v1995_v40, %v1993_v9  ;;  %v1152_v51 = vmul.f32 %v6211_v43, %v1151_v19  ;;  %v1166_v56 = vsub.f32 1.0, %v1165_v28  ;;  %v4705_v9 = vld [vmem:[#allocation8 + $0x98] sm:$0xf0]  ;;  %4173 = vmatpush.bf16.msrb.mxu3 %v4969_v12 }
 0x119   : > { %v6246_v17 = vadd.f32 %v710_v1, %v6004_v45  ;;  %vm1139_vm13 = vweird.f32 %v6154_v62  ;;  %v1143_v53 = vand.u32 2147483647, %v6154_v62  ;;  %v1145_v55 = vand.u32 2147483648, %v6154_v62 }
 0x11a   : > { %v5111_v54 = vpop.eup %5110  ;;  %v4579_v20 = vmul.f32 -1.442695, %v6237_v3  ;;  %2296 = vmatmul.bf16.gmra.mxu2 %v6261_v60  ;;  %vm6286_vm14 = vmor %vm1139_vm13, %vm1140_vm12  ;;  %v1117_v57 = vsel %vm6255_vm10, %v1116_v27, %v1112_v42  ;;  %v1153_v1 = vadd.f32 %v6211_v43, %v1152_v51  ;;  %vm1155_vm0 = vweird.f32 %v6211_v43 }
 0x11b   : > { %v6259_v22 = vadd.f32 1.0, %v5111_v54  ;;  %v5113_v24 = vpop.eup %5112  ;;  %v4580_v49 = vmul.f32 -1.442695, %v6246_v17  ;;  %v1142_v58 = vsel %vm6286_vm14, %v6203_v33, %v1138_v30  ;;  %vm1144_vm15 = vcmp.eq.f32.partialorder %v1143_v53, 8.507059e+37  ;;  %v4941_v33 = vld [vmem:[#allocation8 + $0x94] sm:$0xf] }
 0x11c   : > { %5116 = vpow2.f32 %v4579_v20  ;;  %v6284_v25 = vadd.f32 1.0, %v5113_v24  ;;  %v1146_v59 = vor.u32 1.1754944e-38, %v1145_v55  ;;  %v1167_v31 = vmul.f32 %v6234_v2, %v1166_v56 }
 0x11d   : > { %5118 = vrcp.f32 %v6259_v22  ;;  %v6292_v29 = vpop.eup %5114  ;;  %v1994_v11 = vmul.f32 %v1117_v57, %v6035_v32  ;;  %vm1154_vm1 = vweird.f32 %v6166_v7  ;;  %v1173_v40 = vand.u32 2147483647, %v6183_v18 }
 0x11e   : > { %5120 = vrcp.f32 %v6270_v38  ;;  %v1147_v4 = vsel %vm1144_vm15, %v1146_v59, %v1142_v58  ;;  %v1180_v10 = vmul.f32 %v6292_v29, %v6230_v61  ;;  %vm6319_vm2 = vcmp.eq.f32.partialorder %v1158_v46, 8.507059e+37  ;;  %vm6328_vm3 = vmor %vm1154_vm1, %vm1155_vm0 }
 0x11f   : > { %v624_v39 = vpop.f32.mrf.mxu0  ;;  %5122 = vpow2.f32 %v4580_v49  ;;  %v1996_v63 = vmul.f32 %v1147_v4, %v6056_v48  ;;  %v4708_v24 = vor.u32 %v4941_v33, %v4705_v9  ;;  %v1168_v48 = vadd.f32 %v6234_v2, %v1167_v31 }
 0x120   : > { %v713_v50 = vpop.f32.mrf.mxu1  ;;  %v6301_v35 = vadd.f32 %v624_v39, %v6002_v41  ;;  %5124 = vrcp.f32 %v6284_v25  ;;  %vm1170_vm4 = vweird.f32 %v6234_v2  ;;  %v1175_v7 = vand.u32 2147483648, %v6183_v18 }
 0x121   : > { %v6304_v62 = vadd.f32 %v713_v50, %v6004_v45  ;;  %v6335_v27 = vpack.c.bf16 %v1996_v63, %v1994_v11  ;;  %v1157_v39 = vsel %vm6328_vm3, %v6211_v43, %v1153_v1  ;;  %v1161_v42 = vor.u32 1.1754944e-38, %v1160_v47  ;;  %2556 = vmatpush.bf16.msrb.mxu1 %v4708_v24 }
 0x122   : > { %663 = vmatmul.bf16.gmra.mxu0 %v4903_v44  ;;  %v4581_v6 = vmul.f32 -1.442695, %v6301_v35  ;;  %v5117_v54 = vpop.eup %5116  ;;  %v1181_v49 = vsub.f32 1.0, %v1180_v10  ;;  %vm1169_vm5 = vweird.f32 %v6183_v18  ;;  %vm6341_vm6 = vcmp.eq.f32.partialorder %v1173_v40, 8.507059e+37 }
 0x123   : > { %752 = vmatmul.bf16.gmra.mxu1 %v4903_v44  ;;  %v6317_v28 = vpop.eup %5118  ;;  %v4582_v21 = vmul.f32 -1.442695, %v6304_v62  ;;  %v4644_v44 = vor.u32 %v4925_v52, %v4641_v5  ;;  %v6347_v56 = vadd.f32 1.0, %v5117_v54  ;;  %2385 = vmatmul.bf16.gmra.mxu3 %v6335_v27  ;;  %vm6354_vm7 = vmor %vm1169_vm5, %vm1170_vm4  ;;  %v1162_v55 = vsel %vm6319_vm2, %v1161_v42, %v1157_v39 }
 0x124   : > { %v6324_v26 = vpop.eup %5120  ;;  %5126 = vpow2.f32 %v4581_v6  ;;  %v1210_v51 = vmul.f32 %v6317_v28, %v6259_v22  ;;  %v1182_v16 = vmul.f32 %v6292_v29, %v1181_v49  ;;  %v1172_v57 = vsel %vm6354_vm7, %v6234_v2, %v1168_v48 }
 0x125   : > { %v5123_v30 = vpop.eup %5122  ;;  %2467 = vmatpush.bf16.msrb.mxu0 %v4644_v44  ;;  %5128 = vpow2.f32 %v4582_v21  ;;  %v1195_v53 = vmul.f32 %v6324_v26, %v6270_v38  ;;  %v1176_v58 = vor.u32 1.1754944e-38, %v1175_v7  ;;  %vm1185_vm8 = vweird.f32 %v6292_v29 }
 0x126   : > { %v6350_v43 = vpop.eup %5124  ;;  %v6369_v59 = vadd.f32 1.0, %v5123_v30  ;;  %v1183_v1 = vadd.f32 %v6292_v29, %v1182_v16  ;;  %v1190_v31 = vand.u32 2147483648, %v6230_v61  ;;  %v1211_v52 = vsub.f32 1.0, %v1210_v51 }
 0x127   : > { %v626_v19 = vpop.f32.mrf.mxu0  ;;  %v1225_v5 = vmul.f32 %v6350_v43, %v6284_v25  ;;  %v1188_v33 = vand.u32 2147483647, %v6230_v61  ;;  %v1196_v2 = vsub.f32 1.0, %v1195_v53  ;;  %v1997_v9 = vmul.f32 %v1162_v55, %v6087_v8  ;;  %v4904_v8 = vld [vmem:[%s5980_s10 + $0x68] sm:$0xff] }
 0x128   : > { %v715_v46 = vpop.f32.mrf.mxu1  ;;  %v6359_v18 = vadd.f32 %v626_v19, %v6002_v41  ;;  %5130 = vrcp.f32 %v6347_v56  ;;  %vm1184_vm9 = vweird.f32 %v6230_v61  ;;  %v1177_v12 = vsel %vm6341_vm6, %v1176_v58, %v1172_v57 }
 0x129   : > { %v6372_v34 = vadd.f32 %v715_v46, %v6004_v45  ;;  %vm1214_vm10 = vweird.f32 %v6259_v22  ;;  %v1218_v54 = vand.u32 2147483647, %v6259_v22  ;;  %5132 = vrcp.f32 %v6369_v59  ;;  %vm6391_vm11 = vmor %vm1184_vm9, %vm1185_vm8 }
 0x12a   : > { %v5127_v6 = vpop.eup %5126  ;;  %v4583_v10 = vmul.f32 -1.442695, %v6359_v18  ;;  %v1187_v61 = vsel %vm6391_vm11, %v6292_v29, %v1183_v1  ;;  %v1191_v19 = vor.u32 1.1754944e-38, %v1190_v31  ;;  %v1197_v20 = vmul.f32 %v6324_v26, %v1196_v2 }
 0x12b   : > { %v5129_v40 = vpop.eup %5128  ;;  %v4584_v63 = vmul.f32 -1.442695, %v6372_v34  ;;  %v1212_v21 = vmul.f32 %v6317_v28, %v1211_v52  ;;  %v1226_v44 = vsub.f32 1.0, %v1225_v5  ;;  %v6402_v24 = vadd.f32 1.0, %v5127_v6 }
 0x12c   : > { %vm1189_vm12 = vcmp.eq.f32.partialorder %v1188_v33, 8.507059e+37  ;;  %v1220_v32 = vand.u32 2147483648, %v6259_v22  ;;  %5134 = vpow2.f32 %v4583_v10  ;;  %vm1200_vm13 = vweird.f32 %v6324_v26 }
 0x12d   : > { %v1192_v48 = vsel %vm1189_vm12, %v1191_v19, %v1187_v61  ;;  %v6406_v30 = vadd.f32 1.0, %v5129_v40  ;;  %v1198_v39 = vadd.f32 %v6324_v26, %v1197_v20  ;;  %v1203_v42 = vand.u32 2147483647, %v6270_v38 }
 0x12e   : > { %v1999_v29 = vmul.f32 %v1192_v48, %v6157_v0  ;;  %v6411_v46 = vpop.eup %5130  ;;  %vm1215_vm14 = vweird.f32 %v6317_v28  ;;  %5136 = vpow2.f32 %v4584_v63  ;;  %vm1199_vm15 = vweird.f32 %v6270_v38  ;;  %v4697_v63 = vld [vmem:[#allocation8 + $0x88] sm:$0xf0] }
 0x12f   : > { %v629_v4 = vpop.f32.mrf.mxu0  ;;  %v1205_v49 = vand.u32 2147483648, %v6270_v38  ;;  %v6416_v50 = vpop.eup %5132  ;;  %v1213_v51 = vadd.f32 %v6317_v28, %v1212_v21  ;;  %v1227_v47 = vmul.f32 %v6350_v43, %v1226_v44  ;;  %5138 = vrcp.f32 %v6402_v24  ;;  %vm1201_vm0 = vmor %vm1199_vm15, %vm1200_vm13 }
 0x130   : > { %v718_v7 = vpop.f32.mrf.mxu1  ;;  %v6421_v0 = vpack.c.bf16 %v1999_v29, %v1997_v9  ;;  %v1202_v16 = vsel %vm1201_vm0, %v6324_v26, %v1198_v39  ;;  %v6427_v55 = vadd.f32 %v629_v4, %v6002_v41  ;;  %v1235_v58 = vand.u32 2147483648, %v6284_v25  ;;  %vm6442_vm2 = vmor %vm1214_vm10, %vm1215_vm14 }
 0x131   : > { %v1206_v53 = vor.u32 1.1754944e-38, %v1205_v49  ;;  %v6430_v38 = vadd.f32 %v718_v7, %v6004_v45  ;;  %5140 = vrcp.f32 %v6406_v30  ;;  %vm1204_vm1 = vcmp.eq.f32.partialorder %v1203_v42, 8.507059e+37 }
 0x132   : > { %668 = vmatmul.bf16.gmra.mxu0 %v4904_v8  ;;  %2301 = vmatmul.bf16.gmra.mxu2 %v6421_v0  ;;  %v1240_v1 = vmul.f32 %v6411_v46, %v6347_v56  ;;  %v5135_v31 = vpop.eup %5134  ;;  %v1998_v26 = vmul.f32 %v1177_v12, %v6109_v23  ;;  %v4585_v33 = vmul.f32 -1.442695, %v6427_v55  ;;  %v1217_v2 = vsel %vm6442_vm2, %v6317_v28, %v1213_v51 }
 0x133   : > { %757 = vmatmul.bf16.gmra.mxu1 %v4904_v8  ;;  %v1207_v5 = vsel %vm1204_vm1, %v1206_v53, %v1202_v16  ;;  %v1228_v4 = vadd.f32 %v6350_v43, %v1227_v47  ;;  %vm1230_vm3 = vweird.f32 %v6350_v43  ;;  %v1221_v9 = vor.u32 1.1754944e-38, %v1220_v32 }
 0x134   : > { %v2000_v23 = vmul.f32 %v1207_v5, %v6172_v14  ;;  %v5137_v6 = vpop.eup %5136  ;;  %vm1229_vm4 = vweird.f32 %v6284_v25  ;;  %v4586_v22 = vmul.f32 -1.442695, %v6430_v38  ;;  %v1241_v10 = vsub.f32 1.0, %v1240_v1  ;;  %v4905_v1 = vld [vmem:[%s5980_s10 + $0x70] sm:$0xff] }
 0x135   : > { %v6455_v12 = vpop.eup %5138  ;;  %vm1219_vm5 = vcmp.eq.f32.partialorder %v1218_v54, 8.507059e+37  ;;  %v1233_v11 = vand.u32 2147483647, %v6284_v25  ;;  %v1236_v8 = vor.u32 1.1754944e-38, %v1235_v58  ;;  %vm6460_vm6 = vmor %vm1229_vm4, %vm1230_vm3  ;;  %5142 = vpow2.f32 %v4585_v33 }
 0x136   : > { %v6458_v28 = vpack.c.bf16 %v2000_v23, %v1998_v26  ;;  %v1222_v40 = vsel %vm1219_vm5, %v1221_v9, %v1217_v2  ;;  %v1242_v61 = vmul.f32 %v6411_v46, %v1241_v10  ;;  %vm1245_vm7 = vweird.f32 %v6411_v46  ;;  %v4633_v9 = vld [vmem:[#allocation8 + $0x8] sm:$0xf0] }
 0x137   : > { %v631_v57 = vpop.f32.mrf.mxu0  ;;  %v6466_v19 = vpop.eup %5140  ;;  %v1232_v25 = vsel %vm6460_vm6, %v6350_v43, %v1228_v4  ;;  %v1248_v20 = vand.u32 2147483647, %v6347_v56  ;;  %v1250_v21 = vand.u32 2147483648, %v6347_v56  ;;  %5144 = vpow2.f32 %v4586_v22 }
 0x138   : > { %v720_v14 = vpop.f32.mrf.mxu1  ;;  %2390 = vmatmul.bf16.gmra.mxu3 %v6458_v28  ;;  %v6473_v54 = vadd.f32 %v631_v57, %v6002_v41  ;;  %v1243_v44 = vadd.f32 %v6411_v46, %v1242_v61  ;;  %vm1244_vm8 = vweird.f32 %v6347_v56  ;;  %v1255_v32 = vmul.f32 %v6416_v50, %v6369_v59 }
 0x139   : > { %v1270_v43 = vmul.f32 %v6455_v12, %v6402_v24  ;;  %v6483_v48 = vadd.f32 1.0, %v5135_v31  ;;  %v6485_v7 = vadd.f32 1.0, %v5137_v6  ;;  %vm1246_vm9 = vmor %vm1244_vm8, %vm1245_vm7  ;;  %v1251_v29 = vor.u32 1.1754944e-38, %v1250_v21  ;;  %v4923_v6 = vld [vmem:[#allocation8 + $0x4] sm:$0xf]  ;;  %v4960_v21 = vld [vmem:[#allocation10 + $0x28] sm:$0xff] }
 0x13a   : > { %v1285_v39 = vmul.f32 %v6466_v19, %v6406_v30  ;;  %v1247_v42 = vsel %vm1246_vm9, %v6411_v46, %v1243_v44  ;;  %vm1249_vm10 = vcmp.eq.f32.partialorder %v1248_v20, 8.507059e+37  ;;  %v1256_v56 = vsub.f32 1.0, %v1255_v32  ;;  %v4968_v44 = vld [vmem:[#allocation10 + $0x68] sm:$0xff]  ;;  %4085 = vmatpush.bf16.msrb.mxu2 %v4960_v21 }
 0x13b   : > { %vm1234_vm11 = vcmp.eq.f32.partialorder %v1233_v11, 8.507059e+37  ;;  %v4587_v51 = vmul.f32 -1.442695, %v6473_v54  ;;  %v1252_v47 = vsel %vm1249_vm10, %v1251_v29, %v1247_v42  ;;  %v5143_v16 = vpop.eup %5142  ;;  %v2001_v31 = vmul.f32 %v1222_v40, %v6198_v13  ;;  %v4939_v40 = vld [vmem:[#allocation8 + $0x84] sm:$0xf]  ;;  %4174 = vmatpush.bf16.msrb.mxu3 %v4968_v44 }
 0x13c   : > { %v1237_v53 = vsel %vm1234_vm11, %v1236_v8, %v1232_v25  ;;  %v2003_v57 = vmul.f32 %v1252_v47, %v6237_v3  ;;  %v1257_v58 = vmul.f32 %v6416_v50, %v1256_v56  ;;  %v1271_v26 = vsub.f32 1.0, %v1270_v43 }
 0x13d   : > { %5146 = vrcp.f32 %v6483_v48  ;;  %v5145_v46 = vpop.eup %5144  ;;  %v1286_v52 = vsub.f32 1.0, %v1285_v39  ;;  %v6498_v5 = vadd.f32 %v720_v14, %v6004_v45  ;;  %vm1260_vm12 = vweird.f32 %v6416_v50 }
 0x13e   : > { %5148 = vrcp.f32 %v6485_v7  ;;  %v2002_v3 = vmul.f32 %v1237_v53, %v6201_v37  ;;  %vm1274_vm13 = vweird.f32 %v6402_v24  ;;  %v6503_v33 = vadd.f32 1.0, %v5143_v16 }
 0x13f   : > { %v634_v49 = vpop.f32.mrf.mxu0  ;;  %5150 = vpow2.f32 %v4587_v51  ;;  %v6505_v13 = vpack.c.bf16 %v2003_v57, %v2001_v31  ;;  %v1258_v2 = vadd.f32 %v6416_v50, %v1257_v58  ;;  %vm1259_vm14 = vweird.f32 %v6369_v59 }
 0x140   : > { %v1263_v4 = vand.u32 2147483647, %v6369_v59  ;;  %v723_v23 = vpop.f32.mrf.mxu1  ;;  %v1272_v22 = vmul.f32 %v6455_v12, %v1271_v26  ;;  %v6511_v10 = vadd.f32 1.0, %v5145_v46  ;;  %vm6515_vm15 = vmor %vm1259_vm14, %vm1260_vm12  ;;  %v1265_v11 = vand.u32 2147483648, %v6369_v59 }
 0x141   : > { %v6521_v8 = vadd.f32 %v634_v49, %v6002_v41  ;;  %v1287_v14 = vmul.f32 %v6466_v19, %v1286_v52  ;;  %v4588_v61 = vmul.f32 -1.442695, %v6498_v5  ;;  %v1262_v25 = vsel %vm6515_vm15, %v6416_v50, %v1258_v2 }
 0x142   : > { %673 = vmatmul.bf16.gmra.mxu0 %v4905_v1  ;;  %2306 = vmatmul.bf16.gmra.mxu2 %v6505_v13  ;;  %v4636_v20 = vor.u32 %v4923_v6, %v4633_v9  ;;  %5152 = vrcp.f32 %v6503_v33  ;;  %v1266_v59 = vor.u32 1.1754944e-38, %v1265_v11  ;;  %v4700_v29 = vor.u32 %v4939_v40, %v4697_v63 }
 0x143   : > { %762 = vmatmul.bf16.gmra.mxu1 %v4905_v1  ;;  %v6529_v32 = vpop.eup %5146  ;;  %v4589_v43 = vmul.f32 -1.442695, %v6521_v8  ;;  %v1278_v42 = vand.u32 2147483647, %v6402_v24  ;;  %v1280_v56 = vand.u32 2147483648, %v6402_v24  ;;  %vm1264_vm0 = vcmp.eq.f32.partialorder %v1263_v4, 8.507059e+37 }
 0x144   : > { %v6533_v39 = vpop.eup %5148  ;;  %v1293_v49 = vand.u32 2147483647, %v6406_v30  ;;  %2468 = vmatpush.bf16.msrb.mxu0 %v4636_v20  ;;  %v1273_v47 = vadd.f32 %v6455_v12, %v1272_v22  ;;  %vm1275_vm1 = vweird.f32 %v6455_v12  ;;  %5154 = vrcp.f32 %v6511_v10  ;;  %2557 = vmatpush.bf16.msrb.mxu1 %v4700_v29 }
 0x145   : > { %v5151_v51 = vpop.eup %5150  ;;  %v1267_v16 = vsel %vm1264_vm0, %v1266_v59, %v1262_v25  ;;  %v1295_v53 = vand.u32 2147483648, %v6406_v30  ;;  %5156 = vpow2.f32 %v4589_v43  ;;  %v6544_v58 = vadd.f32 %v723_v23, %v6004_v45  ;;  %vm6552_vm3 = vmor %vm1274_vm13, %vm1275_vm1 }
 0x146   : > { %v2004_v57 = vmul.f32 %v1267_v16, %v6246_v17  ;;  %v1288_v1 = vadd.f32 %v6466_v19, %v1287_v14  ;;  %vm1290_vm2 = vweird.f32 %v6466_v19  ;;  %5158 = vpow2.f32 %v4588_v61 }
 0x147   : > { %v636_v50 = vpop.f32.mrf.mxu0  ;;  %v1300_v31 = vmul.f32 %v6529_v32, %v6483_v48  ;;  %v6556_v46 = vadd.f32 1.0, %v5151_v51  ;;  %v1277_v2 = vsel %vm6552_vm3, %v6455_v12, %v1273_v47  ;;  %vm1289_vm4 = vweird.f32 %v6406_v30 }
 0x148   : > { %v6558_v17 = vpack.c.bf16 %v2004_v57, %v2002_v3  ;;  %v6560_v52 = vpop.eup %5152  ;;  %v6567_v4 = vadd.f32 %v636_v50, %v6002_v41  ;;  %vm1279_vm5 = vcmp.eq.f32.partialorder %v1278_v42, 8.507059e+37  ;;  %v1281_v23 = vor.u32 1.1754944e-38, %v1280_v56  ;;  %vm6569_vm6 = vmor %vm1289_vm4, %vm1290_vm2  ;;  %v725_v9 = vpop.f32.mrf.mxu1  ;;  %v4906_v50 = vld [vmem:[%s5980_s10 + $0x78] sm:$0xff]  ;;  %s4305_s10 = scalar_lea.hbm %s10218_s7, %s4971_s17 }
 0x149   : > { %v1301_v24 = vsub.f32 1.0, %v1300_v31  ;;  %vm6573_vm7 = vcmp.eq.f32.partialorder %v1293_v49, 8.507059e+37  ;;  %v4590_v12 = vmul.f32 -1.442695, %v6544_v58  ;;  %v1292_v22 = vsel %vm6569_vm6, %v6466_v19, %v1288_v1  ;;  %s4308_s12 = sshll.u32 %s4305_s10, 4  ;;  %s4309_s12 = int_to_ptr.hbm [resolvable:$true] %s4308_s12 }
 0x14a   : > { %2395 = vmatmul.bf16.gmra.mxu3 %v6558_v17  ;;  %v6579_v30 = vpop.eup %5154  ;;  %v1296_v37 = vor.u32 1.1754944e-38, %v1295_v53  ;;  %v1315_v40 = vmul.f32 %v6533_v39, %v6485_v7  ;;  %v1282_v14 = vsel %vm1279_vm5, %v1281_v23, %v1277_v2  ;;  %v1330_v61 = vmul.f32 %v6560_v52, %v6503_v33  ;;  %s5744_s28 = sshra.s32 %s4309_s12, 4  ;;  %s5745_s28 = int_to_ptr.hbm [resolvable:$true] %s5744_s28 }
 0x14b   : > { %v1302_v11 = vmul.f32 %v6529_v32, %v1301_v24  ;;  %v5157_v63 = vpop.eup %5156  ;;  %5160 = vrcp.f32 %v6556_v46  ;;  %v1310_v25 = vand.u32 2147483648, %v6483_v48  ;;  %v4591_v21 = vmul.f32 -1.442695, %v6567_v4  ;;  %s5746_s18 = scalar_lea.hbm %s5745_s28, 256  ;;  %p5751_p11 = scmp.lt.s32.totalorder %s5745_s28, %s10218_s7 }
 0x14c   : > { %v5159_v20 = vpop.eup %5158  ;;  %vm1305_vm8 = vweird.f32 %v6529_v32  ;;  %v1308_v44 = vand.u32 2147483647, %v6483_v48  ;;  %v1297_v59 = vsel %vm6573_vm7, %v1296_v37, %v1292_v22  ;;  %v1345_v43 = vmul.f32 %v6579_v30, %v6511_v10  ;;  %p5747_p1 = scmp.ne.s32.totalorder %s5745_s28, %s5746_s18  ;;  %p5752_p9 = scmp.lt.s32.totalorder %s5750_s16, %s5746_s18 }
 0x14d   : > { %v1303_v19 = vadd.f32 %v6529_v32, %v1302_v11  ;;  %5162 = vpow2.f32 %v4590_v12  ;;  %v6600_v29 = vadd.f32 %v725_v9, %v6004_v45  ;;  %v6602_v56 = vadd.f32 1.0, %v5157_v63 }
 0x14e   : > { %vm1304_vm9 = vweird.f32 %v6483_v48  ;;  %v1316_v49 = vsub.f32 1.0, %v1315_v40  ;;  %v2005_v51 = vmul.f32 %v1282_v14, %v6301_v35  ;;  %v1331_v47 = vsub.f32 1.0, %v1330_v61  ;;  %p5748_p4 = pnand %p5747_p1, %p5946_p5  ;;  %p5753_p2 = por %p5752_p9, %p5751_p11 }
 0x14f   : > { %v639_v42 = vpop.f32.mrf.mxu0  ;;  %v6607_v16 = vadd.f32 1.0, %v5159_v20  ;;  %vm1306_vm10 = vmor %vm1304_vm9, %vm1305_vm8  ;;  %v1311_v53 = vor.u32 1.1754944e-38, %v1310_v25  ;;  %v2006_v57 = vmul.f32 %v1297_v59, %v6304_v62  ;;  %5164 = vpow2.f32 %v4591_v21 }
 0x150   : > { %v1307_v1 = vsel %vm1306_vm10, %v6529_v32, %v1303_v19  ;;  %vm1309_vm11 = vcmp.eq.f32.partialorder %v1308_v44, 8.507059e+37  ;;  %vm1334_vm12 = vweird.f32 %v6503_v33  ;;  %v1346_v48 = vsub.f32 1.0, %v1345_v43  ;;  %v728_v12 = vpop.f32.mrf.mxu1  ;;  %p5749_p8 = pneg %p5748_p4 }
 0x151   : > { %v6611_v31 = vpop.eup %5160  ;;  %v4592_v35 = vmul.f32 -1.442695, %v6600_v29  ;;  %v1312_v26 = vsel %vm1309_vm11, %v1311_v53, %v1307_v1  ;;  %vm1320_vm13 = vweird.f32 %v6533_v39  ;;  %5166 = vrcp.f32 %v6602_v56 }
 0x152   : > { %678 = vmatmul.bf16.gmra.mxu0 %v4906_v50  ;;  %v2007_v62 = vmul.f32 %v1312_v26, %v6359_v18  ;;  %v1317_v2 = vmul.f32 %v6533_v39, %v1316_v49  ;;  %v1323_v32 = vand.u32 2147483647, %v6485_v7  ;;  %v1332_v23 = vmul.f32 %v6560_v52, %v1331_v47  ;;  %p5754_p10 = pnand %p5753_p2, %p5749_p8 }
 0x153   : > { %767 = vmatmul.bf16.gmra.mxu1 %v4906_v50  ;;  %v5163_v24 = vpop.eup %5162  ;;  %5168 = vrcp.f32 %v6607_v16  ;;  %v1325_v6 = vand.u32 2147483648, %v6485_v7  ;;  %v6624_v3 = vadd.f32 %v639_v42, %v6002_v41  ;;  %vm1319_vm14 = vweird.f32 %v6485_v7 }
 0x154   : > { %v6626_v9 = vpack.c.bf16 %v2007_v62, %v2005_v51  ;;  %v1318_v22 = vadd.f32 %v6533_v39, %v1317_v2  ;;  %v1360_v18 = vmul.f32 %v6611_v31, %v6556_v46  ;;  %v1338_v37 = vand.u32 2147483647, %v6503_v33  ;;  %vm1321_vm15 = vmor %vm1319_vm14, %vm1320_vm13 }
 0x155   : > { %v1347_v11 = vmul.f32 %v6579_v30, %v1346_v48  ;;  %5170 = vpow2.f32 %v4592_v35  ;;  %v1326_v40 = vor.u32 1.1754944e-38, %v1325_v6  ;;  %v5165_v63 = vpop.eup %5164  ;;  %v6636_v14 = vadd.f32 1.0, %v5163_v24 }
 0x156   : > { %2311 = vmatmul.bf16.gmra.mxu2 %v6626_v9  ;;  %v1322_v61 = vsel %vm1321_vm15, %v6533_v39, %v1318_v22  ;;  %vm1324_vm0 = vcmp.eq.f32.partialorder %v1323_v32, 8.507059e+37  ;;  %v6641_v7 = vadd.f32 %v728_v12, %v6004_v45  ;;  %v1333_v25 = vadd.f32 %v6560_v52, %v1332_v23 }
 0x157   : > { %vm1335_vm1 = vweird.f32 %v6560_v52  ;;  %v1327_v20 = vsel %vm1324_vm0, %v1326_v40, %v1322_v61  ;;  %v4593_v21 = vmul.f32 -1.442695, %v6624_v3  ;;  %v641_v19 = vpop.f32.mrf.mxu0  ;;  %v6646_v44 = vpop.eup %5166  ;;  %v1340_v59 = vand.u32 2147483648, %v6503_v33 }
 0x158   : > { %vm1349_vm2 = vweird.f32 %v6511_v10  ;;  %v2008_v39 = vmul.f32 %v1327_v20, %v6372_v34  ;;  %v1361_v43 = vsub.f32 1.0, %v1360_v18  ;;  %v1348_v49 = vadd.f32 %v6579_v30, %v1347_v11  ;;  %vm6660_vm4 = vmor %vm1334_vm12, %vm1335_vm1  ;;  %v730_v6 = vpop.f32.mrf.mxu1 }
 0x159   : > { %v6651_v42 = vpop.eup %5168  ;;  %vm1350_vm3 = vweird.f32 %v6579_v30  ;;  %v1353_v50 = vand.u32 2147483647, %v6511_v10  ;;  %v6656_v51 = vadd.f32 1.0, %v5165_v63  ;;  %5172 = vrcp.f32 %v6636_v14 }
 0x15a   : > { %v6665_v34 = vpack.c.bf16 %v2008_v39, %v2006_v57  ;;  %v4594_v53 = vmul.f32 -1.442695, %v6641_v7  ;;  %v1362_v1 = vmul.f32 %v6611_v31, %v1361_v43  ;;  %v1337_v35 = vsel %vm6660_vm4, %v6560_v52, %v1333_v25  ;;  %vm6698_vm9 = vmor %vm1349_vm2, %vm1350_vm3 }
 0x15b   : > { %v5171_v48 = vpop.eup %5170  ;;  %v1390_v33 = vmul.f32 %v6646_v44, %v6602_v56  ;;  %5174 = vpow2.f32 %v4593_v21  ;;  %vm1365_vm5 = vweird.f32 %v6611_v31  ;;  %vm1364_vm6 = vweird.f32 %v6556_v46 }
 0x15c   : > { %2400 = vmatmul.bf16.gmra.mxu3 %v6665_v34  ;;  %v1363_v57 = vadd.f32 %v6611_v31, %v1362_v1  ;;  %v1368_v26 = vand.u32 2147483647, %v6556_v46  ;;  %v1370_v62 = vand.u32 2147483648, %v6556_v46  ;;  %v1341_v2 = vor.u32 1.1754944e-38, %v1340_v59  ;;  %vm6682_vm7 = vmor %vm1364_vm6, %vm1365_vm5 }
 0x15d   : > { %v1355_v32 = vand.u32 2147483648, %v6511_v10  ;;  %5176 = vrcp.f32 %v6656_v51  ;;  %v1375_v24 = vmul.f32 %v6651_v42, %v6607_v16  ;;  %vm1339_vm8 = vcmp.eq.f32.partialorder %v1338_v37, 8.507059e+37 }
 0x15e   : > { %5178 = vpow2.f32 %v4594_v53  ;;  %v6689_v23 = vadd.f32 %v641_v19, %v6002_v41  ;;  %v1367_v46 = vsel %vm6682_vm7, %v6611_v31, %v1363_v57  ;;  %v1342_v12 = vsel %vm1339_vm8, %v1341_v2, %v1337_v35  ;;  %v4967_v53 = vld [vmem:[#allocation10 + $0x60] sm:$0xff] }
 0x15f   : > { %v1391_v18 = vsub.f32 1.0, %v1390_v33  ;;  %v6702_v37 = vadd.f32 1.0, %v5171_v48  ;;  %v1371_v11 = vor.u32 1.1754944e-38, %v1370_v62  ;;  %v6704_v40 = vpop.eup %5172  ;;  %v1352_v63 = vsel %vm6698_vm9, %v6579_v30, %v1348_v49  ;;  %v644_v21 = vpop.f32.mrf.mxu0  ;;  %4175 = vmatpush.bf16.msrb.mxu3 %v4967_v53 }
 0x160   : > { %vm1369_vm10 = vcmp.eq.f32.partialorder %v1368_v26, 8.507059e+37  ;;  %v1376_v31 = vsub.f32 1.0, %v1375_v24  ;;  %v1356_v61 = vor.u32 1.1754944e-38, %v1355_v32  ;;  %v6712_v25 = vadd.f32 %v730_v6, %v6004_v45 }
 0x161   : > { %v5175_v10 = vpop.eup %5174  ;;  %v1372_v20 = vsel %vm1369_vm10, %v1371_v11, %v1367_v46  ;;  %v2009_v19 = vmul.f32 %v1342_v12, %v6427_v55  ;;  %vm1354_vm11 = vcmp.eq.f32.partialorder %v1353_v50, 8.507059e+37  ;;  %v4595_v59 = vmul.f32 -1.442695, %v6689_v23  ;;  %v4959_v50 = vld [vmem:[#allocation10 + $0x20] sm:$0xff] }
 0x162   : > { %2469 = vmatmul.bf16.vlgmr.msrb.gmra.mxu0 %v6174_v15  ;;  %v1357_v30 = vsel %vm1354_vm11, %v1356_v61, %v1352_v63  ;;  %v1392_v43 = vmul.f32 %v6646_v44, %v1391_v18  ;;  %v1405_v15 = vmul.f32 %v6704_v40, %v6636_v14  ;;  %5180 = vrcp.f32 %v6702_v37  ;;  %4086 = vmatpush.bf16.msrb.mxu2 %v4959_v50 }
 0x163   : > { %2558 = vmatmul.bf16.vlgmr.msrb.gmra.mxu1 %v6195_v36  ;;  %v6716_v39 = vpop.eup %5176  ;;  %v2011_v49 = vmul.f32 %v1372_v20, %v6473_v54  ;;  %v1377_v47 = vmul.f32 %v6651_v42, %v1376_v31  ;;  %vm1380_vm12 = vweird.f32 %v6651_v42  ;;  %v1383_v55 = vand.u32 2147483647, %v6607_v16 }
 0x164   : > { %v5179_v36 = vpop.eup %5178  ;;  %v6726_v1 = vadd.f32 1.0, %v5175_v10  ;;  %v4596_v48 = vmul.f32 -1.442695, %v6712_v25  ;;  %v1385_v35 = vand.u32 2147483648, %v6607_v16  ;;  %v6731_v33 = vadd.f32 %v644_v21, %v6002_v41 }
 0x165   : > { %5182 = vpow2.f32 %v4595_v59  ;;  %v6733_v57 = vpack.c.bf16 %v2011_v49, %v2009_v19  ;;  %v1378_v54 = vadd.f32 %v6651_v42, %v1377_v47  ;;  %vm1379_vm13 = vweird.f32 %v6607_v16  ;;  %v733_v16 = vpop.f32.mrf.mxu1 }
 0x166   : > { %v1406_v26 = vsub.f32 1.0, %v1405_v15  ;;  %v6737_v62 = vadd.f32 1.0, %v5179_v36  ;;  %vm1381_vm14 = vmor %vm1379_vm13, %vm1380_vm12  ;;  %v1386_v2 = vor.u32 1.1754944e-38, %v1385_v35  ;;  %v1420_v32 = vmul.f32 %v6716_v39, %v6656_v51 }
 0x167   : > { %v1400_v52 = vand.u32 2147483648, %v6602_v56  ;;  %2316 = vmatmul.bf16.gmra.mxu2 %v6733_v57  ;;  %v1382_v24 = vsel %vm1381_vm14, %v6651_v42, %v1378_v54  ;;  %vm1384_vm15 = vcmp.eq.f32.partialorder %v1383_v55, 8.507059e+37  ;;  %v2010_v46 = vmul.f32 %v1357_v30, %v6430_v38  ;;  %v646_v63 = vpop.f32.mrf.mxu0 }
 0x168   : > { %v6746_v6 = vpop.eup %5180  ;;  %5184 = vrcp.f32 %v6726_v1  ;;  %v1387_v12 = vsel %vm1384_vm15, %v1386_v2, %v1382_v24  ;;  %v4597_v22 = vmul.f32 -1.442695, %v6731_v33  ;;  %v1393_v18 = vadd.f32 %v6646_v44, %v1392_v43 }
 0x169   : > { %vm1395_vm0 = vweird.f32 %v6646_v44  ;;  %5186 = vpow2.f32 %v4596_v48  ;;  %v2012_v11 = vmul.f32 %v1387_v12, %v6498_v5  ;;  %vm1394_vm1 = vweird.f32 %v6602_v56 }
 0x16a   : > { %v1407_v42 = vmul.f32 %v6704_v40, %v1406_v26  ;;  %5188 = vrcp.f32 %v6737_v62  ;;  %v1421_v38 = vsub.f32 1.0, %v1420_v32  ;;  %v1398_v10 = vand.u32 2147483647, %v6602_v56  ;;  %vm6761_vm2 = vmor %vm1394_vm1, %vm1395_vm0 }
 0x16b   : > { %v5183_v31 = vpop.eup %5182  ;;  %v1401_v61 = vor.u32 1.1754944e-38, %v1400_v52  ;;  %v1415_v20 = vand.u32 2147483648, %v6636_v14  ;;  %v6759_v21 = vpack.c.bf16 %v2012_v11, %v2010_v46  ;;  %vm1410_vm3 = vweird.f32 %v6704_v40 }
 0x16c   : > { %5190 = vpow2.f32 %v4597_v22  ;;  %v6767_v5 = vadd.f32 %v733_v16, %v6004_v45  ;;  %v1422_v59 = vmul.f32 %v6716_v39, %v1421_v38  ;;  %v1397_v56 = vsel %vm6761_vm2, %v6646_v44, %v1393_v18 }
 0x16d   : > { %2405 = vmatmul.bf16.gmra.mxu3 %v6759_v21  ;;  %v6775_v30 = vadd.f32 %v646_v63, %v6002_v41  ;;  %vm1425_vm4 = vweird.f32 %v6716_v39  ;;  %v1435_v43 = vmul.f32 %v6746_v6, %v6702_v37  ;;  %v1408_v36 = vadd.f32 %v6704_v40, %v1407_v42  ;;  %v735_v32 = vpop.f32.mrf.mxu1 }
 0x16e   : > { %v6780_v15 = vpop.eup %5184  ;;  %v6783_v49 = vadd.f32 1.0, %v5183_v31  ;;  %v1423_v47 = vadd.f32 %v6716_v39, %v1422_v59  ;;  %v1430_v44 = vand.u32 2147483648, %v6656_v51  ;;  %vm1399_vm5 = vcmp.eq.f32.partialorder %v1398_v10, 8.507059e+37 }
 0x16f   : > { %v5187_v55 = vpop.eup %5186  ;;  %vm1424_vm6 = vweird.f32 %v6656_v51  ;;  %v1428_v50 = vand.u32 2147483647, %v6656_v51  ;;  %v1402_v48 = vsel %vm1399_vm5, %v1401_v61, %v1397_v56  ;;  %vm1409_vm7 = vweird.f32 %v6636_v14 }
 0x170   : > { %v6791_v53 = vpop.eup %5188  ;;  %v4598_v35 = vmul.f32 -1.442695, %v6767_v5  ;;  %vm6797_vm8 = vmor %vm1424_vm6, %vm1425_vm4  ;;  %v1436_v26 = vsub.f32 1.0, %v1435_v43  ;;  %v1450_v51 = vmul.f32 %v6780_v15, %v6726_v1  ;;  %v4599_v2 = vmul.f32 -1.442695, %v6775_v30  ;;  %v649_v43 = vpop.f32.mrf.mxu0 }
 0x171   : > { %vm6803_vm9 = vmor %vm1409_vm7, %vm1410_vm3  ;;  %v1427_v52 = vsel %vm6797_vm8, %v6716_v39, %v1423_v47  ;;  %v1416_v46 = vor.u32 1.1754944e-38, %v1415_v20  ;;  %5192 = vrcp.f32 %v6783_v49  ;;  %v1431_v12 = vor.u32 1.1754944e-38, %v1430_v44 }
 0x172   : > { %2474 = vmatmul.bf16.gmra.mxu0 %v6261_v60  ;;  %v5191_v24 = vpop.eup %5190  ;;  %v1412_v16 = vsel %vm6803_vm9, %v6704_v40, %v1408_v36  ;;  %v1465_v22 = vmul.f32 %v6791_v53, %v6737_v62  ;;  %v6821_v18 = vadd.f32 1.0, %v5187_v55  ;;  %vm1429_vm10 = vcmp.eq.f32.partialorder %v1428_v50, 8.507059e+37 }
 0x173   : > { %2563 = vmatmul.bf16.gmra.mxu1 %v6335_v27  ;;  %v1413_v27 = vand.u32 2147483647, %v6636_v14  ;;  %v2013_v14 = vmul.f32 %v1402_v48, %v6521_v8  ;;  %5194 = vpow2.f32 %v4598_v35  ;;  %v6824_v39 = vadd.f32 %v735_v32, %v6004_v45 }
 0x174   : > { %v1432_v11 = vsel %vm1429_vm10, %v1431_v12, %v1427_v52  ;;  %v1437_v42 = vmul.f32 %v6746_v6, %v1436_v26  ;;  %v1451_v40 = vsub.f32 1.0, %v1450_v51  ;;  %v6827_v63 = vadd.f32 1.0, %v5191_v24 }
 0x175   : > { %5196 = vpow2.f32 %v4599_v2  ;;  %vm1439_vm11 = vweird.f32 %v6702_v37  ;;  %v2015_v8 = vmul.f32 %v1432_v11, %v6567_v4  ;;  %vm1440_vm12 = vweird.f32 %v6746_v6 }
 0x176   : > { %v1438_v38 = vadd.f32 %v6746_v6, %v1437_v42  ;;  %v1443_v31 = vand.u32 2147483647, %v6702_v37  ;;  %vm1414_vm13 = vcmp.eq.f32.partialorder %v1413_v27, 8.507059e+37  ;;  %5198 = vrcp.f32 %v6821_v18  ;;  %vm6835_vm14 = vmor %vm1439_vm11, %vm1440_vm12 }
 0x177   : > { %v1445_v61 = vand.u32 2147483648, %v6702_v37  ;;  %v6840_v20 = vpop.eup %5192  ;;  %v1417_v19 = vsel %vm1414_vm13, %v1416_v46, %v1412_v16  ;;  %v4600_v4 = vmul.f32 -1.442695, %v6824_v39  ;;  %v6843_v59 = vpack.c.bf16 %v2015_v8, %v2013_v14 }
 0x178   : > { %v1442_v56 = vsel %vm6835_vm14, %v6746_v6, %v1438_v38  ;;  %v1452_v36 = vmul.f32 %v6780_v15, %v1451_v40  ;;  %v1466_v55 = vsub.f32 1.0, %v1465_v22  ;;  %5200 = vrcp.f32 %v6827_v63  ;;  %v738_v22 = vpop.f32.mrf.mxu1 }
 0x179   : > { %v1446_v47 = vor.u32 1.1754944e-38, %v1445_v61  ;;  %v5195_v44 = vpop.eup %5194  ;;  %2321 = vmatmul.bf16.gmra.mxu2 %v6843_v59  ;;  %vm1444_vm15 = vcmp.eq.f32.partialorder %v1443_v31, 8.507059e+37  ;;  %v2014_v50 = vmul.f32 %v1417_v19, %v6544_v58  ;;  %v1480_v35 = vmul.f32 %v6840_v20, %v6783_v49  ;;  %v651_v31 = vpop.f32.mrf.mxu0 }
 0x17a   : > { %vm1454_vm0 = vweird.f32 %v6726_v1  ;;  %v1458_v6 = vand.u32 2147483647, %v6726_v1  ;;  %5202 = vpow2.f32 %v4600_v4  ;;  %v1453_v60 = vadd.f32 %v6780_v15, %v1452_v36 }
 0x17b   : > { %v5197_v37 = vpop.eup %5196  ;;  %v1447_v48 = vsel %vm1444_vm15, %v1446_v47, %v1442_v56  ;;  %vm1455_vm1 = vweird.f32 %v6780_v15  ;;  %v6861_v27 = vadd.f32 1.0, %v5195_v44  ;;  %v1481_v58 = vsub.f32 1.0, %v1480_v35 }
 0x17c   : > { %v2016_v54 = vmul.f32 %v1447_v48, %v6600_v29  ;;  %v6857_v26 = vpop.eup %5198  ;;  %v1460_v51 = vand.u32 2147483648, %v6726_v1  ;;  %v1467_v2 = vmul.f32 %v6791_v53, %v1466_v55  ;;  %v6865_v32 = vadd.f32 1.0, %v5197_v37  ;;  %vm6881_vm3 = vmor %vm1454_vm0, %vm1455_vm1 }
 0x17d   : > { %v1473_v24 = vand.u32 2147483647, %v6737_v62  ;;  %v6871_v29 = vadd.f32 %v649_v43, %v6002_v41  ;;  %v1482_v16 = vmul.f32 %v6840_v20, %v1481_v58  ;;  %vm1485_vm2 = vweird.f32 %v6840_v20  ;;  %v4966_v58 = vld [vmem:[#allocation10 + $0x58] sm:$0xff] }
 0x17e   : > { %v6867_v52 = vpack.c.bf16 %v2016_v54, %v2014_v50  ;;  %v6877_v46 = vpop.eup %5200  ;;  %vm6885_vm4 = vcmp.eq.f32.partialorder %v1458_v6, 8.507059e+37  ;;  %v1488_v11 = vand.u32 2147483647, %v6783_v49  ;;  %v1457_v1 = vsel %vm6881_vm3, %v6780_v15, %v1453_v60  ;;  %v4958_v60 = vld [vmem:[#allocation10 + $0x18] sm:$0xff]  ;;  %4176 = vmatpush.bf16.msrb.mxu3 %v4966_v58 }
 0x17f   : > { %5204 = vrcp.f32 %v6861_v27  ;;  %v1483_v42 = vadd.f32 %v6840_v20, %v1482_v16  ;;  %vm1484_vm5 = vweird.f32 %v6783_v49  ;;  %v1461_v8 = vor.u32 1.1754944e-38, %v1460_v51  ;;  %4087 = vmatpush.bf16.msrb.mxu2 %v4958_v60 }
 0x180   : > { %2410 = vmatmul.bf16.gmra.mxu3 %v6867_v52  ;;  %v5203_v40 = vpop.eup %5202  ;;  %v1468_v38 = vadd.f32 %v6791_v53, %v1467_v2  ;;  %vm1470_vm6 = vweird.f32 %v6791_v53  ;;  %5206 = vrcp.f32 %v6865_v32  ;;  %vm1486_vm7 = vmor %vm1484_vm5, %vm1485_vm2  ;;  %v1510_v15 = vmul.f32 %v6877_v46, %v6827_v63  ;;  %v740_v16 = vpop.f32.mrf.mxu1 }
 0x181   : > { %v4601_v10 = vmul.f32 -1.442695, %v6871_v29  ;;  %v1487_v61 = vsel %vm1486_vm7, %v6840_v20, %v1483_v42  ;;  %v1462_v19 = vsel %vm6885_vm4, %v1461_v8, %v1457_v1  ;;  %vm1469_vm8 = vweird.f32 %v6737_v62  ;;  %v654_v60 = vpop.f32.mrf.mxu0 }
 0x182   : > { %2479 = vmatmul.bf16.gmra.mxu0 %v6421_v0  ;;  %v1490_v0 = vand.u32 2147483648, %v6783_v49  ;;  %vm1489_vm9 = vcmp.eq.f32.partialorder %v1488_v11, 8.507059e+37  ;;  %vm6912_vm10 = vmor %vm1469_vm8, %vm1470_vm6  ;;  %v1475_v43 = vand.u32 2147483648, %v6737_v62  ;;  %v6917_v36 = vadd.f32 1.0, %v5203_v40 }
 0x183   : > { %2568 = vmatmul.bf16.gmra.mxu1 %v6458_v28  ;;  %v1495_v28 = vmul.f32 %v6857_v26, %v6821_v18  ;;  %v6920_v47 = vadd.f32 %v651_v31, %v6002_v41  ;;  %v1472_v44 = vsel %vm6912_vm10, %v6791_v53, %v1468_v38  ;;  %vm6925_vm11 = vcmp.eq.f32.partialorder %v1473_v24, 8.507059e+37 }
 0x184   : > { %v1491_v49 = vor.u32 1.1754944e-38, %v1490_v0  ;;  %v2017_v50 = vmul.f32 %v1462_v19, %v6624_v3  ;;  %v1511_v48 = vsub.f32 1.0, %v1510_v15  ;;  %5208 = vpow2.f32 %v4601_v10 }
 0x185   : > { %v1496_v4 = vsub.f32 1.0, %v1495_v28  ;;  %v6929_v37 = vpop.eup %5204  ;;  %v6933_v62 = vadd.f32 %v738_v22, %v6004_v45  ;;  %vm1500_vm12 = vweird.f32 %v6857_v26  ;;  %v1503_v53 = vand.u32 2147483647, %v6821_v18 }
 0x186   : > { %v1492_v20 = vsel %vm1489_vm9, %v1491_v49, %v1487_v61  ;;  %v6935_v35 = vpop.eup %5206  ;;  %v1476_v51 = vor.u32 1.1754944e-38, %v1475_v43  ;;  %5210 = vrcp.f32 %v6917_v36  ;;  %v4603_v3 = vmul.f32 -1.442695, %v6920_v47 }
 0x187   : > { %v2019_v6 = vmul.f32 %v1492_v20, %v6689_v23  ;;  %v1497_v54 = vmul.f32 %v6857_v26, %v1496_v4  ;;  %v1505_v2 = vand.u32 2147483648, %v6821_v18  ;;  %v1525_v24 = vmul.f32 %v6929_v37, %v6861_v27 }
 0x188   : > { %vm1499_vm13 = vweird.f32 %v6821_v18  ;;  %v1477_v14 = vsel %vm6925_vm11, %v1476_v51, %v1472_v44  ;;  %v4602_v22 = vmul.f32 -1.442695, %v6933_v62  ;;  %v1540_v0 = vmul.f32 %v6935_v35, %v6865_v32 }
 0x189   : > { %v6946_v23 = vpack.c.bf16 %v2019_v6, %v2017_v50  ;;  %v1498_v12 = vadd.f32 %v6857_v26, %v1497_v54  ;;  %vm1501_vm14 = vmor %vm1499_vm13, %vm1500_vm12  ;;  %v1506_v11 = vor.u32 1.1754944e-38, %v1505_v2  ;;  %v1512_v28 = vmul.f32 %v6877_v46, %v1511_v48 }
 0x18a   : > { %vm1504_vm15 = vcmp.eq.f32.partialorder %v1503_v53, 8.507059e+37  ;;  %v5209_v1 = vpop.eup %5208  ;;  %5212 = vpow2.f32 %v4603_v3  ;;  %v6961_v42 = vadd.f32 %v740_v16, %v6004_v45  ;;  %v2018_v8 = vmul.f32 %v1477_v14, %v6641_v7 }
 0x18b   : > { %2326 = vmatmul.bf16.gmra.mxu2 %v6946_v23  ;;  %v1502_v18 = vsel %vm1501_vm14, %v6857_v26, %v1498_v12  ;;  %v1526_v38 = vsub.f32 1.0, %v1525_v24  ;;  %5214 = vpow2.f32 %v4602_v22  ;;  %v1541_v10 = vsub.f32 1.0, %v1540_v0 }
 0x18c   : > { %v1507_v40 = vsel %vm1504_vm15, %v1506_v11, %v1502_v18  ;;  %v6965_v15 = vpop.eup %5210  ;;  %v1513_v26 = vadd.f32 %v6877_v46, %v1512_v28  ;;  %vm1515_vm0 = vweird.f32 %v6877_v46  ;;  %v6971_v61 = vadd.f32 1.0, %v5209_v1 }
 0x18d   : > { %v2020_v31 = vmul.f32 %v1507_v40, %v6712_v25  ;;  %v1518_v7 = vand.u32 2147483647, %v6827_v63  ;;  %v1520_v25 = vand.u32 2147483648, %v6827_v63  ;;  %v4604_v19 = vmul.f32 -1.442695, %v6961_v42 }
 0x18e   : > { %v1542_v4 = vmul.f32 %v6935_v35, %v1541_v10  ;;  %vm1514_vm1 = vweird.f32 %v6827_v63  ;;  %vm1545_vm2 = vweird.f32 %v6935_v35  ;;  %v1550_v44 = vand.u32 2147483648, %v6865_v32  ;;  %v743_v10 = vpop.f32.mrf.mxu1 }
 0x18f   : > { %v6973_v49 = vpack.c.bf16 %v2020_v31, %v2018_v8  ;;  %vm6985_vm3 = vmor %vm1514_vm1, %vm1515_vm0  ;;  %5216 = vrcp.f32 %v6971_v61  ;;  %vm1544_vm4 = vweird.f32 %v6865_v32  ;;  %v1548_v55 = vand.u32 2147483647, %v6865_v32 }
 0x190   : > { %v5213_v56 = vpop.eup %5212  ;;  %v1543_v20 = vadd.f32 %v6935_v35, %v1542_v4  ;;  %v1517_v63 = vsel %vm6985_vm3, %v6877_v46, %v1513_v26  ;;  %vm1519_vm5 = vcmp.eq.f32.partialorder %v1518_v7, 8.507059e+37  ;;  %v1521_v48 = vor.u32 1.1754944e-38, %v1520_v25  ;;  %vm6997_vm6 = vmor %vm1544_vm4, %vm1545_vm2  ;;  %v656_v25 = vpop.f32.mrf.mxu0 }
 0x191   : > { %2415 = vmatmul.bf16.gmra.mxu3 %v6973_v49  ;;  %v5215_v50 = vpop.eup %5214  ;;  %5218 = vpow2.f32 %v4604_v19  ;;  %vm1530_vm7 = vweird.f32 %v6929_v37  ;;  %v7003_v46 = vadd.f32 1.0, %v5213_v56  ;;  %v1551_v51 = vor.u32 1.1754944e-38, %v1550_v44 }
 0x192   : > { %2484 = vmatmul.bf16.gmra.mxu0 %v6505_v13  ;;  %v1527_v13 = vmul.f32 %v6929_v37, %v1526_v38  ;;  %v1547_v32 = vsel %vm6997_vm6, %v6935_v35, %v1543_v20  ;;  %v1522_v58 = vsel %vm1519_vm5, %v1521_v48, %v1517_v63  ;;  %vm1529_vm8 = vweird.f32 %v6861_v27 }
 0x193   : > { %2573 = vmatmul.bf16.gmra.mxu1 %v6558_v17  ;;  %v1555_v17 = vmul.f32 %v6965_v15, %v6917_v36  ;;  %v1535_v3 = vand.u32 2147483648, %v6861_v27  ;;  %v7010_v2 = vadd.f32 1.0, %v5215_v50  ;;  %vm1549_vm9 = vcmp.eq.f32.partialorder %v1548_v55, 8.507059e+37  ;;  %vm7012_vm10 = vmor %vm1529_vm8, %vm1530_vm7 }
 0x194   : > { %v1528_v53 = vadd.f32 %v6929_v37, %v1527_v13  ;;  %v1533_v16 = vand.u32 2147483647, %v6861_v27  ;;  %v1552_v12 = vsel %vm1549_vm9, %v1551_v51, %v1547_v32  ;;  %v2021_v35 = vmul.f32 %v1522_v58, %v6731_v33 }
 0x195   : > { %v1556_v54 = vsub.f32 1.0, %v1555_v17  ;;  %v7018_v22 = vpop.eup %5216  ;;  %5220 = vrcp.f32 %v7003_v46  ;;  %vm1559_vm11 = vweird.f32 %v6917_v36  ;;  %v2023_v28 = vmul.f32 %v1552_v12, %v6775_v30 }
 0x196   : > { %v1532_v11 = vsel %vm7012_vm10, %v6929_v37, %v1528_v53  ;;  %vm1560_vm12 = vweird.f32 %v6965_v15  ;;  %v1563_v18 = vand.u32 2147483647, %v6917_v36  ;;  %v1536_v1 = vor.u32 1.1754944e-38, %v1535_v3  ;;  %v745_v55 = vpop.f32.mrf.mxu1 }
 0x197   : > { %v1557_v14 = vmul.f32 %v6965_v15, %v1556_v54  ;;  %v5219_v0 = vpop.eup %5218  ;;  %5222 = vrcp.f32 %v7010_v2  ;;  %vm7031_vm13 = vmor %vm1559_vm11, %vm1560_vm12  ;;  %v1565_v37 = vand.u32 2147483648, %v6917_v36  ;;  %vm1534_vm14 = vcmp.eq.f32.partialorder %v1533_v16, 8.507059e+37 }
 0x198   : > { %v1570_v40 = vmul.f32 %v7018_v22, %v6971_v61  ;;  %v7038_v30 = vpack.c.bf16 %v2023_v28, %v2021_v35  ;;  %v1537_v38 = vsel %vm1534_vm14, %v1536_v1, %v1532_v11  ;;  %v7043_v31 = vadd.f32 1.0, %v5219_v0 }
 0x199   : > { %v1558_v27 = vadd.f32 %v6965_v15, %v1557_v14  ;;  %v1566_v26 = vor.u32 1.1754944e-38, %v1565_v37  ;;  %vm1564_vm15 = vcmp.eq.f32.partialorder %v1563_v18, 8.507059e+37  ;;  %v7048_v7 = vadd.f32 %v654_v60, %v6002_v41 }
 0x19a   : > { %v1571_v4 = vsub.f32 1.0, %v1570_v40  ;;  %5224 = vrcp.f32 %v7043_v31  ;;  %v7057_v56 = vadd.f32 %v656_v25, %v6002_v41  ;;  %vm1575_vm0 = vweird.f32 %v7018_v22 }
 0x19b   : > { %v1562_v8 = vsel %vm7031_vm13, %v6965_v15, %v1558_v27  ;;  %2331 = vmatmul.bf16.gmra.mxu2 %v7038_v30  ;;  %v5221_v36 = vpop.eup %5220  ;;  %v2022_v15 = vmul.f32 %v1537_v38, %v6767_v5  ;;  %v4605_v43 = vmul.f32 -1.442695, %v7048_v7  ;;  %vm1574_vm1 = vweird.f32 %v6971_v61 }
 0x19c   : > { %v1567_v19 = vsel %vm1564_vm15, %v1566_v26, %v1562_v8  ;;  %v1600_v20 = vmul.f32 %v5221_v36, %v7003_v46  ;;  %v4607_v44 = vmul.f32 -1.442695, %v7057_v56  ;;  %v1580_v54 = vand.u32 2147483648, %v6971_v61  ;;  %vm7080_vm2 = vmor %vm1574_vm1, %vm1575_vm0 }
 0x19d   : > { %v2024_v13 = vmul.f32 %v1567_v19, %v6824_v39  ;;  %v7053_v17 = vpop.eup %5222  ;;  %5226 = vpow2.f32 %v4605_v43  ;;  %v1578_v53 = vand.u32 2147483647, %v6971_v61  ;;  %v7076_v60 = vadd.f32 %v743_v10, %v6004_v45 }
 0x19e   : > { %v1585_v5 = vmul.f32 %v7053_v17, %v7010_v2  ;;  %v1601_v39 = vsub.f32 1.0, %v1600_v20  ;;  %5228 = vpow2.f32 %v4607_v44  ;;  %vm1605_vm3 = vweird.f32 %v5221_v36  ;;  %v748_v37 = vpop.f32.mrf.mxu1 }
 0x19f   : > { %v1610_v3 = vand.u32 2147483648, %v7003_v46  ;;  %v1608_v16 = vand.u32 2147483647, %v7003_v46  ;;  %v1581_v14 = vor.u32 1.1754944e-38, %v1580_v54  ;;  %vm1604_vm4 = vweird.f32 %v7003_v46 }
 0x1a0   : > { %v7068_v63 = vpop.eup %5224  ;;  %v1602_v50 = vmul.f32 %v5221_v36, %v1601_v39  ;;  %v1586_v6 = vsub.f32 1.0, %v1585_v5  ;;  %vm1579_vm5 = vcmp.eq.f32.partialorder %v1578_v53, 8.507059e+37  ;;  %v4606_v35 = vmul.f32 -1.442695, %v7076_v60  ;;  %vm7092_vm6 = vmor %vm1604_vm4, %vm1605_vm3 }
 0x1a1   : > { %v1615_v32 = vmul.f32 %v7068_v63, %v7043_v31  ;;  %v1611_v27 = vor.u32 1.1754944e-38, %v1610_v3  ;;  %vm1590_vm7 = vweird.f32 %v7053_v17  ;;  %vm1609_vm8 = vcmp.eq.f32.partialorder %v1608_v16, 8.507059e+37 }
 0x1a2   : > { %2489 = vmatmul.bf16.gmra.mxu0 %v6626_v9  ;;  %v7059_v9 = vpack.c.bf16 %v2024_v13, %v2022_v15  ;;  %v1603_v51 = vadd.f32 %v5221_v36, %v1602_v50  ;;  %v1587_v61 = vmul.f32 %v7053_v17, %v1586_v6  ;;  %vm1589_vm9 = vweird.f32 %v7010_v2 }
 0x1a3   : > { %2578 = vmatmul.bf16.gmra.mxu1 %v6665_v34  ;;  %v1572_v34 = vmul.f32 %v7018_v22, %v1571_v4  ;;  %v5227_v12 = vpop.eup %5226  ;;  %v1616_v0 = vsub.f32 1.0, %v1615_v32  ;;  %v1595_v33 = vand.u32 2147483648, %v7010_v2  ;;  %5230 = vpow2.f32 %v4606_v35  ;;  %vm7109_vm10 = vmor %vm1589_vm9, %vm1590_vm7  ;;  %v2292_v4 = vpop.f32.mrf.mxu2 }
 0x1a4   : > { %2420 = vmatmul.bf16.gmra.mxu3 %v7059_v9  ;;  %v5229_v18 = vpop.eup %5228  ;;  %v1588_v46 = vadd.f32 %v7053_v17, %v1587_v61  ;;  %v7102_v1 = vadd.f32 1.0, %v5227_v12  ;;  %v1593_v26 = vand.u32 2147483647, %v7010_v2  ;;  %vm1619_vm11 = vweird.f32 %v7043_v31  ;;  %v2381_v32 = vpop.f32.mrf.mxu3 }
 0x1a5   : > { %v1573_v48 = vadd.f32 %v7018_v22, %v1572_v34  ;;  %v1617_v38 = vmul.f32 %v7068_v63, %v1616_v0  ;;  %vm1620_vm12 = vweird.f32 %v7068_v63  ;;  %v1623_v2 = vand.u32 2147483647, %v7043_v31 }
 0x1a6   : > { %v1592_v25 = vsel %vm7109_vm10, %v7053_v17, %v1588_v46  ;;  %5232 = vrcp.f32 %v7102_v1  ;;  %v1596_v15 = vor.u32 1.1754944e-38, %v1595_v33  ;;  %vm1621_vm13 = vmor %vm1619_vm11, %vm1620_vm12  ;;  %v1625_v13 = vand.u32 2147483648, %v7043_v31  ;;  %v2117_v17 = vld [vmem:[%s10215_s4] sm:$0x3] }
 0x1a7   : > { %v1577_v24 = vsel %vm7080_vm2, %v7018_v22, %v1573_v48  ;;  %v1607_v22 = vsel %vm7092_vm6, %v5221_v36, %v1603_v51  ;;  %v7114_v36 = vadd.f32 1.0, %v5229_v18  ;;  %v1618_v19 = vadd.f32 %v7068_v63, %v1617_v38 }
 0x1a8   : > { %v1582_v28 = vsel %vm1579_vm5, %v1581_v14, %v1577_v24  ;;  %v1612_v40 = vsel %vm1609_vm8, %v1611_v27, %v1607_v22  ;;  %vm1594_vm14 = vcmp.eq.f32.partialorder %v1593_v26, 8.507059e+37  ;;  %v1626_v39 = vor.u32 1.1754944e-38, %v1625_v13  ;;  %v4965_v22 = vld [vmem:[#allocation10 + $0x50] sm:$0xff] }
 0x1a9   : > { %v2025_v8 = vmul.f32 %v1582_v28, %v6871_v29  ;;  %v7121_v29 = vadd.f32 %v745_v55, %v6004_v45  ;;  %5234 = vrcp.f32 %v7114_v36  ;;  %v1622_v43 = vsel %vm1621_vm13, %v7068_v63, %v1618_v19  ;;  %v5231_v20 = vpop.eup %5230  ;;  %v750_v63 = vpop.f32.mrf.mxu1  ;;  %v4957_v28 = vld [vmem:[#allocation10 + $0x10] sm:$0xff]  ;;  %4177 = vmatpush.bf16.msrb.mxu3 %v4965_v22 }
 0x1aa   : > { %v1597_v34 = vsel %vm1594_vm14, %v1596_v15, %v1592_v25  ;;  %vm1624_vm15 = vcmp.eq.f32.partialorder %v1623_v2, 8.507059e+37  ;;  %v7139_v55 = vperm.slane %v2117_v17, 0  ;;  %v7142_v48 = vadd.f32 1.0, %v5231_v20  ;;  %4088 = vmatpush.bf16.msrb.mxu2 %v4957_v28 }
 0x1ab   : > { %v4608_v5 = vmul.f32 -1.442695, %v7121_v29  ;;  %v1627_v31 = vsel %vm1624_vm15, %v1626_v39, %v1622_v43  ;;  %v2026_v50 = vmul.f32 %v1597_v34, %v6933_v62  ;;  %v7151_v51 = vadd.f32 %v748_v37, %v6004_v45  ;;  %v2294_v61 = vpop.f32.mrf.mxu2 }
 0x1ac   : > { %v7137_v44 = vpop.eup %5232  ;;  %v2028_v53 = vmul.f32 %v1627_v31, %v6961_v42  ;;  %v2293_v24 = vadd.f32 %v2292_v4, %v7139_v55  ;;  %v2383_v37 = vpop.f32.mrf.mxu3  ;;  %vm1634_vm0 = vweird.f32 %v7102_v1  ;;  %v1638_v10 = vand.u32 2147483647, %v7102_v1 }
 0x1ad   : > { %5236 = vpow2.f32 %v4608_v5  ;;  %v1630_v62 = vmul.f32 %v7137_v44, %v7102_v1  ;;  %v4610_v12 = vmul.f32 -1.442695, %v7151_v51  ;;  %vm1635_vm1 = vweird.f32 %v7137_v44 }
 0x1ae   : > { %v7153_v3 = vpack.c.bf16 %v2028_v53, %v2026_v50  ;;  %5238 = vrcp.f32 %v7142_v48  ;;  %v7166_v11 = vadd.f32 %v2381_v32, %v2293_v24  ;;  %v1640_v2 = vand.u32 2147483648, %v7102_v1  ;;  %vm7193_vm3 = vmor %vm1634_vm0, %vm1635_vm1 }
 0x1af   : > { %v7148_v58 = vpop.eup %5234  ;;  %v1631_v35 = vsub.f32 1.0, %v1630_v62  ;;  %v1670_v13 = vand.u32 2147483648, %v7114_v36  ;;  %vm1664_vm4 = vweird.f32 %v7114_v36  ;;  %v1668_v34 = vand.u32 2147483647, %v7114_v36 }
 0x1b0   : > { %v1660_v16 = vmul.f32 %v7148_v58, %v7114_v36  ;;  %10323 = vst [vmem:[#allocation16_spill] sm:$0xff] %v7166_v11  ;;  %vm1665_vm2 = vweird.f32 %v7148_v58  ;;  %vm7201_vm5 = vcmp.eq.f32.partialorder %v1638_v10, 8.507059e+37  ;;  %v7215_v50 = vadd.f32 %v750_v63, %v6004_v45 }
 0x1b1   : > { %v753_v46 = vpop.f32.mrf.mxu1  ;;  %v1632_v33 = vmul.f32 %v7137_v44, %v1631_v35  ;;  %vm7205_vm6 = vmor %vm1664_vm4, %vm1665_vm2  ;;  %v1641_v53 = vor.u32 1.1754944e-38, %v1640_v2  ;;  %vm1669_vm7 = vcmp.eq.f32.partialorder %v1668_v34, 8.507059e+37  ;;  %vm1649_vm9 = vweird.f32 %v7142_v48 }
 0x1b2   : > { %2494 = vmatmul.bf16.gmra.mxu0 %v6733_v57  ;;  %v659_v57 = vpop.f32.mrf.mxu0  ;;  %v1661_v0 = vsub.f32 1.0, %v1660_v16  ;;  %v7233_v16 = vadd.f32 %v753_v46, %v6004_v45 }
 0x1b3   : > { %2583 = vmatmul.bf16.gmra.mxu1 %v6759_v21  ;;  %v2027_v21 = vmul.f32 %v1612_v40, %v6920_v47  ;;  %v7145_v6 = vadd.f32 %v659_v57, %v6002_v41  ;;  %v5237_v14 = vpop.eup %5236  ;;  %v4757_v57 = vmul.f32 -1.442695, %v7166_v11  ;;  %v1633_v26 = vadd.f32 %v7137_v44, %v1632_v33 }
 0x1b4   : > { %2425 = vmatmul.bf16.gmra.mxu3 %v7153_v3  ;;  %v7169_v27 = vpop.eup %5238  ;;  %v7171_v18 = vadd.f32 1.0, %v5237_v14  ;;  %v1662_v40 = vmul.f32 %v7148_v58, %v1661_v0  ;;  %v1653_v14 = vand.u32 2147483647, %v7142_v48  ;;  %v1655_v0 = vand.u32 2147483648, %v7142_v48 }
 0x1b5   : > { %v7123_v47 = vpack.c.bf16 %v2027_v21, %v2025_v8  ;;  %v4609_v42 = vmul.f32 -1.442695, %v7145_v6  ;;  %v1645_v21 = vmul.f32 %v7169_v27, %v7142_v48  ;;  %v1637_v39 = vsel %vm7193_vm3, %v7137_v44, %v1633_v26 }
 0x1b6   : > { %v1663_v25 = vadd.f32 %v7148_v58, %v1662_v40  ;;  %v1671_v44 = vor.u32 1.1754944e-38, %v1670_v13  ;;  %vm1650_vm8 = vweird.f32 %v7169_v27  ;;  %vm7266_vm11 = vcmp.eq.f32.partialorder %v1653_v14, 8.507059e+37 }
 0x1b7   : > { %2336 = vmatmul.bf16.gmra.mxu2 %v7123_v47  ;;  %5240 = vpow2.f32 %v4609_v42  ;;  %v1646_v43 = vsub.f32 1.0, %v1645_v21  ;;  %v2386_v21 = vpop.f32.mrf.mxu3  ;;  %vm7262_vm10 = vmor %vm1649_vm9, %vm1650_vm8  ;;  %vm1679_vm13 = vweird.f32 %v7171_v18 }
 0x1b8   : > { %5242 = vpow2.f32 %v4610_v12  ;;  %v1667_v36 = vsel %vm7205_vm6, %v7148_v58, %v1663_v25 }
 0x1b9   : > { %5244 = vrcp.f32 %v7171_v18  ;;  %v755_v24 = vpop.f32.mrf.mxu1  ;;  %v1647_v63 = vmul.f32 %v7169_v27, %v1646_v43  ;;  %v1672_v12 = vsel %vm1669_vm7, %v1671_v44, %v1667_v36  ;;  %v1683_v36 = vand.u32 2147483647, %v7171_v18 }
 0x1ba   : > { %v661_v54 = vpop.f32.mrf.mxu0  ;;  %5246 = vpow2.f32 %v4757_v57  ;;  %v2031_v46 = vmul.f32 %v1672_v12, %v7057_v56  ;;  %v4614_v57 = vmul.f32 -1.442695, %v7233_v16 }
 0x1bb   : > { %v7190_v4 = vadd.f32 %v661_v54, %v6002_v41  ;;  %v1648_v22 = vadd.f32 %v7169_v27, %v1647_v63  ;;  %vm1684_vm15 = vcmp.eq.f32.partialorder %v1683_v36, 8.507059e+37  ;;  %v10350_v36 = vmov 0 }
 0x1bd   : > { %v5241_v38 = vpop.eup %5240  ;;  %v4611_v32 = vmul.f32 -1.442695, %v7190_v4  ;;  %v1652_v25 = vsel %vm7262_vm10, %v7169_v27, %v1648_v22 }
 0x1be   : > { %v5243_v19 = vpop.eup %5242  ;;  %v7197_v20 = vadd.f32 1.0, %v5241_v38 }
 0x1bf   : > { %v7212_v31 = vadd.f32 1.0, %v5243_v19  ;;  %v7221_v54 = vpop.eup %5244  ;;  %v1656_v19 = vor.u32 1.1754944e-38, %v1655_v0 }
 0x1c0   : > { %v5247_v42 = vpop.eup %5246  ;;  %v1675_v35 = vmul.f32 %v7221_v54, %v7171_v18  ;;  %vm1680_vm12 = vweird.f32 %v7221_v54  ;;  %v1698_v22 = vand.u32 2147483647, %v7197_v20  ;;  %vm1694_vm0 = vweird.f32 %v7197_v20 }
 0x1c1   : > { %v7285_v1 = vpop.f32.mrf.mxu1  ;;  %vm1681_vm14 = vmor %vm1679_vm13, %vm1680_vm12  ;;  %vm1709_vm1 = vweird.f32 %v7212_v31 }
 0x1c2   : > { %2499 = vmatmul.bf16.gmra.mxu0 %v6843_v59  ;;  %v2295_v59 = vadd.f32 %v2294_v61, %v7139_v55  ;;  %v2297_v61 = vpop.f32.mrf.mxu2  ;;  %v1676_v10 = vsub.f32 1.0, %v1675_v35  ;;  %vm7340_vm3 = vcmp.eq.f32.partialorder %v1698_v22, 8.507059e+37 }
 0x1c3   : > { %2588 = vmatmul.bf16.gmra.mxu1 %v6867_v52  ;;  %v664_v52 = vpop.f32.mrf.mxu0  ;;  %v2298_v17 = vadd.f32 %v2297_v61, %v7139_v55 }
 0x1c4   : > { %v7176_v8 = vadd.f32 %v2383_v37, %v2295_v59  ;;  %v7228_v58 = vadd.f32 %v664_v52, %v6002_v41  ;;  %v7242_v59 = vadd.f32 1.0, %v5247_v42 }
 0x1c6   : > { %10324 = vst [vmem:[#allocation17_spill] sm:$0xff] %v7176_v8  ;;  %v4759_v15 = vmul.f32 -1.442695, %v7176_v8  ;;  %v4613_v52 = vmul.f32 -1.442695, %v7228_v58 }
 0x1c7   : > { %10331 = vst [vmem:[#allocation18_spill] sm:$0xff] %v7242_v59 }
 0x1c8   : > { %5248 = vpow2.f32 %v4759_v15 }
 0x1c9   : > { %5250 = vrcp.f32 %v7197_v20 }
 0x1ca   : > { %5252 = vrcp.f32 %v7212_v31  ;;  %v2299_v27 = vpop.f32.mrf.mxu2 }
 0x1cb   : > { %v666_v62 = vpop.f32.mrf.mxu0  ;;  %5254 = vpow2.f32 %v4611_v32  ;;  %v1700_v32 = vand.u32 2147483648, %v7197_v20  ;;  %v2300_v12 = vadd.f32 %v2299_v27, %v7139_v55  ;;  %v760_v27 = vpop.f32.mrf.mxu1 }
 0x1cc   : > { %v7251_v37 = vadd.f32 %v666_v62, %v6002_v41 }
 0x1ce   : > { %v5249_v33 = vpop.eup %5248  ;;  %v4615_v43 = vmul.f32 -1.442695, %v7251_v37 }
 0x1cf   : > { %v7253_v40 = vpop.eup %5250  ;;  %v7276_v2 = vadd.f32 1.0, %v5249_v33 }
 0x1d0   : > { %v7271_v26 = vpop.eup %5252  ;;  %v1690_v13 = vmul.f32 %v7253_v40, %v7197_v20  ;;  %vm1695_vm2 = vweird.f32 %v7253_v40 }
 0x1d1   : > { %10336 = vst [vmem:[#allocation19_spill] sm:$0xff] %v7276_v2  ;;  %v5255_v15 = vpop.eup %5254  ;;  %v1705_v62 = vmul.f32 %v7271_v26, %v7212_v31  ;;  %vm1710_vm4 = vweird.f32 %v7271_v26  ;;  %vm7382_vm6 = vmor %vm1694_vm0, %vm1695_vm2 }
 0x1d2   : > { %2504 = vmatmul.bf16.gmra.mxu0 %v6946_v23  ;;  %v1642_v23 = vsel %vm7201_vm5, %v1641_v53, %v1637_v39  ;;  %v1677_v39 = vmul.f32 %v7221_v54, %v1676_v10  ;;  %v1657_v53 = vsel %vm7266_vm11, %v1656_v19, %v1652_v25  ;;  %v7298_v42 = vadd.f32 1.0, %v5255_v15  ;;  %vm7398_vm7 = vmor %vm1709_vm1, %vm1710_vm4 }
 0x1d3   : > { %2593 = vmatmul.bf16.gmra.mxu1 %v6973_v49  ;;  %v4612_v49 = vmul.f32 -1.442695, %v7215_v50  ;;  %v2029_v28 = vmul.f32 %v1642_v23, %v7048_v7  ;;  %v7256_v7 = vadd.f32 %v755_v24, %v6004_v45  ;;  %v7283_v34 = vpop.f32.mrf.mxu0  ;;  %v1685_v24 = vand.u32 2147483648, %v7171_v18 }
 0x1d4   : > { %v1678_v63 = vadd.f32 %v7221_v54, %v1677_v39  ;;  %v7304_v23 = vadd.f32 %v2386_v21, %v2298_v17  ;;  %v1691_v35 = vsub.f32 1.0, %v1690_v13  ;;  %v1713_v15 = vand.u32 2147483647, %v7212_v31 }
 0x1d5   : > { %5256 = vpow2.f32 %v4612_v49  ;;  %v7258_v38 = vpack.c.bf16 %v2031_v46, %v2029_v28  ;;  %v4616_v5 = vmul.f32 -1.442695, %v7256_v7  ;;  %v1686_v14 = vor.u32 1.1754944e-38, %v1685_v24 }
 0x1d6   : > { %5258 = vrcp.f32 %v7242_v59  ;;  %10338 = vst [vmem:[#allocation21_spill] sm:$0xff] %v7304_v23  ;;  %v1682_v0 = vsel %vm1681_vm14, %v7221_v54, %v1678_v63  ;;  %v2030_v28 = vmul.f32 %v1657_v53, %v7076_v60  ;;  %v2388_v54 = vpop.f32.mrf.mxu3  ;;  %v4761_v60 = vmul.f32 -1.442695, %v7304_v23 }
 0x1d7   : > { %5260 = vpow2.f32 %v4613_v52  ;;  %2341 = vmatmul.bf16.gmra.mxu2 %v7258_v38  ;;  %v1706_v52 = vsub.f32 1.0, %v1705_v62  ;;  %v1687_v46 = vsel %vm1684_vm15, %v1686_v14, %v1682_v0  ;;  %v7324_v10 = vadd.f32 %v2388_v54, %v2300_v12 }
 0x1d8   : > { %5262 = vpow2.f32 %v4614_v57  ;;  %v2032_v21 = vmul.f32 %v1687_v46, %v7121_v29  ;;  %v1715_v13 = vand.u32 2147483648, %v7212_v31  ;;  %v7352_v62 = vadd.f32 %v7283_v34, %v6002_v41 }
 0x1d9   : > { %5264 = vrcp.f32 %v7276_v2  ;;  %10339 = vst [vmem:[#allocation22_spill] sm:$0xff] %v7324_v10  ;;  %v1707_v29 = vmul.f32 %v7271_v26, %v1706_v52  ;;  %vm2900_vm5 = vweird.f32 %v7242_v59  ;;  %v7370_v34 = vadd.f32 %v7285_v1, %v6004_v45 }
 0x1da   : > { %5266 = vpow2.f32 %v4615_v43  ;;  %v7332_v25 = vpack.c.bf16 %v2032_v21, %v2030_v28  ;;  %v7376_v28 = vadd.f32 %v760_v27, %v6004_v45  ;;  %v4617_v1 = vmul.f32 -1.442695, %v7352_v62 }
 0x1db   : > { %v5257_v44 = vpop.eup %5256  ;;  %5268 = vpow2.f32 %v4616_v5  ;;  %v671_v43 = vpop.f32.mrf.mxu0  ;;  %v1708_v14 = vadd.f32 %v7271_v26, %v1707_v29  ;;  %vm7402_vm8 = vcmp.eq.f32.partialorder %v1713_v15, 8.507059e+37  ;;  %v4618_v31 = vmul.f32 -1.442695, %v7370_v34 }
 0x1dc   : > { %v7302_v61 = vpop.eup %5258  ;;  %5270 = vrcp.f32 %v7298_v42  ;;  %v7317_v57 = vadd.f32 1.0, %v5257_v44  ;;  %2430 = vmatmul.bf16.gmra.mxu3 %v7332_v25  ;;  %v7362_v12 = vadd.f32 %v671_v43, %v6002_v41  ;;  %v4620_v27 = vmul.f32 -1.442695, %v7376_v28 }
 0x1dd   : > { %10337 = vst [vmem:[#allocation20_spill] sm:$0xff] %v7302_v61  ;;  %v5261_v49 = vpop.eup %5260  ;;  %v2896_v33 = vmul.f32 %v7302_v61, %v7242_v59  ;;  %vm2901_vm9 = vweird.f32 %v7302_v61  ;;  %vm1724_vm13 = vweird.f32 %v7298_v42 }
 0x1de   : > { %v5263_v18 = vpop.eup %5262  ;;  %v7330_v48 = vadd.f32 1.0, %v5261_v49  ;;  %5272 = vrcp.f32 %v7317_v57  ;;  %vm7443_vm10 = vmor %vm2900_vm5, %vm2901_vm9 }
 0x1df   : > { %v7326_v56 = vpop.eup %5264  ;;  %v7337_v17 = vadd.f32 1.0, %v5263_v18  ;;  %v2897_v39 = vsub.f32 1.0, %v2896_v33  ;;  %5274 = vpow2.f32 %v4761_v60  ;;  %v2906_v18 = vand.u32 2147483648, %v7242_v59 }
 0x1e0   : > { %v5267_v19 = vpop.eup %5266  ;;  %v2926_v53 = vmul.f32 %v7326_v56, %v7276_v2  ;;  %5276 = vrcp.f32 %v7330_v48  ;;  %v4619_v60 = vmul.f32 -1.442695, %v7362_v12  ;;  %v10351_v36 = vsel %vm7443_vm10, 4294967295, %v10350_v36 }
 0x1e1   : > { %v5269_v5 = vpop.eup %5268  ;;  %v7359_v63 = vadd.f32 1.0, %v5267_v19  ;;  %5278 = vrcp.f32 %v7337_v17  ;;  %v1716_v19 = vor.u32 1.1754944e-38, %v1715_v13  ;;  %v7419_v43 = vor.u32 1.1754944e-38, %v2906_v18  ;;  %10352 = vst [vmem:[#allocation25_spill] sm:$0xff] %v10351_v36 }
 0x1e2   : > { %2509 = vmatmul.bf16.gmra.mxu0 %v7038_v30  ;;  %v7321_v30 = vor.u32 1.1754944e-38, %v1700_v32  ;;  %v4763_v32 = vmul.f32 -1.442695, %v7324_v10  ;;  %v7354_v24 = vpop.eup %5270  ;;  %v7366_v49 = vadd.f32 1.0, %v5269_v5  ;;  %v2927_v52 = vsub.f32 1.0, %v2926_v53 }
 0x1e3   : > { %2598 = vmatmul.bf16.gmra.mxu1 %v7059_v9  ;;  %v1692_v9 = vmul.f32 %v7253_v40, %v1691_v35  ;;  %v2898_v35 = vmul.f32 %v7302_v61, %v2897_v39  ;;  %v1720_v46 = vmul.f32 %v7354_v24, %v7298_v42  ;;  %10349 = vst [vmem:[#allocation24_spill] sm:$0xff] %v7419_v43  ;;  %v7428_v53 = vpop.f32.mrf.mxu0  ;;  %vm1725_vm11 = vweird.f32 %v7354_v24 }
 0x1e4   : > { %5280 = vpow2.f32 %v4763_v32  ;;  %v7389_v33 = vpop.eup %5272  ;;  %v2928_v13 = vmul.f32 %v7326_v56, %v2927_v52  ;;  %v7430_v32 = vpop.f32.mrf.mxu1  ;;  %v1760_v52 = vand.u32 2147483648, %v7330_v48  ;;  %vm1754_vm12 = vweird.f32 %v7330_v48  ;;  %vm7515_vm15 = vmor %vm1724_vm13, %vm1725_vm11 }
 0x1e5   : > { %v1693_v44 = vadd.f32 %v7253_v40, %v1692_v9  ;;  %5282 = vrcp.f32 %v7359_v63  ;;  %v5275_v9 = vpop.eup %5274  ;;  %v7416_v15 = vadd.f32 %v7302_v61, %v2898_v35  ;;  %v1721_v39 = vsub.f32 1.0, %v1720_v46 }
 0x1e6   : > { %5284 = vrcp.f32 %v7366_v49  ;;  %v7413_v29 = vpop.eup %5276  ;;  %v1735_v35 = vmul.f32 %v7389_v33, %v7317_v57  ;;  %vm1769_vm14 = vweird.f32 %v7337_v17  ;;  %vm1784_vm1 = vweird.f32 %v7359_v63 }
 0x1e7   : > { %v1697_v54 = vsel %vm7382_vm6, %v7253_v40, %v1693_v44  ;;  %v1712_v40 = vsel %vm7398_vm7, %v7271_v26, %v1708_v14  ;;  %10348 = vst [vmem:[#allocation23_spill] sm:$0xff] %v7416_v15  ;;  %v7422_v5 = vpop.eup %5278  ;;  %5286 = vpow2.f32 %v4617_v1  ;;  %v7434_v14 = vadd.f32 1.0, %v5275_v9  ;;  %v7472_v9 = vpop.f32.mrf.mxu2 }
 0x1e8   : > { %v1702_v26 = vsel %vm7340_vm3, %v7321_v30, %v1697_v54  ;;  %v1717_v44 = vsel %vm7402_vm8, %v1716_v19, %v1712_v40  ;;  %5288 = vpow2.f32 %v4619_v60  ;;  %v1750_v22 = vmul.f32 %v7413_v29, %v7330_v48 }
 0x1e9   : > { %5290 = vpow2.f32 %v4618_v31  ;;  %v7459_v46 = vmul.f32 %v1702_v26, %v7145_v6  ;;  %v1765_v54 = vmul.f32 %v7422_v5, %v7337_v17  ;;  %v7466_v21 = vmul.f32 %v1717_v44, %v7151_v51 }
 0x1ea   : > { %v5281_v30 = vpop.eup %5280  ;;  %5292 = vpow2.f32 %v4620_v27  ;;  %v1775_v60 = vand.u32 2147483648, %v7337_v17  ;;  %v1722_v40 = vmul.f32 %v7354_v24, %v1721_v39  ;;  %v1758_v6 = vand.u32 2147483647, %v7330_v48 }
 0x1eb   : > { %5294 = vrcp.f32 %v7434_v14  ;;  %v7477_v19 = vadd.f32 1.0, %v5281_v30  ;;  %v1736_v31 = vsub.f32 1.0, %v1735_v35  ;;  %v1751_v26 = vsub.f32 1.0, %v1750_v22 }
 0x1ec   : > { %v7479_v51 = vor.u32 1.1754944e-38, %v1760_v52  ;;  %v1766_v1 = vsub.f32 1.0, %v1765_v54  ;;  %v1788_v39 = vand.u32 2147483647, %v7359_v63  ;;  %v1728_v30 = vand.u32 2147483647, %v7298_v42  ;;  %v7505_v15 = vpop.f32.mrf.mxu1 }
 0x1ed   : > { %v7488_v35 = vor.u32 1.1754944e-38, %v1775_v60  ;;  %v1723_v22 = vadd.f32 %v7354_v24, %v1722_v40  ;;  %v1730_v52 = vand.u32 2147483648, %v7298_v42  ;;  %5296 = vrcp.f32 %v7477_v19  ;;  %v7503_v40 = vpop.f32.mrf.mxu0  ;;  %v2391_v42 = vpop.f32.mrf.mxu3 }
 0x1ee   : > { %v1790_v54 = vand.u32 2147483648, %v7359_v63  ;;  %v1737_v11 = vmul.f32 %v7389_v33, %v1736_v31  ;;  %vm1729_vm0 = vcmp.eq.f32.partialorder %v1728_v30, 8.507059e+37  ;;  %vm1740_vm2 = vweird.f32 %v7389_v33 }
 0x1ef   : > { %v1743_v30 = vand.u32 2147483647, %v7317_v57  ;;  %vm1755_vm3 = vweird.f32 %v7413_v29  ;;  %v2304_v2 = vpop.f32.mrf.mxu2  ;;  %vm7535_vm4 = vcmp.eq.f32.partialorder %v1758_v6, 8.507059e+37  ;;  %vm1770_vm5 = vweird.f32 %v7422_v5 }
 0x1f0   : > { %vm1739_vm6 = vweird.f32 %v7317_v57  ;;  %vm7552_vm9 = vcmp.eq.f32.partialorder %v1788_v39, 8.507059e+37 }
 0x1f1   : > { %vm1741_vm7 = vmor %vm1739_vm6, %vm1740_vm2  ;;  %vm1744_vm11 = vcmp.eq.f32.partialorder %v1743_v30, 8.507059e+37 }
 0x1f2   : > { %2514 = vmatmul.bf16.gmra.mxu0 %v7123_v47  ;;  %v7452_v47 = vpop.eup %5282 }
 0x1f3   : > { %2603 = vmatmul.bf16.gmra.mxu1 %v7153_v3  ;;  %v7463_v20 = vpop.eup %5284  ;;  %v7469_v3 = vadd.f32 %v7326_v56, %v2928_v13  ;;  %v1773_v13 = vand.u32 2147483647, %v7337_v17  ;;  %v1780_v44 = vmul.f32 %v7452_v47, %v7359_v63  ;;  %vm1785_vm13 = vweird.f32 %v7452_v47 }
 0x1f4   : > { %v5287_v27 = vpop.eup %5286  ;;  %v1795_v0 = vmul.f32 %v7463_v20, %v7366_v49  ;;  %vm1800_vm2 = vweird.f32 %v7463_v20  ;;  %v7601_v30 = vpop.f32.mrf.mxu1 }
 0x1f5   : > { %10353 = vst [vmem:[#allocation26_spill] sm:$0xff] %v7469_v3  ;;  %v5289_v18 = vpop.eup %5288  ;;  %v7495_v8 = vadd.f32 1.0, %v5287_v27  ;;  %v1752_v3 = vmul.f32 %v7413_v29, %v1751_v26  ;;  %v1781_v60 = vsub.f32 1.0, %v1780_v44  ;;  %v1767_v27 = vmul.f32 %v7422_v5, %v1766_v1 }
 0x1f6   : > { %v5291_v23 = vpop.eup %5290  ;;  %v7500_v43 = vadd.f32 1.0, %v5289_v18  ;;  %v1796_v31 = vsub.f32 1.0, %v1795_v0  ;;  %v1727_v1 = vsel %vm7515_vm15, %v7354_v24, %v1723_v22  ;;  %v1731_v44 = vor.u32 1.1754944e-38, %v1730_v52  ;;  %vm7571_vm15 = vmor %vm1754_vm12, %vm1755_vm3 }
 0x1f7   : > { %v5293_v10 = vpop.eup %5292  ;;  %v7511_v36 = vadd.f32 1.0, %v5291_v23  ;;  %v1745_v23 = vand.u32 2147483648, %v7317_v57  ;;  %5298 = vrcp.f32 %v7495_v8  ;;  %v1738_v0 = vadd.f32 %v7389_v33, %v1737_v11  ;;  %vm7589_vm12 = vmor %vm1769_vm14, %vm1770_vm5 }
 0x1f8   : > { %v7507_v61 = vpop.eup %5294  ;;  %v7520_v26 = vadd.f32 1.0, %v5293_v10  ;;  %v1782_v10 = vmul.f32 %v7452_v47, %v1781_v60  ;;  %5300 = vrcp.f32 %v7500_v43  ;;  %v1732_v18 = vsel %vm1729_vm0, %v1731_v44, %v1727_v1  ;;  %vm7612_vm14 = vmor %vm1784_vm1, %vm1785_vm13 }
 0x1f9   : > { %v7533_v24 = vpop.eup %5296  ;;  %v1803_v11 = vand.u32 2147483647, %v7366_v49  ;;  %5302 = vrcp.f32 %v7511_v36  ;;  %v1753_v52 = vadd.f32 %v7413_v29, %v1752_v3  ;;  %v1768_v60 = vadd.f32 %v7422_v5, %v1767_v27 }
 0x1fa   : > { %5304 = vrcp.f32 %v7520_v26  ;;  %v1746_v6 = vor.u32 1.1754944e-38, %v1745_v23  ;;  %vm7548_vm8 = vcmp.eq.f32.partialorder %v1773_v13, 8.507059e+37  ;;  %v1797_v57 = vmul.f32 %v7463_v20, %v1796_v31 }
 0x1fb   : > { %v2035_v3 = vmul.f32 %v1732_v18, %v7190_v4  ;;  %v1742_v27 = vsel %vm1741_vm7, %v7389_v33, %v1738_v0  ;;  %v1783_v59 = vadd.f32 %v7452_v47, %v1782_v10  ;;  %v2303_v13 = vadd.f32 %v7472_v9, %v7139_v55  ;;  %v7599_v0 = vpop.f32.mrf.mxu0 }
 0x1fc   : > { %v1747_v39 = vsel %vm1744_vm11, %v1746_v6, %v1742_v27  ;;  %vm1799_vm0 = vweird.f32 %v7366_v49  ;;  %v1805_v33 = vand.u32 2147483648, %v7366_v49  ;;  %vm7594_vm3 = vcmp.eq.f32.partialorder %v1803_v11, 8.507059e+37 }
 0x1fd   : > { %v7565_v23 = vpop.eup %5298  ;;  %v7578_v9 = vpack.c.bf16 %v2035_v3, %v7459_v46  ;;  %v2036_v46 = vmul.f32 %v1747_v39, %v7215_v50  ;;  %v1772_v17 = vsel %vm7589_vm12, %v7422_v5, %v1768_v60  ;;  %v1798_v50 = vadd.f32 %v7463_v20, %v1797_v57  ;;  %v2393_v60 = vpop.f32.mrf.mxu3  ;;  %vm7652_vm1 = vmor %vm1799_vm0, %vm1800_vm2 }
 0x1fe   : > { %v7580_v31 = vpop.eup %5300  ;;  %v7620_v18 = vadd.f32 %v7428_v53, %v6002_v41  ;;  %v7624_v11 = vadd.f32 %v7430_v32, %v6004_v45  ;;  %v1787_v63 = vsel %vm7612_vm14, %v7452_v47, %v1783_v59  ;;  %v7638_v53 = vadd.f32 %v7503_v40, %v6002_v41  ;;  %v7659_v40 = vpop.f32.mrf.mxu2 }
 0x1ff   : > { %2346 = vmatmul.bf16.gmra.mxu2 %v7578_v9  ;;  %v7634_v6 = vpack.c.bf16 %v2036_v46, %v7466_v21  ;;  %v2305_v57 = vadd.f32 %v2304_v2, %v7139_v55  ;;  %v1840_v32 = vmul.f32 %v7580_v31, %v7500_v43  ;;  %v1806_v2 = vor.u32 1.1754944e-38, %v1805_v33  ;;  %v4964_v46 = vld [vmem:[#allocation10 + $0x48] sm:$0xff] }
 0x200   : > { %v4621_v3 = vmul.f32 -1.442695, %v7620_v18  ;;  %v4622_v27 = vmul.f32 -1.442695, %v7624_v11  ;;  %v1810_v21 = vmul.f32 %v7565_v23, %v7495_v8  ;;  %v1802_v49 = vsel %vm7652_vm1, %v7463_v20, %v1798_v50  ;;  %4178 = vmatpush.bf16.msrb.mxu3 %v4964_v46 }
 0x201   : > { %2435 = vmatmul.bf16.gmra.mxu3 %v7634_v6  ;;  %v1777_v39 = vsel %vm7548_vm8, %v7488_v35, %v1772_v17  ;;  %v7680_v33 = vadd.f32 %v2393_v60, %v2305_v57  ;;  %v7684_v48 = vmul.f32 %v7507_v61, %v7434_v14  ;;  %v1807_v1 = vsel %vm7594_vm3, %v1806_v2, %v1802_v49 }
 0x202   : > { %2519 = vmatmul.bf16.gmra.mxu0 %v7258_v38  ;;  %v1791_v38 = vor.u32 1.1754944e-38, %v1790_v54  ;;  %5306 = vpow2.f32 %v4621_v3  ;;  %v1811_v35 = vsub.f32 1.0, %v1810_v21  ;;  %v1820_v44 = vand.u32 2147483648, %v7495_v8 }
 0x203   : > { %2608 = vmatmul.bf16.gmra.mxu1 %v7332_v25  ;;  %v1757_v25 = vsel %vm7571_vm15, %v7413_v29, %v1753_v52  ;;  %v7603_v29 = vpop.eup %5302  ;;  %v7631_v52 = vadd.f32 %v2391_v42, %v2303_v13  ;;  %v7663_v42 = vadd.f32 %v7505_v15, %v6004_v45  ;;  %v4623_v13 = vmul.f32 -1.442695, %v7638_v53  ;;  %10373 = vst [vmem:[#allocation28_spill] sm:$0xff] %v7680_v33  ;;  %v7696_v54 = vpop.f32.mrf.mxu0 }
 0x204   : > { %v7626_v5 = vpop.eup %5304  ;;  %v1762_v59 = vsel %vm7535_vm4, %v7479_v51, %v1757_v25  ;;  %v1825_v51 = vmul.f32 %v7603_v29, %v7511_v36  ;;  %v1792_v15 = vsel %vm7552_vm9, %v1791_v38, %v1787_v63  ;;  %v1841_v25 = vsub.f32 1.0, %v1840_v32  ;;  %v4956_v38 = vld [vmem:[#allocation10 + $0x8] sm:$0xff]  ;;  %v7698_v32 = vpop.f32.mrf.mxu1 }
 0x205   : > { %10370 = vst [vmem:[#allocation27_spill] sm:$0xff] %v7631_v52  ;;  %v1855_v22 = vmul.f32 %v7626_v5, %v7520_v26  ;;  %v4624_v4 = vmul.f32 -1.442695, %v7663_v42  ;;  %v4765_v20 = vmul.f32 -1.442695, %v7631_v52  ;;  %5308 = vpow2.f32 %v4622_v27  ;;  %4089 = vmatpush.bf16.msrb.mxu2 %v4956_v38  ;;  %v7710_v2 = vpop.f32.mrf.mxu3 }
 0x206   : > { %v2039_v17 = vmul.f32 %v1792_v15, %v7251_v37  ;;  %v1826_v10 = vsub.f32 1.0, %v1825_v51  ;;  %5310 = vpow2.f32 %v4623_v13  ;;  %v2037_v63 = vmul.f32 %v1762_v59, %v7228_v58  ;;  %v7723_v15 = vpop.f32.mrf.mxu2 }
 0x207   : > { %v1856_v50 = vsub.f32 1.0, %v1855_v22  ;;  %v2038_v60 = vmul.f32 %v1777_v39, %v7233_v16  ;;  %v7694_v57 = vmul.f32 %v7533_v24, %v7477_v19  ;;  %5312 = vpow2.f32 %v4624_v4 }
 0x208   : > { %v2040_v37 = vmul.f32 %v1807_v1, %v7256_v7  ;;  %5314 = vpow2.f32 %v4765_v20  ;;  %v7702_v3 = vmul.f32 -1.442695, %v7680_v33  ;;  %v1842_v58 = vmul.f32 %v7580_v31, %v1841_v25  ;;  %v5307_v16 = vpop.eup %5306 }
 0x209   : > { %v1812_v27 = vmul.f32 %v7565_v23, %v1811_v35  ;;  %vm1814_vm4 = vweird.f32 %v7495_v8  ;;  %v1818_v59 = vand.u32 2147483647, %v7495_v8  ;;  %v7708_v47 = vor.u32 1.1754944e-38, %v1820_v44 }
 0x20a   : > { %v1827_v7 = vmul.f32 %v7603_v29, %v1826_v10  ;;  %v1857_v49 = vmul.f32 %v7626_v5, %v1856_v50  ;;  %v7714_v51 = vadd.f32 1.0, %v5307_v16  ;;  %v7716_v22 = vpack.c.bf16 %v2039_v17, %v2037_v63 }
 0x20b   : > { %v5309_v21 = vpop.eup %5308  ;;  %vm1815_vm5 = vweird.f32 %v7565_v23  ;;  %v1835_v13 = vand.u32 2147483648, %v7511_v36  ;;  %vm1844_vm6 = vweird.f32 %v7500_v43  ;;  %v1848_v39 = vand.u32 2147483647, %v7500_v43 }
 0x20c   : > { %v5311_v4 = vpop.eup %5310  ;;  %v1843_v20 = vadd.f32 %v7580_v31, %v1842_v58  ;;  %vm1845_vm7 = vweird.f32 %v7580_v31  ;;  %v1850_v25 = vand.u32 2147483648, %v7500_v43  ;;  %5316 = vrcp.f32 %v7714_v51  ;;  %vm7740_vm9 = vmor %vm1814_vm4, %vm1815_vm5 }
 0x20d   : > { %v1813_v1 = vadd.f32 %v7565_v23, %v1812_v27  ;;  %vm1830_vm8 = vweird.f32 %v7603_v29  ;;  %v7732_v35 = vadd.f32 1.0, %v5309_v21  ;;  %v7734_v44 = vpack.c.bf16 %v2040_v37, %v2038_v60  ;;  %vm7756_vm15 = vmor %vm1844_vm6, %vm1845_vm7  ;;  %v7785_v21 = vpop.f32.mrf.mxu1 }
 0x20e   : > { %v1828_v46 = vadd.f32 %v7603_v29, %v1827_v7  ;;  %v1858_v17 = vadd.f32 %v7626_v5, %v1857_v49  ;;  %vm1860_vm11 = vweird.f32 %v7626_v5  ;;  %v7747_v10 = vadd.f32 1.0, %v5311_v4 }
 0x20f   : > { %2351 = vmatmul.bf16.gmra.mxu2 %v7716_v22  ;;  %vm1829_vm13 = vweird.f32 %v7511_v36  ;;  %v1833_v50 = vand.u32 2147483647, %v7511_v36  ;;  %v1865_v63 = vand.u32 2147483648, %v7520_v26  ;;  %5318 = vrcp.f32 %v7732_v35 }
 0x210   : > { %vm7764_vm0 = vmor %vm1829_vm13, %vm1830_vm8  ;;  %v1847_v36 = vsel %vm7756_vm15, %v7580_v31, %v1843_v20  ;;  %vm1859_vm12 = vweird.f32 %v7520_v26  ;;  %v1863_v43 = vand.u32 2147483647, %v7520_v26  ;;  %v1836_v58 = vor.u32 1.1754944e-38, %v1835_v13  ;;  %v7783_v31 = vpop.f32.mrf.mxu0 }
 0x211   : > { %vm1849_vm2 = vcmp.eq.f32.partialorder %v1848_v39, 8.507059e+37  ;;  %v1851_v16 = vor.u32 1.1754944e-38, %v1850_v25  ;;  %vm7777_vm3 = vmor %vm1859_vm12, %vm1860_vm11  ;;  %5320 = vrcp.f32 %v7747_v10  ;;  %2440 = vmatmul.bf16.gmra.mxu3 %v7734_v44  ;;  %v1817_v7 = vsel %vm7740_vm9, %v7565_v23, %v1813_v1 }
 0x212   : > { %2524 = vmatmul.bf16.gmra.mxu0 %v7578_v9  ;;  %v5313_v9 = vpop.eup %5312  ;;  %v1832_v49 = vsel %vm7764_vm0, %v7603_v29, %v1828_v46  ;;  %v1862_v13 = vsel %vm7777_vm3, %v7626_v5, %v1858_v17  ;;  %v7800_v39 = vadd.f32 %v7599_v0, %v6002_v41  ;;  %v1866_v20 = vor.u32 1.1754944e-38, %v1865_v63  ;;  %v7816_v46 = vpop.f32.mrf.mxu2 }
 0x213   : > { %2613 = vmatmul.bf16.gmra.mxu1 %v7634_v6  ;;  %v5315_v38 = vpop.eup %5314  ;;  %v7773_v37 = vadd.f32 1.0, %v5313_v9  ;;  %v1852_v4 = vsel %vm1849_vm2, %v1851_v16, %v1847_v36  ;;  %v7804_v9 = vpop.f32.mrf.mxu3  ;;  %v7808_v23 = vadd.f32 %v7601_v30, %v6004_v45  ;;  %vm1819_vm14 = vcmp.eq.f32.partialorder %v1818_v59, 8.507059e+37 }
 0x214   : > { %v7787_v26 = vpop.eup %5316  ;;  %vm1834_vm1 = vcmp.eq.f32.partialorder %v1833_v50, 8.507059e+37  ;;  %vm1864_vm4 = vcmp.eq.f32.partialorder %v1863_v43, 8.507059e+37  ;;  %v7813_v0 = vadd.f32 1.0, %v5315_v38  ;;  %v1822_v5 = vsel %vm1819_vm14, %v7708_v47, %v1817_v7 }
 0x215   : > { %v1870_v25 = vmul.f32 %v7787_v26, %v7714_v51  ;;  %5322 = vrcp.f32 %v7773_v37  ;;  %v7811_v29 = vpop.eup %5318  ;;  %v1837_v1 = vsel %vm1834_vm1, %v1836_v58, %v1832_v49  ;;  %v1867_v6 = vsel %vm1864_vm4, %v1866_v20, %v1862_v13 }
 0x216   : > { %v2043_v17 = vmul.f32 %v1852_v4, %v7362_v12  ;;  %v1885_v30 = vmul.f32 %v7811_v29, %v7732_v35  ;;  %v4625_v59 = vmul.f32 -1.442695, %v7800_v39  ;;  %v2957_v63 = vsub.f32 1.0, %v7684_v48 }
 0x217   : > { %v1871_v8 = vsub.f32 1.0, %v1870_v25  ;;  %v7822_v50 = vpop.eup %5320  ;;  %v2987_v38 = vsub.f32 1.0, %v7694_v57  ;;  %v4626_v47 = vmul.f32 -1.442695, %v7808_v23  ;;  %v7829_v60 = vadd.f32 %v7696_v54, %v6002_v41  ;;  %v7844_v54 = vpop.f32.mrf.mxu1  ;;  %v10405_v57 = vld [vmem:[#allocation16_spill] sm:$0xff] }
 0x218   : > { %v2041_v12 = vmul.f32 %v1822_v5, %v7352_v62  ;;  %5324 = vpow2.f32 %v7702_v3  ;;  %v2044_v36 = vmul.f32 %v1867_v6, %v7376_v28  ;;  %v1900_v43 = vmul.f32 %v7822_v50, %v7747_v10  ;;  %v7842_v41 = vpop.f32.mrf.mxu0 }
 0x219   : > { %5326 = vrcp.f32 %v7813_v0  ;;  %v2042_v58 = vmul.f32 %v1837_v1, %v7370_v34  ;;  %v7840_v16 = vadd.f32 %v7659_v40, %v7139_v55  ;;  %v1886_v27 = vsub.f32 1.0, %v1885_v30 }
 0x21a   : > { %v1872_v28 = vmul.f32 %v7787_v26, %v1871_v8  ;;  %v1901_v3 = vsub.f32 1.0, %v1900_v43  ;;  %5328 = vpow2.f32 %v4625_v59  ;;  %v7849_v7 = vpack.c.bf16 %v2043_v17, %v2041_v12  ;;  %v10384_v12 = vld [vmem:[#allocation18_spill] sm:$0xff] }
 0x21b   : > { %v7846_v62 = vpop.eup %5322  ;;  %5330 = vpow2.f32 %v4626_v47  ;;  %v7855_v40 = vmul.f32 -1.442695, %v7829_v60  ;;  %v7859_v49 = vadd.f32 %v7698_v32, %v6004_v45  ;;  %v1880_v13 = vand.u32 2147483648, %v7714_v51  ;;  %v7870_v1 = vpop.f32.mrf.mxu3 }
 0x21c   : > { %v1915_v34 = vmul.f32 %v7846_v62, %v7773_v37  ;;  %v1902_v4 = vmul.f32 %v7822_v50, %v1901_v3  ;;  %vm1905_vm5 = vweird.f32 %v7822_v50  ;;  %v1887_v20 = vmul.f32 %v7811_v29, %v1886_v27  ;;  %v7890_v47 = vpop.f32.mrf.mxu2 }
 0x21d   : > { %vm1904_vm6 = vweird.f32 %v7747_v10  ;;  %v1910_v25 = vand.u32 2147483648, %v7747_v10  ;;  %vm2931_vm7 = vweird.f32 %v7326_v56  ;;  %v1873_v32 = vadd.f32 %v7787_v26, %v1872_v28 }
 0x21e   : > { %v1916_v5 = vsub.f32 1.0, %v1915_v34  ;;  %v5325_v45 = vpop.eup %5324  ;;  %vm1875_vm8 = vweird.f32 %v7787_v26  ;;  %v1908_v6 = vand.u32 2147483647, %v7747_v10  ;;  %vm1874_vm9 = vweird.f32 %v7714_v51  ;;  %vm7884_vm11 = vmor %vm1904_vm6, %vm1905_vm5 }
 0x21f   : > { %2356 = vmatmul.bf16.gmra.mxu2 %v7849_v7  ;;  %v7878_v17 = vpop.eup %5326  ;;  %v1878_v8 = vand.u32 2147483647, %v7714_v51  ;;  %vm1920_vm13 = vweird.f32 %v7846_v62  ;;  %v10388_v51 = vld [vmem:[#allocation19_spill] sm:$0xff]  ;;  %vm1919_vm12 = vweird.f32 %v7773_v37  ;;  %v1923_v27 = vand.u32 2147483647, %v7773_v37  ;;  %vm7907_vm2 = vmor %vm1874_vm9, %vm1875_vm8 }
 0x220   : > { %v1917_v59 = vmul.f32 %v7846_v62, %v1916_v5  ;;  %v5329_v10 = vpop.eup %5328  ;;  %vm2930_vm0 = vweird.f32 %v10388_v51  ;;  %v1925_v28 = vand.u32 2147483648, %v7773_v37  ;;  %vm1890_vm3 = vweird.f32 %v7811_v29  ;;  %vm7921_vm1 = vmor %vm1919_vm12, %vm1920_vm13 }
 0x221   : > { %v5331_v3 = vpop.eup %5330  ;;  %v1911_v5 = vor.u32 1.1754944e-38, %v1910_v25  ;;  %v1877_v37 = vsel %vm7907_vm2, %v7787_v26, %v1873_v32  ;;  %v1895_v30 = vand.u32 2147483648, %v7732_v35  ;;  %vm1909_vm14 = vcmp.eq.f32.partialorder %v1908_v6, 8.507059e+37  ;;  %v7927_v25 = vpop.f32.mrf.mxu1 }
 0x222   : > { %2529 = vmatmul.bf16.gmra.mxu0 %v7716_v22  ;;  %v7865_v22 = vpack.c.bf16 %v2044_v36, %v2042_v58  ;;  %v10385_v36 = vand.u32 2147483647, %v10384_v12  ;;  %vm1889_vm4 = vweird.f32 %v7732_v35  ;;  %vm1879_vm5 = vcmp.eq.f32.partialorder %v1878_v8, 8.507059e+37 }
 0x223   : > { %2618 = vmatmul.bf16.gmra.mxu1 %v7734_v44  ;;  %v1903_v44 = vadd.f32 %v7822_v50, %v1902_v4  ;;  %v1888_v4 = vadd.f32 %v7811_v29, %v1887_v20  ;;  %v7925_v20 = vpop.f32.mrf.mxu0  ;;  %vm7940_vm6 = vmor %vm1889_vm4, %vm1890_vm3  ;;  %v1926_v6 = vor.u32 1.1754944e-38, %v1925_v28  ;;  %v7944_v34 = vadd.f32 1.0, %v5329_v10 }
 0x224   : > { %vm7894_vm15 = vcmp.eq.f32.partialorder %v10385_v36, 8.507059e+37  ;;  %2445 = vmatmul.bf16.gmra.mxu3 %v7865_v22  ;;  %vm1924_vm8 = vcmp.eq.f32.partialorder %v1923_v27, 8.507059e+37  ;;  %5332 = vpow2.f32 %v7855_v40  ;;  %v4628_v10 = vmul.f32 -1.442695, %v7859_v49 }
 0x225   : > { %v1907_v58 = vsel %vm7884_vm11, %v7822_v50, %v1903_v44  ;;  %v1918_v50 = vadd.f32 %v7846_v62, %v1917_v59  ;;  %v1881_v44 = vor.u32 1.1754944e-38, %v1880_v13  ;;  %v1893_v59 = vand.u32 2147483647, %v7732_v35  ;;  %vm7978_vm11 = vmor %vm2930_vm0, %vm2931_vm7 }
 0x226   : > { %v1912_v36 = vsel %vm1909_vm14, %v1911_v5, %v1907_v58  ;;  %v7936_v13 = vadd.f32 %v7710_v2, %v7840_v16  ;;  %v1892_v58 = vsel %vm7940_vm6, %v7811_v29, %v1888_v4  ;;  %v7951_v2 = vadd.f32 1.0, %v5325_v45  ;;  %v5578_v29 = vld [vmem:[%s10215_s4] sm:$0x3]  ;;  %v10397_v4 = vld [vmem:[#allocation20_spill] sm:$0xff] }
 0x227   : > { %v1922_v26 = vsel %vm7921_vm1, %v7846_v62, %v1918_v50  ;;  %v1882_v35 = vsel %vm1879_vm5, %v1881_v44, %v1877_v37  ;;  %v7949_v62 = vadd.f32 1.0, %v5331_v3  ;;  %v1896_v16 = vor.u32 1.1754944e-38, %v1895_v30  ;;  %v7954_v50 = vpop.f32.mrf.mxu3  ;;  %v10398_v37 = vld [vmem:[#allocation23_spill] sm:$0xff]  ;;  %v10400_v44 = vld [vmem:[#allocation24_spill] sm:$0xff] }
 0x228   : > { %10393 = vst [vmem:[#allocation18_spill] sm:$0xff] %v7936_v13  ;;  %v2047_v8 = vmul.f32 %v1912_v36, %v7638_v53  ;;  %v1927_v5 = vsel %vm1924_vm8, %v1926_v6, %v1922_v26  ;;  %vm1894_vm9 = vcmp.eq.f32.partialorder %v1893_v59, 8.507059e+37  ;;  %v7961_v27 = vperm.slane %v5578_v29, 1  ;;  %v7985_v36 = vpop.f32.mrf.mxu2  ;;  %v10403_v26 = vld [vmem:[#allocation26_spill] sm:$0xff] }
 0x229   : > { %v4769_v45 = vmul.f32 -1.442695, %v7936_v13  ;;  %v2045_v28 = vmul.f32 %v1882_v35, %v7620_v18  ;;  %v1897_v3 = vsel %vm1894_vm9, %v1896_v16, %v1892_v58  ;;  %5334 = vrcp.f32 %v7944_v34 }
 0x22a   : > { %v10399_v40 = vsel %vm7443_vm10, %v10397_v4, %v10398_v37  ;;  %v2934_v18 = vand.u32 2147483647, %v10388_v51  ;;  %v2048_v59 = vmul.f32 %v1927_v5, %v7663_v42  ;;  %5336 = vrcp.f32 %v7949_v62 }
 0x22b   : > { %v2908_v30 = vsel %vm7894_vm15, %v10400_v44, %v10399_v40  ;;  %v2933_v43 = vsel %vm7978_vm11, %v7326_v56, %v10403_v26  ;;  %5338 = vrcp.f32 %v7951_v2  ;;  %v2471_v32 = vadd.f32 %v7783_v31, %v7961_v27  ;;  %v8010_v48 = vpop.f32.mrf.mxu0 }
 0x22c   : > { %v7994_v6 = vpack.c.bf16 %v2047_v8, %v2045_v28  ;;  %v2958_v42 = vmul.f32 %v7507_v61, %v2957_v63  ;;  %v2988_v35 = vmul.f32 %v7533_v24, %v2987_v38  ;;  %v2046_v58 = vmul.f32 %v1897_v3, %v7624_v11  ;;  %v8012_v63 = vpop.f32.mrf.mxu1  ;;  %v5333_v11 = vpop.eup %5332 }
 0x22d   : > { %5340 = vpow2.f32 %v4628_v10  ;;  %v10404_v56 = vand.u32 2147483648, %v10388_v51  ;;  %v2310_v31 = vadd.f32 %v7723_v15, %v7139_v55  ;;  %v8008_v8 = vadd.f32 %v7785_v21, %v2471_v32 }
 0x22e   : > { %5342 = vpow2.f32 %v4769_v45  ;;  %v8017_v38 = vmul.f32 %v2908_v30, %v10405_v57  ;;  %vm2935_vm10 = vcmp.eq.f32.partialorder %v2934_v18, 8.507059e+37  ;;  %v2964_v51 = vand.u32 2147483647, %v7434_v14 }
 0x22f   : > { %v2937_v16 = vor.u32 1.1754944e-38, %v10404_v56  ;;  %v8020_v5 = vpack.c.bf16 %v2048_v59, %v2046_v58  ;;  %v8022_v15 = vpop.eup %5334  ;;  %vm2961_vm7 = vweird.f32 %v7507_v61  ;;  %v2966_v10 = vand.u32 2147483648, %v7434_v14  ;;  %2361 = vmatmul.bf16.gmra.mxu2 %v7994_v6  ;;  %v8057_v30 = vpop.f32.mrf.mxu3 }
 0x230   : > { %v8026_v29 = vadd.f32 1.0, %v5333_v11  ;;  %v2989_v45 = vadd.f32 %v7533_v24, %v2988_v35  ;;  %vm2991_vm13 = vweird.f32 %v7533_v24  ;;  %v2994_v28 = vand.u32 2147483647, %v7477_v19  ;;  %v8086_v58 = vpop.f32.mrf.mxu2 }
 0x231   : > { %v2938_v21 = vsel %vm2935_vm10, %v2937_v16, %v2933_v43  ;;  %vm2960_vm15 = vweird.f32 %v7434_v14  ;;  %v8039_v53 = vadd.f32 %v7804_v9, %v2310_v31  ;;  %v4758_v4 = vmul.f32 -1.442695, %v8008_v8 }
 0x232   : > { %2534 = vmatmul.bf16.gmra.mxu0 %v7849_v7  ;;  %v8029_v7 = vpop.eup %5336  ;;  %5344 = vrcp.f32 %v8026_v29  ;;  %vm8045_vm0 = vmor %vm2960_vm15, %vm2961_vm7  ;;  %vm8049_vm12 = vcmp.eq.f32.partialorder %v2964_v51, 8.507059e+37  ;;  %vm2990_vm2 = vweird.f32 %v7477_v19  ;;  %v2996_v14 = vand.u32 2147483648, %v7477_v19 }
 0x233   : > { %2623 = vmatmul.bf16.gmra.mxu1 %v7865_v22  ;;  %v2959_v22 = vadd.f32 %v7507_v61, %v2958_v42  ;;  %v8035_v3 = vpop.eup %5338  ;;  %10406 = vst [vmem:[#allocation19_spill] sm:$0xff] %v8039_v53  ;;  %v2313_v9 = vadd.f32 %v7816_v46, %v7139_v55  ;;  %v2967_v18 = vor.u32 1.1754944e-38, %v2966_v10  ;;  %vm8062_vm3 = vmor %vm2990_vm2, %vm2991_vm13  ;;  %v1930_v26 = vmul.f32 %v8022_v15, %v7944_v34 }
 0x234   : > { %v5341_v37 = vpop.eup %5340  ;;  %2450 = vmatmul.bf16.gmra.mxu3 %v8020_v5  ;;  %v1945_v19 = vmul.f32 %v8029_v7, %v7949_v62  ;;  %v2473_v46 = vadd.f32 %v7842_v41, %v7961_v27  ;;  %v2993_v32 = vsel %vm8062_vm3, %v7533_v24, %v2989_v45  ;;  %vm8078_vm14 = vcmp.eq.f32.partialorder %v2994_v28, 8.507059e+37  ;;  %v8108_v45 = vpop.f32.mrf.mxu0 }
 0x235   : > { %v5343_v12 = vpop.eup %5342  ;;  %v2963_v43 = vsel %vm8045_vm0, %v7507_v61, %v2959_v22  ;;  %v8084_v35 = vmul.f32 %v7878_v17, %v7813_v0  ;;  %v8090_v41 = vmul.f32 %v8035_v3, %v7951_v2  ;;  %v4771_v61 = vmul.f32 -1.442695, %v8039_v53  ;;  %v8110_v28 = vpop.f32.mrf.mxu1 }
 0x236   : > { %v8093_v56 = vadd.f32 1.0, %v5341_v37  ;;  %5346 = vpow2.f32 %v4758_v4  ;;  %v2997_v24 = vor.u32 1.1754944e-38, %v2996_v14  ;;  %v8095_v16 = vadd.f32 1.0, %v5343_v12  ;;  %v10416_v4 = vld [vmem:[#allocation17_spill] sm:$0xff] }
 0x237   : > { %v8098_v31 = vadd.f32 %v7870_v1, %v2313_v9  ;;  %v2315_v11 = vadd.f32 %v7890_v47, %v7139_v55  ;;  %v1931_v51 = vsub.f32 1.0, %v1930_v26  ;;  %v1946_v10 = vsub.f32 1.0, %v1945_v19 }
 0x238   : > { %v8102_v57 = vpop.eup %5344  ;;  %5348 = vrcp.f32 %v8093_v56  ;;  %v8106_v22 = vadd.f32 %v7844_v54, %v2473_v46  ;;  %v8113_v37 = vmul.f32 %v2938_v21, %v10416_v4  ;;  %v8117_v1 = vsel %vm8049_vm12, %v2967_v18, %v2963_v43  ;;  %v4955_v54 = vld [vmem:[#allocation10] sm:$0xff]  ;;  %v8153_v4 = vpop.f32.mrf.mxu2 }
 0x239   : > { %10415 = vst [vmem:[#allocation25_spill] sm:$0xff] %v8098_v31  ;;  %v8121_v47 = vsel %vm8078_vm14, %v2997_v24, %v2993_v32  ;;  %v1960_v40 = vmul.f32 %v8102_v57, %v8026_v29  ;;  %5350 = vpow2.f32 %v4771_v61  ;;  %v4963_v21 = vld [vmem:[#allocation10 + $0x40] sm:$0xff]  ;;  %v8130_v44 = vmul.f32 -1.442695, %v8098_v31  ;;  %4090 = vmatpush.bf16.msrb.mxu2 %v4955_v54  ;;  %v8144_v24 = vpop.f32.mrf.mxu3 }
 0x23a   : > { %5352 = vrcp.f32 %v8095_v16  ;;  %v8133_v18 = vadd.f32 %v7954_v50, %v2315_v11  ;;  %v1932_v19 = vmul.f32 %v8022_v15, %v1931_v51  ;;  %vm1934_vm1 = vweird.f32 %v7944_v34  ;;  %4179 = vmatpush.bf16.msrb.mxu3 %v4963_v21 }
 0x23b   : > { %v1961_v59 = vsub.f32 1.0, %v1960_v40  ;;  %v1947_v46 = vmul.f32 %v8029_v7, %v1946_v10  ;;  %v4760_v43 = vmul.f32 -1.442695, %v8106_v22  ;;  %v1938_v32 = vand.u32 2147483647, %v7944_v34 }
 0x23c   : > { %v5347_v26 = vpop.eup %5346  ;;  %v1940_v42 = vand.u32 2147483648, %v7944_v34  ;;  %vm1935_vm4 = vweird.f32 %v8022_v15  ;;  %vm1949_vm5 = vweird.f32 %v7949_v62  ;;  %vm1950_vm6 = vweird.f32 %v8029_v7 }
 0x23d   : > { %v1962_v61 = vmul.f32 %v8102_v57, %v1961_v59  ;;  %v8142_v50 = vadd.f32 1.0, %v5347_v26  ;;  %5354 = vpow2.f32 %v4760_v43  ;;  %vm1965_vm8 = vweird.f32 %v8102_v57  ;;  %v8159_v43 = vpop.f32.mrf.mxu0  ;;  %vm8171_vm9 = vmor %vm1934_vm1, %vm1935_vm4 }
 0x23e   : > { %v5349_v11 = vpop.eup %5348  ;;  %v1933_v54 = vadd.f32 %v8022_v15, %v1932_v19  ;;  %v1948_v21 = vadd.f32 %v8029_v7, %v1947_v46  ;;  %v1968_v59 = vand.u32 2147483647, %v8026_v29  ;;  %v1970_v26 = vand.u32 2147483648, %v8026_v29  ;;  %vm8195_vm13 = vmor %vm1949_vm5, %vm1950_vm6 }
 0x23f   : > { %v1963_v51 = vadd.f32 %v8102_v57, %v1962_v61  ;;  %v1975_v10 = vmul.f32 %v5349_v11, %v8093_v56  ;;  %5356 = vrcp.f32 %v8142_v50  ;;  %v5351_v40 = vpop.eup %5350  ;;  %v8161_v61 = vpop.f32.mrf.mxu1  ;;  %v1953_v46 = vand.u32 2147483647, %v7949_v62 }
 0x240   : > { %10417 = vst [vmem:[#allocation20_spill] sm:$0xff] %v8161_v61  ;;  %v8165_v9 = vpop.eup %5352  ;;  %vm1964_vm11 = vweird.f32 %v8026_v29  ;;  %vm8179_vm10 = vcmp.eq.f32.partialorder %v1938_v32, 8.507059e+37  ;;  %v1941_v14 = vor.u32 1.1754944e-38, %v1940_v42  ;;  %v1955_v31 = vand.u32 2147483648, %v7949_v62 }
 0x241   : > { %v1976_v12 = vsub.f32 1.0, %v1975_v10  ;;  %vm8186_vm7 = vmor %vm1964_vm11, %vm1965_vm8  ;;  %v1985_v53 = vand.u32 2147483648, %v8093_v56  ;;  %vm1980_vm15 = vweird.f32 %v5349_v11  ;;  %v1983_v42 = vand.u32 2147483647, %v8093_v56 }
 0x242   : > { %2539 = vmatmul.bf16.gmra.mxu0 %v7994_v6  ;;  %v2476_v6 = vadd.f32 %v7925_v20, %v7961_v27  ;;  %v1967_v29 = vsel %vm8186_vm7, %v8102_v57, %v1963_v51  ;;  %v1937_v13 = vsel %vm8171_vm9, %v8022_v15, %v1933_v54  ;;  %v1952_v62 = vsel %vm8195_vm13, %v8029_v7, %v1948_v21  ;;  %v8220_v21 = vpop.f32.mrf.mxu3 }
 0x243   : > { %2628 = vmatmul.bf16.gmra.mxu1 %v8020_v5  ;;  %v1977_v32 = vmul.f32 %v5349_v11, %v1976_v12  ;;  %v5355_v10 = vpop.eup %5354  ;;  %vm1969_vm0 = vcmp.eq.f32.partialorder %v1968_v59, 8.507059e+37  ;;  %v1971_v61 = vor.u32 1.1754944e-38, %v1970_v26  ;;  %vm1979_vm12 = vweird.f32 %v8093_v56 }
 0x244   : > { %v8212_v57 = vadd.f32 1.0, %v5355_v10  ;;  %v8215_v12 = vadd.f32 %v7927_v25, %v2476_v6  ;;  %v1956_v51 = vor.u32 1.1754944e-38, %v1955_v31  ;;  %vm1981_vm2 = vmor %vm1979_vm12, %vm1980_vm15  ;;  %v1986_v15 = vor.u32 1.1754944e-38, %v1985_v53 }
 0x245   : > { %v8209_v33 = vpop.eup %5356  ;;  %v1978_v52 = vadd.f32 %v5349_v11, %v1977_v32  ;;  %v1972_v34 = vsel %vm1969_vm0, %v1971_v61, %v1967_v29  ;;  %vm1954_vm3 = vcmp.eq.f32.partialorder %v1953_v46, 8.507059e+37  ;;  %vm1984_vm14 = vcmp.eq.f32.partialorder %v1983_v42, 8.507059e+37  ;;  %v8247_v5 = vpop.f32.mrf.mxu0 }
 0x246   : > { %v2911_v54 = vmul.f32 %v8209_v33, %v8142_v50  ;;  %5358 = vrcp.f32 %v8212_v57  ;;  %v1942_v56 = vsel %vm8179_vm10, %v1941_v14, %v1937_v13  ;;  %v1957_v59 = vsel %vm1954_vm3, %v1956_v51, %v1952_v62  ;;  %v8237_v14 = vpop.f32.mrf.mxu2 }
 0x247   : > { %v1982_v7 = vsel %vm1981_vm2, %v5349_v11, %v1978_v52  ;;  %v10426_v31 = vsub.f32 1.0, %v8084_v35  ;;  %v2051_v61 = vmul.f32 %v1972_v34, %v7829_v60  ;;  %v4762_v52 = vmul.f32 -1.442695, %v8215_v12  ;;  %v8249_v20 = vpop.f32.mrf.mxu1 }
 0x248   : > { %v1987_v25 = vsel %vm1984_vm14, %v1986_v15, %v1982_v7  ;;  %v2912_v26 = vsub.f32 1.0, %v2911_v54  ;;  %v10427_v11 = vsub.f32 1.0, %v8090_v41  ;;  %v8233_v6 = vadd.f32 1.0, %v5351_v40 }
 0x249   : > { %v3018_v53 = vmul.f32 %v7878_v17, %v10426_v31  ;;  %v2052_v19 = vmul.f32 %v1987_v25, %v7859_v49  ;;  %5360 = vpow2.f32 %v8130_v44  ;;  %v4775_v13 = vmul.f32 -1.442695, %v8133_v18 }
 0x24a   : > { %v3048_v46 = vmul.f32 %v8035_v3, %v10427_v11  ;;  %v2049_v35 = vmul.f32 %v1942_v56, %v7800_v39  ;;  %v2050_v60 = vmul.f32 %v1957_v59, %v7808_v23  ;;  %v2913_v49 = vmul.f32 %v8209_v33, %v2912_v26  ;;  %v8281_v26 = vpop.f32.mrf.mxu3 }
 0x24b   : > { %5362 = vpow2.f32 %v4762_v52  ;;  %vm3021_vm1 = vweird.f32 %v7878_v17  ;;  %v3026_v41 = vand.u32 2147483648, %v7813_v0  ;;  %v3056_v40 = vand.u32 2147483648, %v7951_v2 }
 0x24c   : > { %v2318_v44 = vadd.f32 %v7985_v36, %v7139_v55  ;;  %v8251_v29 = vpop.eup %5358  ;;  %vm3051_vm4 = vweird.f32 %v8035_v3  ;;  %v2478_v39 = vadd.f32 %v8010_v48, %v7961_v27  ;;  %v2083_v23 = vpack.c.bf16 %v2051_v61, %v2049_v35 }
 0x24d   : > { %v2084_v32 = vpack.c.bf16 %v2052_v19, %v2050_v60  ;;  %v8257_v42 = vadd.f32 %v7878_v17, %v3018_v53  ;;  %vm3020_vm5 = vweird.f32 %v7813_v0  ;;  %v8261_v36 = vadd.f32 %v8035_v3, %v3048_v46 }
 0x24e   : > { %5364 = vrcp.f32 %v8233_v6  ;;  %v2941_v10 = vmul.f32 %v8251_v29, %v8212_v57  ;;  %vm3050_vm6 = vweird.f32 %v7951_v2  ;;  %v8269_v48 = vmul.f32 %v8165_v9, %v8095_v16  ;;  %2366 = vmatmul.bf16.gmra.mxu2 %v2083_v23  ;;  %vm8340_vm2 = vmor %vm3020_vm5, %vm3021_vm1 }
 0x24f   : > { %5366 = vpow2.f32 %v4775_v13  ;;  %v2914_v62 = vadd.f32 %v8209_v33, %v2913_v49  ;;  %vm2916_vm8 = vweird.f32 %v8209_v33  ;;  %2455 = vmatmul.bf16.gmra.mxu3 %v2084_v32  ;;  %v5361_v51 = vpop.eup %5360  ;;  %v8274_v34 = vadd.f32 %v8057_v30, %v2318_v44  ;;  %vm8356_vm3 = vmor %vm3050_vm6, %vm3051_vm4 }
 0x250   : > { %vm2915_vm9 = vweird.f32 %v8142_v50  ;;  %v2921_v15 = vand.u32 2147483648, %v8142_v50  ;;  %v2942_v54 = vsub.f32 1.0, %v2941_v10  ;;  %v2919_v56 = vand.u32 2147483647, %v8142_v50 }
 0x251   : > { %v5363_v7 = vpop.eup %5362  ;;  %v2949_v59 = vand.u32 2147483647, %v8212_v57  ;;  %v2951_v25 = vand.u32 2147483648, %v8212_v57  ;;  %v8284_v31 = vadd.f32 %v8012_v63, %v2478_v39  ;;  %v10428_v30 = vand.u32 2147483647, %v7813_v0  ;;  %vm8294_vm10 = vmor %vm2915_vm9, %vm2916_vm8 }
 0x252   : > { %v2943_v50 = vmul.f32 %v8251_v29, %v2942_v54  ;;  %vm2946_vm7 = vweird.f32 %v8251_v29  ;;  %v8300_v19 = vadd.f32 1.0, %v5363_v7  ;;  %v2481_v63 = vadd.f32 %v8108_v45, %v7961_v27  ;;  %v8317_v45 = vpop.f32.mrf.mxu2 }
 0x253   : > { %vm8288_vm11 = vcmp.eq.f32.partialorder %v10428_v30, 8.507059e+37  ;;  %v8304_v52 = vadd.f32 1.0, %v5361_v51  ;;  %v2918_v11 = vsel %vm8294_vm10, %v8209_v33, %v2914_v62  ;;  %v2320_v46 = vadd.f32 %v8086_v58, %v7139_v55  ;;  %v8332_v51 = vpop.f32.mrf.mxu0  ;;  %2544 = vmatmul.bf16.gmra.mxu0 %v2083_v23 }
 0x254   : > { %v4764_v13 = vmul.f32 -1.442695, %v8284_v31  ;;  %v8312_v35 = vpop.eup %5364  ;;  %v4777_v60 = vmul.f32 -1.442695, %v8274_v34  ;;  %v2922_v49 = vor.u32 1.1754944e-38, %v2921_v15  ;;  %v2944_v44 = vadd.f32 %v8251_v29, %v2943_v50  ;;  %v8334_v15 = vpop.f32.mrf.mxu1  ;;  %2633 = vmatmul.bf16.gmra.mxu1 %v2084_v32 }
 0x255   : > { %vm2945_vm13 = vweird.f32 %v8212_v57  ;;  %v5367_v39 = vpop.eup %5366  ;;  %vm2920_vm15 = vcmp.eq.f32.partialorder %v2919_v56, 8.507059e+37  ;;  %vm2950_vm12 = vcmp.eq.f32.partialorder %v2949_v59, 8.507059e+37  ;;  %v2952_v58 = vor.u32 1.1754944e-38, %v2951_v25 }
 0x256   : > { %vm8321_vm0 = vmor %vm2945_vm13, %vm2946_vm7  ;;  %5368 = vrcp.f32 %v8300_v19  ;;  %v2923_v10 = vsel %vm2920_vm15, %v2922_v49, %v2918_v11  ;;  %v8330_v57 = vadd.f32 %v8110_v28, %v2481_v63  ;;  %v3106_v28 = vmul.f32 %v8312_v35, %v8233_v6 }
 0x257   : > { %v2948_v62 = vsel %vm8321_vm0, %v8251_v29, %v2944_v44  ;;  %5370 = vpow2.f32 %v4764_v13  ;;  %v3054_v29 = vand.u32 2147483647, %v7951_v2  ;;  %v3023_v23 = vsel %vm8340_vm2, %v7878_v17, %v8257_v42  ;;  %v10440_v13 = vld [vmem:[#allocation21_spill] sm:$0xff]  ;;  %v10441_v44 = vld [vmem:[#allocation27_spill] sm:$0xff] }
 0x258   : > { %5372 = vrcp.f32 %v8304_v52  ;;  %v2953_v7 = vsel %vm2950_vm12, %v2952_v58, %v2948_v62  ;;  %v8361_v56 = vadd.f32 %v8144_v24, %v2320_v46  ;;  %v4766_v25 = vmul.f32 -1.442695, %v8330_v57 }
 0x259   : > { %v3858_v59 = vmul.f32 %v2953_v7, %v8106_v22  ;;  %v3027_v30 = vor.u32 1.1754944e-38, %v3026_v41  ;;  %v3053_v17 = vsel %vm8356_vm3, %v8035_v3, %v8261_v36  ;;  %5374 = vpow2.f32 %v4777_v60  ;;  %v8381_v3 = vpop.f32.mrf.mxu3 }
 0x25a   : > { %v3856_v42 = vmul.f32 %v2923_v10, %v8008_v8  ;;  %v3057_v61 = vor.u32 1.1754944e-38, %v3056_v40  ;;  %v3077_v24 = vsub.f32 1.0, %v8269_v48  ;;  %v8375_v50 = vadd.f32 1.0, %v5367_v39  ;;  %v10439_v8 = vld [vmem:[#allocation22_spill] sm:$0xff]  ;;  %v10443_v10 = vld [vmem:[#allocation20_spill] sm:$0xff] }
 0x25b   : > { %5376 = vpow2.f32 %v4766_v25  ;;  %v3028_v0 = vsel %vm8288_vm11, %v3027_v30, %v3023_v23  ;;  %vm3055_vm14 = vcmp.eq.f32.partialorder %v3054_v29, 8.507059e+37  ;;  %v3107_v41 = vsub.f32 1.0, %v3106_v28 }
 0x25c   : > { %v8377_v22 = vpop.eup %5368  ;;  %v3920_v63 = vpack.c.bf16 %v3858_v59, %v3856_v42  ;;  %v8385_v2 = vmul.f32 %v8121_v47, %v10439_v8  ;;  %v3058_v40 = vsel %vm3055_vm14, %v3057_v61, %v3053_v17  ;;  %v4779_v48 = vmul.f32 -1.442695, %v8361_v56 }
 0x25d   : > { %v5371_v36 = vpop.eup %5370  ;;  %v2483_v11 = vadd.f32 %v8159_v43, %v7961_v27  ;;  %v3919_v53 = vpack.c.bf16 %v8113_v37, %v8017_v38  ;;  %v8396_v60 = vmul.f32 %v8117_v1, %v10440_v13  ;;  %v2323_v49 = vadd.f32 %v8153_v4, %v7139_v55  ;;  %v8409_v38 = vpop.f32.mrf.mxu2  ;;  %v10442_v1 = vld [vmem:[#allocation28_spill] sm:$0xff] }
 0x25e   : > { %v8390_v46 = vpop.eup %5372  ;;  %v8400_v47 = vadd.f32 1.0, %v5371_v36  ;;  %v8403_v39 = vmul.f32 %v3028_v0, %v10441_v44  ;;  %v3078_v33 = vmul.f32 %v8165_v9, %v3077_v24  ;;  %5378 = vrcp.f32 %v8375_v50 }
 0x25f   : > { %v2971_v43 = vmul.f32 %v8377_v22, %v8300_v19  ;;  %v5375_v37 = vpop.eup %5374  ;;  %v8412_v58 = vmul.f32 %v3058_v40, %v10442_v1  ;;  %v3108_v4 = vmul.f32 %v8312_v35, %v3107_v41  ;;  %v8417_v62 = vadd.f32 %v10443_v10, %v2483_v11  ;;  %4091 = vmatmul.bf16.vlgmr.msrb.gmra.mxu2 %v3919_v53 }
 0x260   : > { %5380 = vrcp.f32 %v8400_v47  ;;  %4180 = vmatmul.bf16.vlgmr.msrb.gmra.mxu3 %v3920_v63  ;;  %v3086_v29 = vand.u32 2147483648, %v8095_v16  ;;  %v3136_v28 = vmul.f32 %v8390_v46, %v8304_v52  ;;  %vm3080_vm1 = vweird.f32 %v8095_v16 }
 0x261   : > { %v5377_v54 = vpop.eup %5376  ;;  %5382 = vpow2.f32 %v4779_v48  ;;  %v3116_v23 = vand.u32 2147483648, %v8233_v6  ;;  %v8427_v32 = vadd.f32 %v8220_v21, %v2323_v49  ;;  %v8432_v25 = vadd.f32 %v8165_v9, %v3078_v33  ;;  %v8461_v11 = vpop.f32.mrf.mxu3 }
 0x262   : > { %v8429_v59 = vadd.f32 1.0, %v5377_v54  ;;  %vm3081_vm4 = vweird.f32 %v8165_v9  ;;  %v8435_v30 = vadd.f32 1.0, %v5375_v37  ;;  %v2972_v17 = vsub.f32 1.0, %v2971_v43 }
 0x263   : > { %v8438_v42 = vadd.f32 %v8312_v35, %v3108_v4  ;;  %vm3111_vm5 = vweird.f32 %v8312_v35  ;;  %v2325_v61 = vadd.f32 %v8237_v14, %v7139_v55  ;;  %v4768_v21 = vmul.f32 -1.442695, %v8417_v62  ;;  %vm8452_vm6 = vmor %vm3080_vm1, %vm3081_vm4 }
 0x264   : > { %v8444_v24 = vpop.eup %5378  ;;  %v3084_v0 = vand.u32 2147483647, %v8095_v16  ;;  %v8447_v41 = vor.u32 1.1754944e-38, %v3086_v29  ;;  %v3137_v63 = vsub.f32 1.0, %v3136_v28  ;;  %5384 = vrcp.f32 %v8429_v59 }
 0x265   : > { %vm3110_vm8 = vweird.f32 %v8233_v6  ;;  %v3114_v14 = vand.u32 2147483647, %v8233_v6  ;;  %v8458_v40 = vor.u32 1.1754944e-38, %v3116_v23  ;;  %v4781_v48 = vmul.f32 -1.442695, %v8427_v32  ;;  %v8489_v10 = vpop.f32.mrf.mxu2 }
 0x266   : > { %v5381_v36 = vpop.eup %5380  ;;  %vm8469_vm9 = vmor %vm3110_vm8, %vm3111_vm5  ;;  %5386 = vrcp.f32 %v8435_v30  ;;  %v2973_v6 = vmul.f32 %v8377_v22, %v2972_v17  ;;  %v8481_v33 = vadd.f32 %v8281_v26, %v2325_v61  ;;  %v2486_v43 = vadd.f32 %v8247_v5, %v7961_v27 }
 0x267   : > { %v5383_v53 = vpop.eup %5382  ;;  %v3001_v49 = vmul.f32 %v5381_v36, %v8400_v47  ;;  %5388 = vpow2.f32 %v4768_v21  ;;  %v3138_v37 = vmul.f32 %v8390_v46, %v3137_v63  ;;  %vm3141_vm11 = vweird.f32 %v8390_v46 }
 0x268   : > { %10448 = vst [vmem:[#allocation23_spill] sm:$0xff] %v8481_v33  ;;  %v3166_v1 = vmul.f32 %v8444_v24, %v8375_v50  ;;  %vm8491_vm10 = vcmp.eq.f32.partialorder %v3084_v0, 8.507059e+37  ;;  %vm3140_vm7 = vweird.f32 %v8304_v52  ;;  %v8496_v26 = vadd.f32 1.0, %v5383_v53 }
 0x269   : > { %v3002_v4 = vsub.f32 1.0, %v3001_v49  ;;  %5390 = vpow2.f32 %v4781_v48  ;;  %vm2976_vm13 = vweird.f32 %v8377_v22  ;;  %v3011_v5 = vand.u32 2147483648, %v8400_v47  ;;  %vm8561_vm5 = vmor %vm3140_vm7, %vm3141_vm11 }
 0x26a   : > { %v8500_v29 = vpop.eup %5384  ;;  %vm8502_vm15 = vcmp.eq.f32.partialorder %v3114_v14, 8.507059e+37  ;;  %v2974_v23 = vadd.f32 %v8377_v22, %v2973_v6  ;;  %vm3006_vm0 = vweird.f32 %v5381_v36  ;;  %v3009_v61 = vand.u32 2147483647, %v8400_v47 }
 0x26b   : > { %v3003_v17 = vmul.f32 %v5381_v36, %v3002_v4  ;;  %vm2975_vm12 = vweird.f32 %v8300_v19  ;;  %v2981_v21 = vand.u32 2147483648, %v8300_v19  ;;  %v4783_v0 = vmul.f32 -1.442695, %v8481_v33 }
 0x26c   : > { %v8512_v63 = vadd.f32 %v8249_v20, %v2486_v43  ;;  %v8514_v48 = vpop.eup %5386  ;;  %vm8516_vm2 = vmor %vm2975_vm12, %vm2976_vm13  ;;  %v2979_v53 = vand.u32 2147483647, %v8300_v19  ;;  %vm3005_vm3 = vweird.f32 %v8400_v47  ;;  %v2328_v49 = vadd.f32 %v8317_v45, %v7139_v55 }
 0x26d   : > { %v3004_v6 = vadd.f32 %v5381_v36, %v3003_v17  ;;  %v5389_v4 = vpop.eup %5388  ;;  %v3139_v44 = vadd.f32 %v8390_v46, %v3138_v37  ;;  %v3167_v16 = vsub.f32 1.0, %v3166_v1  ;;  %vm3007_vm14 = vmor %vm3005_vm3, %vm3006_vm0  ;;  %v3012_v20 = vor.u32 1.1754944e-38, %v3011_v5  ;;  %v8534_v1 = vpop.f32.mrf.mxu3 }
 0x26e   : > { %v3031_v43 = vmul.f32 %v8500_v29, %v8429_v59  ;;  %v2978_v19 = vsel %vm8516_vm2, %v8377_v22, %v2974_v23  ;;  %vm3010_vm1 = vcmp.eq.f32.partialorder %v3009_v61, 8.507059e+37  ;;  %v8531_v47 = vadd.f32 1.0, %v5389_v4  ;;  %v8545_v23 = vpop.f32.mrf.mxu0  ;;  %v8601_v4 = vpop.f32.mrf.mxu1 }
 0x26f   : > { %v3008_v17 = vsel %vm3007_vm14, %v5381_v36, %v3004_v6  ;;  %v5391_v7 = vpop.eup %5390  ;;  %5392 = vrcp.f32 %v8496_v26  ;;  %v2982_v45 = vor.u32 1.1754944e-38, %v2981_v21  ;;  %v4770_v5 = vmul.f32 -1.442695, %v8512_v63 }
 0x270   : > { %v3013_v37 = vsel %vm3010_vm1, %v3012_v20, %v3008_v17  ;;  %v10455_v33 = vpack.c.bf16 %v8385_v2, %v8396_v60  ;;  %v3196_v22 = vmul.f32 %v8514_v48, %v8435_v30  ;;  %vm2980_vm4 = vcmp.eq.f32.partialorder %v2979_v53, 8.507059e+37 }
 0x271   : > { %5394 = vpow2.f32 %v4783_v0  ;;  %v8543_v36 = vadd.f32 %v8381_v3, %v2328_v49  ;;  %v3146_v61 = vand.u32 2147483648, %v8304_v52  ;;  %v2983_v21 = vsel %vm2980_vm4, %v2982_v45, %v2978_v19  ;;  %v10461_v49 = vld [vmem:[#allocation19_spill] sm:$0xff] }
 0x272   : > { %4096 = vmatmul.bf16.gmra.mxu2 %v10455_v33  ;;  %v3032_v14 = vsub.f32 1.0, %v3031_v43  ;;  %5396 = vrcp.f32 %v8531_v47  ;;  %v10456_v2 = vsel %vm8452_vm6, %v8165_v9, %v8432_v25  ;;  %v3144_v33 = vand.u32 2147483647, %v8304_v52  ;;  %v8569_v9 = vpop.f32.mrf.mxu2 }
 0x273   : > { %v3088_v60 = vsel %vm8491_vm10, %v8447_v41, %v10456_v2  ;;  %v3862_v0 = vmul.f32 %v3013_v37, %v8284_v31  ;;  %v2330_v8 = vadd.f32 %v8409_v38, %v7139_v55  ;;  %v10459_v25 = vsel %vm8469_vm9, %v8312_v35, %v8438_v42  ;;  %v10460_v42 = vld [vmem:[#allocation18_spill] sm:$0xff] }
 0x274   : > { %v3118_v41 = vsel %vm8502_vm15, %v8458_v40, %v10459_v25  ;;  %v3143_v52 = vsel %vm8561_vm5, %v8390_v46, %v3139_v44  ;;  %5398 = vpow2.f32 %v4770_v5  ;;  %v2488_v31 = vadd.f32 %v8332_v51, %v7961_v27 }
 0x275   : > { %v3168_v38 = vmul.f32 %v8444_v24, %v3167_v16  ;;  %v3197_v54 = vsub.f32 1.0, %v3196_v22  ;;  %v3860_v13 = vmul.f32 %v2983_v21, %v8215_v12  ;;  %v4785_v53 = vmul.f32 -1.442695, %v8543_v36  ;;  %v8587_v35 = vpop.eup %5392 }
 0x276   : > { %v8590_v28 = vmul.f32 %v3088_v60, %v10460_v42  ;;  %v3147_v40 = vor.u32 1.1754944e-38, %v3146_v61  ;;  %v8592_v6 = vadd.f32 1.0, %v5391_v7  ;;  %v3033_v46 = vmul.f32 %v8500_v29, %v3032_v14  ;;  %v8625_v61 = vpop.f32.mrf.mxu3  ;;  %v2492_v3 = vpop.f32.mrf.mxu0 }
 0x277   : > { %v5395_v44 = vpop.eup %5394  ;;  %v8596_v51 = vmul.f32 %v3118_v41, %v10461_v49  ;;  %vm3145_vm6 = vcmp.eq.f32.partialorder %v3144_v33, 8.507059e+37  ;;  %v8599_v16 = vadd.f32 %v8461_v11, %v2330_v8  ;;  %v3922_v12 = vpack.c.bf16 %v3862_v0, %v3860_v13 }
 0x278   : > { %v5397_v20 = vpop.eup %5396  ;;  %v8603_v43 = vsel %vm3145_vm6, %v3147_v40, %v3143_v52  ;;  %v3174_v19 = vand.u32 2147483647, %v8375_v50  ;;  %v3176_v7 = vand.u32 2147483648, %v8375_v50  ;;  %v8608_v17 = vadd.f32 %v8334_v15, %v2488_v31 }
 0x279   : > { %v8611_v45 = vadd.f32 %v8444_v24, %v3168_v38  ;;  %vm3171_vm8 = vweird.f32 %v8444_v24  ;;  %v8615_v11 = vmul.f32 %v8514_v48, %v3197_v54  ;;  %5400 = vpow2.f32 %v4785_v53  ;;  %4185 = vmatmul.bf16.gmra.mxu3 %v3922_v12 }
 0x27a   : > { %v3061_v37 = vmul.f32 %v5397_v20, %v8531_v47  ;;  %v5399_v5 = vpop.eup %5398  ;;  %v8620_v22 = vmul.f32 %v8587_v35, %v8496_v26  ;;  %5402 = vrcp.f32 %v8592_v6  ;;  %v3034_v15 = vadd.f32 %v8500_v29, %v3033_v46  ;;  %v8643_v38 = vpop.f32.mrf.mxu2 }
 0x27b   : > { %vm3036_vm9 = vweird.f32 %v8500_v29  ;;  %vm3170_vm11 = vweird.f32 %v8375_v50  ;;  %v8628_v21 = vadd.f32 1.0, %v5395_v44  ;;  %v3041_v14 = vand.u32 2147483648, %v8429_v59 }
 0x27c   : > { %v4787_v2 = vmul.f32 -1.442695, %v8599_v16  ;;  %v3062_v60 = vsub.f32 1.0, %v3061_v37  ;;  %vm3035_vm10 = vweird.f32 %v8429_v59  ;;  %v3039_v33 = vand.u32 2147483647, %v8429_v59  ;;  %vm8676_vm3 = vmor %vm3170_vm11, %vm3171_vm8 }
 0x27d   : > { %v3071_v0 = vand.u32 2147483648, %v8531_v47  ;;  %v4772_v8 = vmul.f32 -1.442695, %v8608_v17  ;;  %vm8636_vm7 = vmor %vm3035_vm10, %vm3036_vm9  ;;  %vm3066_vm13 = vweird.f32 %v5397_v20  ;;  %v3069_v52 = vand.u32 2147483647, %v8531_v47 }
 0x27e   : > { %v3063_v41 = vmul.f32 %v5397_v20, %v3062_v60  ;;  %v8641_v31 = vadd.f32 1.0, %v5399_v5  ;;  %v3038_v59 = vsel %vm8636_vm7, %v8500_v29, %v3034_v15  ;;  %v2493_v54 = vadd.f32 %v2492_v3, %v7961_v27 }
 0x27f   : > { %5404 = vpow2.f32 %v4772_v8  ;;  %v3923_v13 = vpack.c.bf16 %v8412_v58, %v8403_v39  ;;  %v5401_v53 = vpop.eup %5400  ;;  %v3042_v42 = vor.u32 1.1754944e-38, %v3041_v14  ;;  %vm3065_vm15 = vweird.f32 %v8531_v47  ;;  %v2581_v47 = vpop.f32.mrf.mxu1 }
 0x280   : > { %v3064_v40 = vadd.f32 %v5397_v20, %v3063_v41  ;;  %v2333_v46 = vadd.f32 %v8489_v10, %v7139_v55  ;;  %v8654_v44 = vpop.eup %5402  ;;  %v3227_v49 = vsub.f32 1.0, %v8620_v22  ;;  %vm3040_vm0 = vcmp.eq.f32.partialorder %v3039_v33, 8.507059e+37  ;;  %vm3067_vm12 = vmor %vm3065_vm15, %vm3066_vm13 }
 0x281   : > { %v3072_v29 = vor.u32 1.1754944e-38, %v3071_v0  ;;  %v2491_v12 = vadd.f32 %v8545_v23, %v7961_v27  ;;  %v3043_v39 = vsel %vm3040_vm0, %v3042_v42, %v3038_v59  ;;  %vm3070_vm2 = vcmp.eq.f32.partialorder %v3069_v52, 8.507059e+37 }
 0x282   : > { %4101 = vmatmul.bf16.gmra.mxu2 %v3923_v13  ;;  %v3068_v58 = vsel %vm3067_vm12, %v5397_v20, %v3064_v40  ;;  %5406 = vrcp.f32 %v8641_v31  ;;  %v8662_v10 = vadd.f32 1.0, %v5401_v53  ;;  %v8664_v5 = vadd.f32 %v2581_v47, %v2493_v54  ;;  %v10466_v54 = vld [vmem:[#allocation25_spill] sm:$0xff] }
 0x283   : > { %5408 = vrcp.f32 %v8628_v21  ;;  %v3073_v37 = vsel %vm3070_vm2, %v3072_v29, %v3068_v58  ;;  %v3256_v22 = vmul.f32 %v8654_v44, %v8592_v6  ;;  %v8670_v15 = vadd.f32 %v8534_v1, %v2333_v46 }
 0x284   : > { %5410 = vpow2.f32 %v4787_v2  ;;  %v3866_v23 = vmul.f32 %v3073_v37, %v8417_v62  ;;  %v3177_v60 = vor.u32 1.1754944e-38, %v3176_v7  ;;  %v3204_v3 = vand.u32 2147483647, %v8435_v30  ;;  %v8682_v2 = vpop.f32.mrf.mxu3 }
 0x285   : > { %v5405_v20 = vpop.eup %5404  ;;  %v3864_v33 = vmul.f32 %v3043_v39, %v8330_v57  ;;  %v8685_v62 = vadd.f32 %v8601_v4, %v2491_v12  ;;  %v3173_v1 = vsel %vm8676_vm3, %v8444_v24, %v8611_v45  ;;  %vm3201_vm14 = vweird.f32 %v8514_v48  ;;  %v8704_v45 = vpop.f32.mrf.mxu2 }
 0x286   : > { %v3206_v0 = vand.u32 2147483648, %v8435_v30  ;;  %v8693_v8 = vadd.f32 1.0, %v5405_v20  ;;  %v3199_v7 = vadd.f32 %v8514_v48, %v8615_v11  ;;  %5412 = vrcp.f32 %v8662_v10 }
 0x287   : > { %v4776_v57 = vmul.f32 -1.442695, %v8664_v5  ;;  %v3924_v4 = vpack.c.bf16 %v3866_v23, %v3864_v33  ;;  %v3228_v41 = vmul.f32 %v8587_v35, %v3227_v49  ;;  %v3257_v52 = vsub.f32 1.0, %v3256_v22 }
 0x288   : > { %v8699_v25 = vpop.eup %5406  ;;  %v4789_v24 = vmul.f32 -1.442695, %v8670_v15  ;;  %5414 = vrcp.f32 %v8693_v8  ;;  %v8710_v11 = vmul.f32 %v8603_v43, %v10466_v54  ;;  %vm3175_vm1 = vcmp.eq.f32.partialorder %v3174_v19, 8.507059e+37  ;;  %v2495_v54 = vpop.f32.mrf.mxu0 }
 0x289   : > { %v8706_v59 = vpop.eup %5408  ;;  %vm3200_vm4 = vweird.f32 %v8435_v30  ;;  %v4774_v13 = vmul.f32 -1.442695, %v8685_v62  ;;  %v3178_v42 = vsel %vm3175_vm1, %v3177_v60, %v3173_v1  ;;  %vm8722_vm6 = vcmp.eq.f32.partialorder %v3204_v3, 8.507059e+37  ;;  %4190 = vmatmul.bf16.gmra.mxu3 %v3924_v4 }
 0x28a   : > { %v5411_v53 = vpop.eup %5410  ;;  %vm8718_vm5 = vmor %vm3200_vm4, %vm3201_vm14  ;;  %v3207_v43 = vor.u32 1.1754944e-38, %v3206_v0  ;;  %v3236_v50 = vand.u32 2147483648, %v8496_v26  ;;  %vm3231_vm8 = vweird.f32 %v8587_v35  ;;  %v3091_v19 = vmul.f32 %v8699_v25, %v8641_v31 }
 0x28b   : > { %v3203_v30 = vsel %vm8718_vm5, %v8514_v48, %v3199_v7  ;;  %5416 = vpow2.f32 %v4776_v57  ;;  %v3229_v49 = vadd.f32 %v8587_v35, %v3228_v41  ;;  %v3258_v29 = vmul.f32 %v8654_v44, %v3257_v52 }
 0x28c   : > { %v3286_v12 = vmul.f32 %v8706_v59, %v8628_v21  ;;  %5418 = vpow2.f32 %v4789_v24  ;;  %v8737_v39 = vpop.eup %5412  ;;  %vm3230_vm9 = vweird.f32 %v8496_v26  ;;  %v8740_v58 = vadd.f32 1.0, %v5411_v53  ;;  %v8759_v33 = vpop.f32.mrf.mxu3 }
 0x28d   : > { %v2335_v48 = vadd.f32 %v8569_v9, %v7139_v55  ;;  %5420 = vpow2.f32 %v4774_v13  ;;  %v3208_v37 = vsel %vm8722_vm6, %v3207_v43, %v3203_v30  ;;  %v3234_v22 = vand.u32 2147483647, %v8496_v26  ;;  %vm8752_vm11 = vmor %vm3230_vm9, %vm3231_vm8  ;;  %v8785_v24 = vpop.f32.mrf.mxu2 }
 0x28e   : > { %v8744_v47 = vpop.eup %5414  ;;  %v3237_v23 = vor.u32 1.1754944e-38, %v3236_v50  ;;  %v3264_v20 = vand.u32 2147483647, %v8592_v6  ;;  %v3266_v60 = vand.u32 2147483648, %v8592_v6  ;;  %v3092_v9 = vsub.f32 1.0, %v3091_v19 }
 0x28f   : > { %v3121_v3 = vmul.f32 %v8744_v47, %v8693_v8  ;;  %v3925_v26 = vpack.c.bf16 %v8596_v51, %v8590_v28  ;;  %v3233_v1 = vsel %vm8752_vm11, %v8587_v35, %v3229_v49  ;;  %v8767_v0 = vadd.f32 %v8654_v44, %v3258_v29 }
 0x290   : > { %vm3261_vm10 = vweird.f32 %v8654_v44  ;;  %v3287_v7 = vsub.f32 1.0, %v3286_v12  ;;  %v8772_v4 = vmul.f32 %v8737_v39, %v8662_v10  ;;  %5422 = vrcp.f32 %v8740_v58 }
 0x291   : > { %v5417_v57 = vpop.eup %5416  ;;  %v8776_v41 = vadd.f32 %v8625_v61, %v2335_v48  ;;  %v3122_v28 = vsub.f32 1.0, %v3121_v3  ;;  %v8779_v35 = vmul.f32 %v3178_v42, %v8133_v18  ;;  %v8782_v52 = vmul.f32 %v3208_v37, %v8274_v34 }
 0x292   : > { %4106 = vmatmul.bf16.gmra.mxu2 %v3925_v26  ;;  %v5419_v51 = vpop.eup %5418  ;;  %vm3235_vm7 = vcmp.eq.f32.partialorder %v3234_v22, 8.507059e+37  ;;  %vm3260_vm13 = vweird.f32 %v8592_v6  ;;  %v3267_v18 = vor.u32 1.1754944e-38, %v3266_v60  ;;  %v3093_v42 = vmul.f32 %v8699_v25, %v3092_v9 }
 0x293   : > { %v5421_v13 = vpop.eup %5420  ;;  %v8787_v53 = vsel %vm3235_vm7, %v3237_v23, %v3233_v1  ;;  %vm8791_vm15 = vmor %vm3260_vm13, %vm3261_vm10  ;;  %v3123_v34 = vmul.f32 %v8744_v47, %v3122_v28  ;;  %vm8801_vm0 = vcmp.eq.f32.partialorder %v3264_v20, 8.507059e+37  ;;  %v3288_v46 = vmul.f32 %v8706_v59, %v3287_v7  ;;  %v2584_v20 = vpop.f32.mrf.mxu1 }
 0x294   : > { %v3263_v6 = vsel %vm8791_vm15, %v8654_v44, %v8767_v0  ;;  %v3294_v43 = vand.u32 2147483647, %v8628_v21  ;;  %v8807_v50 = vadd.f32 1.0, %v5417_v57  ;;  %v3317_v30 = vsub.f32 1.0, %v8772_v4  ;;  %v8840_v26 = vpop.f32.mrf.mxu3 }
 0x295   : > { %v4791_v19 = vmul.f32 -1.442695, %v8776_v41  ;;  %v3124_v49 = vadd.f32 %v8744_v47, %v3123_v34  ;;  %vm3126_vm12 = vweird.f32 %v8744_v47  ;;  %v8813_v29 = vadd.f32 1.0, %v5419_v51 }
 0x296   : > { %v3131_v44 = vand.u32 2147483648, %v8693_v8  ;;  %v2338_v12 = vadd.f32 %v8643_v38, %v7139_v55  ;;  %v8818_v48 = vadd.f32 1.0, %v5421_v13  ;;  %v8820_v37 = vpop.eup %5422  ;;  %v3094_v22 = vadd.f32 %v8699_v25, %v3093_v42  ;;  %v2497_v13 = vpop.f32.mrf.mxu0 }
 0x297   : > { %vm3096_vm2 = vweird.f32 %v8699_v25  ;;  %vm3125_vm3 = vweird.f32 %v8693_v8  ;;  %v3129_v23 = vand.u32 2147483647, %v8693_v8  ;;  %v3101_v14 = vand.u32 2147483648, %v8641_v31 }
 0x298   : > { %vm8827_vm14 = vmor %vm3125_vm3, %vm3126_vm12  ;;  %v2340_v38 = vadd.f32 %v8704_v45, %v7139_v55  ;;  %5424 = vrcp.f32 %v8807_v50  ;;  %v2496_v9 = vadd.f32 %v2495_v54, %v7961_v27  ;;  %vm3095_vm1 = vweird.f32 %v8641_v31  ;;  %v8864_v54 = vpop.f32.mrf.mxu2 }
 0x299   : > { %v3099_v3 = vand.u32 2147483647, %v8641_v31  ;;  %5426 = vpow2.f32 %v4791_v19  ;;  %v3128_v8 = vsel %vm8827_vm14, %v8744_v47, %v3124_v49  ;;  %v3346_v1 = vmul.f32 %v8820_v37, %v8740_v58  ;;  %vm8846_vm4 = vmor %vm3095_vm1, %vm3096_vm2 }
 0x29a   : > { %v3132_v0 = vor.u32 1.1754944e-38, %v3131_v44  ;;  %5428 = vrcp.f32 %v8818_v48  ;;  %v8851_v31 = vadd.f32 %v2584_v20, %v2496_v9  ;;  %v3098_v47 = vsel %vm8846_vm4, %v8699_v25, %v3094_v22 }
 0x29b   : > { %5430 = vrcp.f32 %v8813_v29  ;;  %vm3130_vm5 = vcmp.eq.f32.partialorder %v3129_v23, 8.507059e+37  ;;  %v8858_v7 = vadd.f32 %v8682_v2, %v2338_v12  ;;  %v3102_v57 = vor.u32 1.1754944e-38, %v3101_v14 }
 0x29c   : > { %v3133_v4 = vsel %vm3130_vm5, %v3132_v0, %v3128_v8  ;;  %v8861_v28 = vadd.f32 %v8759_v33, %v2340_v38  ;;  %v4778_v51 = vmul.f32 -1.442695, %v8851_v31  ;;  %v3268_v61 = vsel %vm8801_vm0, %v3267_v18, %v3263_v6  ;;  %v8913_v60 = vpop.f32.mrf.mxu3 }
 0x29d   : > { %vm3291_vm6 = vweird.f32 %v8706_v59  ;;  %v3296_v25 = vand.u32 2147483648, %v8628_v21  ;;  %vm3100_vm8 = vcmp.eq.f32.partialorder %v3099_v3, 8.507059e+37  ;;  %v3289_v42 = vadd.f32 %v8706_v59, %v3288_v46 }
 0x29e   : > { %v8870_v2 = vpop.eup %5424  ;;  %v3347_v34 = vsub.f32 1.0, %v3346_v1  ;;  %v3103_v33 = vsel %vm3100_vm8, %v3102_v57, %v3098_v47  ;;  %5432 = vpow2.f32 %v4778_v51  ;;  %v3870_v49 = vmul.f32 %v3133_v4, %v8608_v17 }
 0x29f   : > { %v5427_v19 = vpop.eup %5426  ;;  %v4793_v44 = vmul.f32 -1.442695, %v8858_v7  ;;  %v2498_v40 = vadd.f32 %v2497_v13, %v7961_v27  ;;  %v3927_v18 = vpack.c.bf16 %v8779_v35, %v8710_v11  ;;  %v8882_v12 = vmul.f32 %v8787_v53, %v8361_v56  ;;  %v2586_v53 = vpop.f32.mrf.mxu1 }
 0x2a0   : > { %v8878_v6 = vpop.eup %5428  ;;  %vm3290_vm9 = vweird.f32 %v8628_v21  ;;  %v3318_v46 = vmul.f32 %v8737_v39, %v3317_v30  ;;  %v4795_v22 = vmul.f32 -1.442695, %v8861_v28  ;;  %vm8895_vm10 = vcmp.eq.f32.partialorder %v3294_v43, 8.507059e+37  ;;  %v8930_v51 = vpop.f32.mrf.mxu2 }
 0x2a1   : > { %v8887_v17 = vpop.eup %5430  ;;  %vm8891_vm11 = vmor %vm3290_vm9, %vm3291_vm6  ;;  %v3297_v56 = vor.u32 1.1754944e-38, %v3296_v25  ;;  %v3868_v35 = vmul.f32 %v3103_v33, %v8512_v63  ;;  %v3181_v21 = vmul.f32 %v8870_v2, %v8807_v50  ;;  %v8903_v30 = vmul.f32 %v3268_v61, %v8427_v32 }
 0x2a2   : > { %4111 = vmatmul.bf16.gmra.mxu2 %v3927_v18  ;;  %v3293_v20 = vsel %vm8891_vm11, %v8706_v59, %v3289_v42  ;;  %v3348_v43 = vmul.f32 %v8820_v37, %v3347_v34  ;;  %v8909_v14 = vadd.f32 1.0, %v5427_v19  ;;  %5434 = vpow2.f32 %v4793_v44  ;;  %v2500_v42 = vpop.f32.mrf.mxu0  ;;  %v10487_v18 = vld [vmem:[#allocation23_spill] sm:$0xff] }
 0x2a3   : > { %v3151_v63 = vmul.f32 %v8878_v6, %v8818_v48  ;;  %v8915_v38 = vadd.f32 %v2586_v53, %v2498_v40  ;;  %v3926_v9 = vpack.c.bf16 %v3870_v49, %v3868_v35  ;;  %v3319_v32 = vadd.f32 %v8737_v39, %v3318_v46 }
 0x2a4   : > { %v5433_v3 = vpop.eup %5432  ;;  %vm3321_vm7 = vweird.f32 %v8737_v39  ;;  %v3376_v59 = vmul.f32 %v8887_v17, %v8813_v29  ;;  %5436 = vpow2.f32 %v4795_v22  ;;  %v3324_v8 = vand.u32 2147483647, %v8662_v10 }
 0x2a5   : > { %v3326_v1 = vand.u32 2147483648, %v8662_v10  ;;  %v3182_v45 = vsub.f32 1.0, %v3181_v21  ;;  %v4780_v0 = vmul.f32 -1.442695, %v8915_v38  ;;  %4195 = vmatmul.bf16.gmra.mxu3 %v3926_v9  ;;  %v3298_v47 = vsel %vm8895_vm10, %v3297_v56, %v3293_v20 }
 0x2a6   : > { %vm3320_vm13 = vweird.f32 %v8662_v10  ;;  %v3356_v57 = vand.u32 2147483648, %v8740_v58  ;;  %v8928_v4 = vadd.f32 1.0, %v5433_v3  ;;  %v8937_v61 = vadd.f32 %v8820_v37, %v3348_v43 }
 0x2a7   : > { %vm8932_vm15 = vmor %vm3320_vm13, %vm3321_vm7  ;;  %vm3351_vm0 = vweird.f32 %v8820_v37  ;;  %5438 = vrcp.f32 %v8909_v14  ;;  %v3152_v25 = vsub.f32 1.0, %v3151_v63  ;;  %v3354_v34 = vand.u32 2147483647, %v8740_v58  ;;  %v2589_v21 = vpop.f32.mrf.mxu1 }
 0x2a8   : > { %v3323_v10 = vsel %vm8932_vm15, %v8737_v39, %v3319_v32  ;;  %v3377_v33 = vsub.f32 1.0, %v3376_v59  ;;  %5440 = vpow2.f32 %v4780_v0  ;;  %v5435_v19 = vpop.eup %5434  ;;  %vm3325_vm12 = vcmp.eq.f32.partialorder %v3324_v8, 8.507059e+37  ;;  %v8982_v59 = vpop.f32.mrf.mxu3 }
 0x2a9   : > { %v3327_v49 = vor.u32 1.1754944e-38, %v3326_v1  ;;  %vm3350_vm2 = vweird.f32 %v8740_v58  ;;  %v3183_v44 = vmul.f32 %v8870_v2, %v3182_v45  ;;  %v8948_v46 = vmul.f32 %v3298_v47, %v10487_v18 }
 0x2aa   : > { %v5437_v40 = vpop.eup %5436  ;;  %vm8952_vm3 = vmor %vm3350_vm2, %vm3351_vm0  ;;  %v3357_v39 = vor.u32 1.1754944e-38, %v3356_v57  ;;  %5442 = vrcp.f32 %v8928_v4  ;;  %v2501_v23 = vadd.f32 %v2500_v42, %v7961_v27  ;;  %v3386_v56 = vand.u32 2147483648, %v8813_v29 }
 0x2ab   : > { %v3328_v11 = vsel %vm3325_vm12, %v3327_v49, %v3323_v10  ;;  %v3353_v58 = vsel %vm8952_vm3, %v8820_v37, %v8937_v61  ;;  %v3153_v35 = vmul.f32 %v8878_v6, %v3152_v25  ;;  %vm8964_vm14 = vcmp.eq.f32.partialorder %v3354_v34, 8.507059e+37 }
 0x2ac   : > { %v3378_v20 = vmul.f32 %v8887_v17, %v3377_v33  ;;  %vm3380_vm1 = vweird.f32 %v8813_v29  ;;  %vm3381_vm4 = vweird.f32 %v8887_v17  ;;  %v8971_v43 = vadd.f32 1.0, %v5435_v19  ;;  %v2502_v33 = vpop.f32.mrf.mxu0 }
 0x2ad   : > { %v2343_v37 = vadd.f32 %v8785_v24, %v7139_v55  ;;  %v8975_v63 = vpop.eup %5438  ;;  %v3161_v9 = vand.u32 2147483648, %v8818_v48  ;;  %v8978_v3 = vadd.f32 1.0, %v5437_v40  ;;  %v3184_v32 = vadd.f32 %v8870_v2, %v3183_v44  ;;  %vm9045_vm13 = vmor %vm3380_vm1, %vm3381_vm4 }
 0x2ae   : > { %vm3186_vm5 = vweird.f32 %v8870_v2  ;;  %v5441_v8 = vpop.eup %5440  ;;  %vm3156_vm6 = vweird.f32 %v8878_v6  ;;  %v3191_v1 = vand.u32 2147483648, %v8807_v50  ;;  %v8986_v45 = vadd.f32 %v2589_v21, %v2501_v23 }
 0x2af   : > { %v3929_v24 = vpack.c.bf16 %v8882_v12, %v8782_v52  ;;  %v3154_v0 = vadd.f32 %v8878_v6, %v3153_v35  ;;  %vm3185_vm8 = vweird.f32 %v8807_v50  ;;  %v3189_v47 = vand.u32 2147483647, %v8807_v50  ;;  %v9009_v50 = vpop.f32.mrf.mxu2 }
 0x2b0   : > { %v8993_v57 = vadd.f32 1.0, %v5441_v8  ;;  %v8995_v13 = vpop.eup %5442  ;;  %v3379_v61 = vadd.f32 %v8887_v17, %v3378_v20  ;;  %v3406_v25 = vmul.f32 %v8975_v63, %v8909_v14  ;;  %vm9000_vm9 = vmor %vm3185_vm8, %vm3186_vm5  ;;  %v9005_v52 = vadd.f32 %v8840_v26, %v2343_v37 }
 0x2b1   : > { %v2345_v12 = vadd.f32 %v8864_v54, %v7139_v55  ;;  %vm3155_vm11 = vweird.f32 %v8818_v48  ;;  %v3159_v10 = vand.u32 2147483647, %v8818_v48  ;;  %v3188_v34 = vsel %vm9000_vm9, %v8870_v2, %v3184_v32 }
 0x2b2   : > { %5444 = vrcp.f32 %v8993_v57  ;;  %4116 = vmatmul.bf16.gmra.mxu2 %v3929_v24  ;;  %vm9020_vm10 = vmor %vm3155_vm11, %vm3156_vm6  ;;  %v3162_v54 = vor.u32 1.1754944e-38, %v3161_v9  ;;  %v3192_v19 = vor.u32 1.1754944e-38, %v3191_v1  ;;  %v4782_v48 = vmul.f32 -1.442695, %v8986_v45  ;;  %v9057_v9 = vpop.f32.mrf.mxu3 }
 0x2b3   : > { %5446 = vrcp.f32 %v8971_v43  ;;  %v3158_v2 = vsel %vm9020_vm10, %v8878_v6, %v3154_v0  ;;  %vm3190_vm7 = vcmp.eq.f32.partialorder %v3189_v47, 8.507059e+37  ;;  %v3211_v49 = vmul.f32 %v8995_v13, %v8928_v4 }
 0x2b4   : > { %5448 = vrcp.f32 %v8978_v3  ;;  %v3193_v44 = vsel %vm3190_vm7, %v3192_v19, %v3188_v34  ;;  %v4797_v40 = vmul.f32 -1.442695, %v9005_v52  ;;  %v9033_v18 = vadd.f32 %v8913_v60, %v2345_v12  ;;  %v2591_v60 = vpop.f32.mrf.mxu1 }
 0x2b5   : > { %v2503_v22 = vadd.f32 %v2502_v33, %v7961_v27  ;;  %v9037_v23 = vmul.f32 %v3328_v11, %v8543_v36  ;;  %v3358_v6 = vsel %vm8964_vm14, %v3357_v39, %v3353_v58  ;;  %v3384_v21 = vand.u32 2147483647, %v8813_v29 }
 0x2b6   : > { %vm3160_vm15 = vcmp.eq.f32.partialorder %v3159_v10, 8.507059e+37  ;;  %v3383_v36 = vsel %vm9045_vm13, %v8887_v17, %v3379_v61  ;;  %v3416_v11 = vand.u32 2147483648, %v8909_v14  ;;  %5450 = vpow2.f32 %v4782_v48  ;;  %v2505_v48 = vpop.f32.mrf.mxu0 }
 0x2b7   : > { %v3163_v53 = vsel %vm3160_vm15, %v3162_v54, %v3158_v2  ;;  %v3407_v58 = vsub.f32 1.0, %v3406_v25  ;;  %v3874_v20 = vmul.f32 %v3193_v44, %v8664_v5  ;;  %v3212_v37 = vsub.f32 1.0, %v3211_v49  ;;  %v9080_v12 = vpop.f32.mrf.mxu2 }
 0x2b8   : > { %v9054_v39 = vpop.eup %5444  ;;  %v9059_v32 = vadd.f32 %v2591_v60, %v2503_v22  ;;  %v3387_v1 = vor.u32 1.1754944e-38, %v3386_v56  ;;  %5452 = vpow2.f32 %v4797_v40  ;;  %v4799_v17 = vmul.f32 -1.442695, %v9033_v18 }
 0x2b9   : > { %v9061_v8 = vpop.eup %5446  ;;  %v3241_v24 = vmul.f32 %v9054_v39, %v8993_v57  ;;  %v9071_v5 = vmul.f32 %v3358_v6, %v8599_v16  ;;  %vm3385_vm0 = vcmp.eq.f32.partialorder %v3384_v21, 8.507059e+37  ;;  %v3872_v47 = vmul.f32 %v3163_v53, %v8685_v62 }
 0x2ba   : > { %v9068_v0 = vpop.eup %5448  ;;  %v2348_v61 = vadd.f32 %v8930_v51, %v7139_v55  ;;  %v9076_v25 = vsel %vm3385_vm0, %v3387_v1, %v3383_v36  ;;  %v3414_v29 = vand.u32 2147483647, %v8909_v14  ;;  %v4784_v42 = vmul.f32 -1.442695, %v9059_v32 }
 0x2bb   : > { %v3242_v56 = vsub.f32 1.0, %v3241_v24  ;;  %v3408_v10 = vmul.f32 %v8975_v63, %v3407_v58  ;;  %v9083_v34 = vor.u32 1.1754944e-38, %v3416_v11  ;;  %v3213_v16 = vmul.f32 %v8995_v13, %v3212_v37 }
 0x2bc   : > { %v3928_v33 = vpack.c.bf16 %v3874_v20, %v3872_v47  ;;  %v5451_v62 = vpop.eup %5450  ;;  %v3436_v51 = vmul.f32 %v9061_v8, %v8971_v43  ;;  %v3466_v26 = vmul.f32 %v9068_v0, %v8978_v3  ;;  %5454 = vpow2.f32 %v4799_v17  ;;  %v2441_v20 = vpop.f32.mrf.mxu3 }
 0x2bd   : > { %v3243_v54 = vmul.f32 %v9054_v39, %v3242_v56  ;;  %vm3246_vm12 = vweird.f32 %v9054_v39  ;;  %v9093_v19 = vadd.f32 %v8982_v59, %v2348_v61  ;;  %5456 = vpow2.f32 %v4784_v42 }
 0x2be   : > { %4200 = vmatmul.bf16.gmra.mxu3 %v3928_v33  ;;  %v3931_v2 = vpack.c.bf16 %v8948_v46, %v8903_v30  ;;  %v5453_v49 = vpop.eup %5452  ;;  %vm3411_vm2 = vweird.f32 %v8975_v63  ;;  %vm3216_vm3 = vweird.f32 %v8995_v13  ;;  %v3251_v40 = vand.u32 2147483648, %v8993_v57  ;;  %v2594_v30 = vpop.f32.mrf.mxu1 }
 0x2bf   : > { %v3244_v44 = vadd.f32 %v9054_v39, %v3243_v54  ;;  %v2506_v22 = vadd.f32 %v2505_v48, %v7961_v27  ;;  %v3214_v59 = vadd.f32 %v8995_v13, %v3213_v16  ;;  %vm3245_vm14 = vweird.f32 %v8993_v57 }
 0x2c0   : > { %v3249_v6 = vand.u32 2147483647, %v8993_v57  ;;  %v9105_v35 = vadd.f32 1.0, %v5451_v62  ;;  %vm3410_vm1 = vweird.f32 %v8909_v14  ;;  %v3437_v46 = vsub.f32 1.0, %v3436_v51  ;;  %vm9112_vm4 = vmor %vm3245_vm14, %vm3246_vm12 }
 0x2c1   : > { %v3444_v21 = vand.u32 2147483647, %v8971_v43  ;;  %v3467_v60 = vsub.f32 1.0, %v3466_v26  ;;  %v3221_v36 = vand.u32 2147483648, %v8928_v4  ;;  %v9116_v53 = vadd.f32 1.0, %v5453_v49  ;;  %v2507_v26 = vpop.f32.mrf.mxu0  ;;  %vm9171_vm13 = vmor %vm3410_vm1, %vm3411_vm2 }
 0x2c2   : > { %vm3215_vm5 = vweird.f32 %v8928_v4  ;;  %v3219_v57 = vand.u32 2147483647, %v8928_v4  ;;  %v3248_v58 = vsel %vm9112_vm4, %v9054_v39, %v3244_v44  ;;  %4121 = vmatmul.bf16.gmra.mxu2 %v3931_v2  ;;  %v5455_v37 = vpop.eup %5454  ;;  %v3252_v17 = vor.u32 1.1754944e-38, %v3251_v40 }
 0x2c3   : > { %vm9125_vm6 = vmor %vm3215_vm5, %vm3216_vm3  ;;  %v4801_v24 = vmul.f32 -1.442695, %v9093_v19  ;;  %v2350_v47 = vadd.f32 %v9009_v50, %v7139_v55  ;;  %v9132_v4 = vadd.f32 %v2594_v30, %v2506_v22  ;;  %v5457_v61 = vpop.eup %5456  ;;  %v3409_v39 = vadd.f32 %v8975_v63, %v3408_v10  ;;  %v9147_v10 = vpop.f32.mrf.mxu2 }
 0x2c4   : > { %vm3440_vm8 = vweird.f32 %v8971_v43  ;;  %v3218_v56 = vsel %vm9125_vm6, %v8995_v13, %v3214_v59  ;;  %vm3250_vm9 = vcmp.eq.f32.partialorder %v3249_v6, 8.507059e+37  ;;  %5458 = vrcp.f32 %v9105_v35 }
 0x2c5   : > { %vm9140_vm11 = vcmp.eq.f32.partialorder %v3414_v29, 8.507059e+37  ;;  %v3222_v16 = vor.u32 1.1754944e-38, %v3221_v36  ;;  %v3253_v50 = vsel %vm3250_vm9, %v3252_v17, %v3248_v58  ;;  %v9144_v33 = vadd.f32 1.0, %v5457_v61 }
 0x2c6   : > { %v4786_v62 = vmul.f32 -1.442695, %v9132_v4  ;;  %v3438_v51 = vmul.f32 %v9061_v8, %v3437_v46  ;;  %5460 = vrcp.f32 %v9116_v53  ;;  %vm3220_vm10 = vcmp.eq.f32.partialorder %v3219_v57, 8.507059e+37  ;;  %v9191_v57 = vpop.f32.mrf.mxu3 }
 0x2c7   : > { %v9151_v13 = vadd.f32 1.0, %v5455_v37  ;;  %v3468_v29 = vmul.f32 %v9068_v0, %v3467_v60  ;;  %v3223_v54 = vsel %vm3220_vm10, %v3222_v16, %v3218_v56  ;;  %5462 = vpow2.f32 %v4801_v24 }
 0x2c8   : > { %v9155_v48 = vadd.f32 %v9057_v9, %v2350_v47  ;;  %v3446_v2 = vand.u32 2147483648, %v8971_v43  ;;  %v3474_v49 = vand.u32 2147483647, %v8978_v3  ;;  %v3878_v44 = vmul.f32 %v3253_v50, %v8915_v38 }
 0x2c9   : > { %5464 = vrcp.f32 %v9144_v33  ;;  %vm3441_vm7 = vweird.f32 %v9061_v8  ;;  %v3476_v40 = vand.u32 2147483648, %v8978_v3  ;;  %v2353_v22 = vadd.f32 %v9080_v12, %v7139_v55  ;;  %v2596_v12 = vpop.f32.mrf.mxu1  ;;  %v2510_v50 = vpop.f32.mrf.mxu0 }
 0x2ca   : > { %5466 = vpow2.f32 %v4786_v62  ;;  %v9165_v59 = vpop.eup %5458  ;;  %v3439_v38 = vadd.f32 %v9061_v8, %v3438_v51  ;;  %v3876_v6 = vmul.f32 %v3223_v54, %v8851_v31  ;;  %v2508_v30 = vadd.f32 %v2507_v26, %v7961_v27  ;;  %vm9199_vm12 = vmor %vm3440_vm8, %vm3441_vm7 }
 0x2cb   : > { %5468 = vrcp.f32 %v9151_v13  ;;  %v3413_v46 = vsel %vm9171_vm13, %v8975_v63, %v3409_v39  ;;  %v3469_v60 = vadd.f32 %v9068_v0, %v3468_v29  ;;  %vm3471_vm15 = vweird.f32 %v9068_v0  ;;  %v2357_v16 = vpop.f32.mrf.mxu2 }
 0x2cc   : > { %v4803_v14 = vmul.f32 -1.442695, %v9155_v48  ;;  %v9185_v36 = vpop.eup %5460  ;;  %vm9187_vm0 = vcmp.eq.f32.partialorder %v3444_v21, 8.507059e+37  ;;  %v3447_v31 = vor.u32 1.1754944e-38, %v3446_v2  ;;  %v9193_v58 = vadd.f32 %v2596_v12, %v2508_v30 }
 0x2cd   : > { %v3930_v37 = vpack.c.bf16 %v3878_v44, %v3876_v6  ;;  %v5463_v1 = vpop.eup %5462  ;;  %vm3470_vm2 = vweird.f32 %v8978_v3  ;;  %vm9204_vm3 = vcmp.eq.f32.partialorder %v3474_v49, 8.507059e+37  ;;  %v3271_v17 = vmul.f32 %v9165_v59, %v9105_v35 }
 0x2ce   : > { %v9210_v24 = vadd.f32 %v2441_v20, %v2353_v22  ;;  %v3418_v43 = vsel %vm9140_vm11, %v9083_v34, %v3413_v46  ;;  %v3443_v61 = vsel %vm9199_vm12, %v9061_v8, %v3439_v38  ;;  %vm9222_vm14 = vmor %vm3470_vm2, %vm3471_vm15  ;;  %v3477_v39 = vor.u32 1.1754944e-38, %v3476_v40 }
 0x2cf   : > { %v9212_v47 = vpop.eup %5464  ;;  %v4788_v20 = vmul.f32 -1.442695, %v9193_v58  ;;  %4205 = vmatmul.bf16.gmra.mxu3 %v3930_v37  ;;  %v3473_v42 = vsel %vm9222_vm14, %v9068_v0, %v3469_v60  ;;  %v3496_v34 = vmul.f32 %v9185_v36, %v9116_v53  ;;  %5470 = vpow2.f32 %v4803_v14 }
 0x2d0   : > { %v5467_v56 = vpop.eup %5466  ;;  %v3301_v8 = vmul.f32 %v9212_v47, %v9144_v33  ;;  %v9236_v51 = vadd.f32 1.0, %v5463_v1  ;;  %v3933_v29 = vpack.c.bf16 %v9071_v5, %v9037_v23  ;;  %v3448_v0 = vsel %vm9187_vm0, %v3447_v31, %v3443_v61  ;;  %v2446_v31 = vpop.f32.mrf.mxu3 }
 0x2d1   : > { %v9234_v62 = vpop.eup %5468  ;;  %v9238_v26 = vadd.f32 1.0, %v5467_v56  ;;  %5472 = vpow2.f32 %v4788_v20  ;;  %v3272_v54 = vsub.f32 1.0, %v3271_v17  ;;  %v4805_v49 = vmul.f32 -1.442695, %v9210_v24  ;;  %v2599_v30 = vpop.f32.mrf.mxu1 }
 0x2d2   : > { %v3302_v2 = vsub.f32 1.0, %v3301_v8  ;;  %v9247_v44 = vmul.f32 %v9076_v25, %v8670_v15  ;;  %v3478_v40 = vsel %vm9204_vm3, %v3477_v39, %v3473_v42  ;;  %v3506_v22 = vand.u32 2147483648, %v9116_v53  ;;  %4126 = vmatmul.bf16.gmra.mxu2 %v3933_v29 }
 0x2d3   : > { %v2511_v9 = vadd.f32 %v2510_v50, %v7961_v27  ;;  %v9254_v23 = vmul.f32 %v3418_v43, %v8776_v41  ;;  %v3497_v5 = vsub.f32 1.0, %v3496_v34  ;;  %v3526_v38 = vmul.f32 %v9234_v62, %v9151_v13  ;;  %v9295_v20 = vpop.f32.mrf.mxu2 }
 0x2d4   : > { %5474 = vrcp.f32 %v9238_v26  ;;  %v9260_v15 = vmul.f32 %v3448_v0, %v8858_v7  ;;  %v3504_v25 = vand.u32 2147483647, %v9116_v53  ;;  %v3303_v6 = vmul.f32 %v9212_v47, %v3302_v2 }
 0x2d5   : > { %5476 = vrcp.f32 %v9236_v51  ;;  %v5471_v12 = vpop.eup %5470  ;;  %v9266_v41 = vmul.f32 %v3478_v40, %v8861_v28  ;;  %vm3500_vm1 = vweird.f32 %v9116_v53  ;;  %v3273_v46 = vmul.f32 %v9165_v59, %v3272_v54 }
 0x2d6   : > { %5478 = vpow2.f32 %v4805_v49  ;;  %v2355_v7 = vadd.f32 %v9147_v10, %v7139_v55  ;;  %vm3501_vm4 = vweird.f32 %v9185_v36  ;;  %v9273_v14 = vor.u32 1.1754944e-38, %v3506_v22 }
 0x2d7   : > { %v5473_v60 = vpop.eup %5472  ;;  %v3534_v11 = vand.u32 2147483647, %v9151_v13  ;;  %v9276_v37 = vadd.f32 %v2599_v30, %v2511_v9  ;;  %v3498_v28 = vmul.f32 %v9185_v36, %v3497_v5  ;;  %v3527_v1 = vsub.f32 1.0, %v3526_v38  ;;  %vm9341_vm15 = vmor %vm3500_vm1, %vm3501_vm4 }
 0x2d8   : > { %v3536_v63 = vand.u32 2147483648, %v9151_v13  ;;  %v9280_v21 = vadd.f32 1.0, %v5473_v60  ;;  %vm3276_vm5 = vweird.f32 %v9165_v59  ;;  %v9283_v10 = vadd.f32 1.0, %v5471_v12 }
 0x2d9   : > { %v3304_v17 = vadd.f32 %v9212_v47, %v3303_v6  ;;  %vm3306_vm6 = vweird.f32 %v9212_v47  ;;  %v3274_v61 = vadd.f32 %v9165_v59, %v3273_v46  ;;  %v3311_v3 = vand.u32 2147483648, %v9144_v33  ;;  %v2601_v30 = vpop.f32.mrf.mxu1 }
 0x2da   : > { %v9287_v43 = vpop.eup %5474  ;;  %v9292_v39 = vadd.f32 %v9191_v57, %v2355_v7  ;;  %5480 = vrcp.f32 %v9280_v21  ;;  %vm9299_vm8 = vcmp.eq.f32.partialorder %v3504_v25, 8.507059e+37  ;;  %vm3305_vm9 = vweird.f32 %v9144_v33 }
 0x2db   : > { %v9297_v56 = vpop.eup %5476  ;;  %v3309_v34 = vand.u32 2147483647, %v9144_v33  ;;  %v2358_v8 = vadd.f32 %v2357_v16, %v7139_v55  ;;  %v4790_v50 = vmul.f32 -1.442695, %v9276_v37  ;;  %v3499_v29 = vadd.f32 %v9185_v36, %v3498_v28  ;;  %vm9314_vm7 = vmor %vm3305_vm9, %vm3306_vm6  ;;  %v9357_v28 = vpop.f32.mrf.mxu3 }
 0x2dc   : > { %v5479_v57 = vpop.eup %5478  ;;  %v3528_v0 = vmul.f32 %v9234_v62, %v3527_v1  ;;  %vm3530_vm11 = vweird.f32 %v9151_v13  ;;  %vm3275_vm10 = vweird.f32 %v9105_v35  ;;  %v3281_v54 = vand.u32 2147483648, %v9105_v35 }
 0x2dd   : > { %vm9320_vm13 = vmor %vm3275_vm10, %vm3276_vm5  ;;  %v3279_v16 = vand.u32 2147483647, %v9105_v35  ;;  %5482 = vrcp.f32 %v9283_v10  ;;  %v3308_v49 = vsel %vm9314_vm7, %v9212_v47, %v3304_v17  ;;  %v3331_v40 = vmul.f32 %v9287_v43, %v9238_v26  ;;  %v2512_v35 = vpop.f32.mrf.mxu0 }
 0x2de   : > { %v3556_v22 = vmul.f32 %v9297_v56, %v9236_v51  ;;  %v3278_v9 = vsel %vm9320_vm13, %v9165_v59, %v3274_v61  ;;  %v3312_v5 = vor.u32 1.1754944e-38, %v3311_v3  ;;  %v4807_v38 = vmul.f32 -1.442695, %v9292_v39 }
 0x2df   : > { %vm3310_vm0 = vcmp.eq.f32.partialorder %v3309_v34, 8.507059e+37  ;;  %v9345_v25 = vadd.f32 1.0, %v5479_v57  ;;  %v9347_v6 = vadd.f32 %v2446_v31, %v2358_v8  ;;  %5484 = vpow2.f32 %v4790_v50 }
 0x2e0   : > { %v9349_v59 = vpop.eup %5480  ;;  %v3503_v12 = vsel %vm9341_vm15, %v9185_v36, %v3499_v29  ;;  %vm3531_vm12 = vweird.f32 %v9234_v62  ;;  %v3282_v53 = vor.u32 1.1754944e-38, %v3281_v54  ;;  %v3313_v46 = vsel %vm3310_vm0, %v3312_v5, %v3308_v49  ;;  %v9382_v29 = vpop.f32.mrf.mxu2 }
 0x2e1   : > { %vm3280_vm2 = vcmp.eq.f32.partialorder %v3279_v16, 8.507059e+37  ;;  %v3332_v7 = vsub.f32 1.0, %v3331_v40  ;;  %v3361_v60 = vmul.f32 %v9349_v59, %v9280_v21  ;;  %v3935_v31 = vpack.c.bf16 %v9254_v23, %v9247_v44  ;;  %vm9388_vm14 = vmor %vm3530_vm11, %vm3531_vm12 }
 0x2e2   : > { %v3529_v1 = vadd.f32 %v9234_v62, %v3528_v0  ;;  %v3557_v17 = vsub.f32 1.0, %v3556_v22  ;;  %v3283_v61 = vsel %vm3280_vm2, %v3282_v53, %v3278_v9  ;;  %5486 = vpow2.f32 %v4807_v38 }
 0x2e3   : > { %v9362_v36 = vpop.eup %5482  ;;  %v3882_v3 = vmul.f32 %v3313_v46, %v9059_v32  ;;  %5488 = vrcp.f32 %v9345_v25  ;;  %v3362_v34 = vsub.f32 1.0, %v3361_v60  ;;  %v4809_v8 = vmul.f32 -1.442695, %v9347_v6  ;;  %4131 = vmatmul.bf16.gmra.mxu2 %v3935_v31 }
 0x2e4   : > { %v9370_v50 = vsel %vm9299_vm8, %v9273_v14, %v3503_v12  ;;  %vm9374_vm3 = vcmp.eq.f32.partialorder %v3534_v11, 8.507059e+37  ;;  %v3537_v32 = vor.u32 1.1754944e-38, %v3536_v63  ;;  %v3564_v23 = vand.u32 2147483647, %v9236_v51  ;;  %v2604_v12 = vpop.f32.mrf.mxu1 }
 0x2e5   : > { %v2513_v57 = vadd.f32 %v2512_v35, %v7961_v27  ;;  %v5485_v0 = vpop.eup %5484  ;;  %v3566_v11 = vand.u32 2147483648, %v9236_v51  ;;  %v3880_v42 = vmul.f32 %v3283_v61, %v8986_v45  ;;  %v3333_v63 = vmul.f32 %v9287_v43, %v3332_v7  ;;  %v2515_v38 = vpop.f32.mrf.mxu0 }
 0x2e6   : > { %v3363_v54 = vmul.f32 %v9349_v59, %v3362_v34  ;;  %v3533_v2 = vsel %vm9388_vm14, %v9234_v62, %v3529_v1  ;;  %v3558_v33 = vmul.f32 %v9297_v56, %v3557_v17  ;;  %v3586_v13 = vmul.f32 %v9362_v36, %v9283_v10  ;;  %v2451_v1 = vpop.f32.mrf.mxu3 }
 0x2e7   : > { %v9402_v16 = vadd.f32 %v2601_v30, %v2513_v57  ;;  %vm3366_vm1 = vweird.f32 %v9349_v59  ;;  %5490 = vpow2.f32 %v4809_v8  ;;  %v3932_v45 = vpack.c.bf16 %v3882_v3, %v3880_v42 }
 0x2e8   : > { %v3364_v49 = vadd.f32 %v9349_v59, %v3363_v54  ;;  %v5487_v40 = vpop.eup %5486  ;;  %v3371_v22 = vand.u32 2147483648, %v9280_v21  ;;  %v9407_v9 = vadd.f32 1.0, %v5485_v0  ;;  %v2360_v62 = vadd.f32 %v9295_v20, %v7139_v55 }
 0x2e9   : > { %v4792_v5 = vmul.f32 -1.442695, %v9402_v16  ;;  %v9412_v35 = vpop.eup %5488  ;;  %v3334_v47 = vadd.f32 %v9287_v43, %v3333_v63  ;;  %vm3336_vm4 = vweird.f32 %v9287_v43  ;;  %vm3365_vm5 = vweird.f32 %v9280_v21  ;;  %4210 = vmatmul.bf16.gmra.mxu3 %v3932_v45  ;;  %v9455_v63 = vpop.f32.mrf.mxu2 }
 0x2ea   : > { %v3369_v30 = vand.u32 2147483647, %v9280_v21  ;;  %vm3560_vm6 = vweird.f32 %v9236_v51  ;;  %v3587_v53 = vsub.f32 1.0, %v3586_v13  ;;  %v3341_v20 = vand.u32 2147483648, %v9238_v26  ;;  %vm9422_vm8 = vmor %vm3365_vm5, %vm3366_vm1 }
 0x2eb   : > { %5492 = vpow2.f32 %v4792_v5  ;;  %v2516_v7 = vadd.f32 %v2515_v38, %v7961_v27  ;;  %vm3335_vm9 = vweird.f32 %v9238_v26  ;;  %v3339_v21 = vand.u32 2147483647, %v9238_v26 }
 0x2ec   : > { %v9429_v60 = vadd.f32 1.0, %v5487_v40  ;;  %v3368_v31 = vsel %vm9422_vm8, %v9349_v59, %v3364_v49  ;;  %v3616_v17 = vmul.f32 %v9412_v35, %v9345_v25  ;;  %vm9438_vm11 = vmor %vm3335_vm9, %vm3336_vm4  ;;  %v3372_v3 = vor.u32 1.1754944e-38, %v3371_v22 }
 0x2ed   : > { %5494 = vrcp.f32 %v9407_v9  ;;  %v9443_v26 = vadd.f32 %v2604_v12, %v2516_v7  ;;  %v5491_v34 = vpop.eup %5490  ;;  %v3538_v8 = vsel %vm9374_vm3, %v3537_v32, %v3533_v2  ;;  %v3338_v59 = vsel %vm9438_vm11, %v9287_v43, %v3334_v47  ;;  %v2517_v13 = vpop.f32.mrf.mxu0 }
 0x2ee   : > { %vm3370_vm10 = vcmp.eq.f32.partialorder %v3369_v30, 8.507059e+37  ;;  %v9451_v57 = vadd.f32 %v9357_v28, %v2360_v62  ;;  %v3559_v0 = vadd.f32 %v9297_v56, %v3558_v33  ;;  %vm3561_vm7 = vweird.f32 %v9297_v56  ;;  %v2606_v30 = vpop.f32.mrf.mxu1  ;;  %v2453_v46 = vpop.f32.mrf.mxu3 }
 0x2ef   : > { %v3342_v14 = vor.u32 1.1754944e-38, %v3341_v20  ;;  %v3373_v42 = vsel %vm3370_vm10, %v3372_v3, %v3368_v31  ;;  %v3588_v54 = vmul.f32 %v9362_v36, %v3587_v53  ;;  %vm3340_vm13 = vcmp.eq.f32.partialorder %v3339_v21, 8.507059e+37  ;;  %vm9478_vm0 = vmor %vm3560_vm6, %vm3561_vm7 }
 0x2f0   : > { %5496 = vrcp.f32 %v9429_v60  ;;  %v4794_v44 = vmul.f32 -1.442695, %v9443_v26  ;;  %v3617_v32 = vsub.f32 1.0, %v3616_v17  ;;  %v9460_v28 = vadd.f32 1.0, %v5491_v34 }
 0x2f1   : > { %v5493_v43 = vpop.eup %5492  ;;  %v3343_v2 = vsel %vm3340_vm13, %v3342_v14, %v3338_v59  ;;  %v3937_v33 = vpack.c.bf16 %v9266_v41, %v9260_v15  ;;  %v3886_v49 = vmul.f32 %v3373_v42, %v9193_v58  ;;  %v4811_v45 = vmul.f32 -1.442695, %v9451_v57  ;;  %v9525_v3 = vpop.f32.mrf.mxu2 }
 0x2f2   : > { %v9466_v40 = vadd.f32 1.0, %v5493_v43  ;;  %5498 = vpow2.f32 %v4794_v44  ;;  %vm3591_vm15 = vweird.f32 %v9362_v36  ;;  %v3594_v62 = vand.u32 2147483647, %v9283_v10 }
 0x2f3   : > { %v9468_v22 = vpop.eup %5494  ;;  %v3596_v5 = vand.u32 2147483648, %v9283_v10  ;;  %v2518_v38 = vadd.f32 %v2517_v13, %v7961_v27  ;;  %v3589_v15 = vadd.f32 %v9362_v36, %v3588_v54  ;;  %v3884_v41 = vmul.f32 %v3343_v2, %v9132_v4  ;;  %4136 = vmatmul.bf16.gmra.mxu2 %v3937_v33 }
 0x2f4   : > { %5500 = vrcp.f32 %v9466_v40  ;;  %v2363_v47 = vadd.f32 %v9382_v29, %v7139_v55  ;;  %v3563_v12 = vsel %vm9478_vm0, %v9297_v56, %v3559_v0  ;;  %vm3590_vm12 = vweird.f32 %v9283_v10 }
 0x2f5   : > { %v3618_v53 = vmul.f32 %v9412_v35, %v3617_v32  ;;  %5502 = vrcp.f32 %v9460_v28  ;;  %v3391_v4 = vmul.f32 %v9468_v22, %v9407_v9  ;;  %v9497_v29 = vadd.f32 %v2606_v30, %v2518_v38  ;;  %vm9512_vm3 = vmor %vm3590_vm12, %vm3591_vm15  ;;  %v2520_v32 = vpop.f32.mrf.mxu0 }
 0x2f6   : > { %v9493_v20 = vpop.eup %5496  ;;  %5504 = vpow2.f32 %v4811_v45  ;;  %v3934_v7 = vpack.c.bf16 %v3886_v49, %v3884_v41  ;;  %v9501_v21 = vmul.f32 %v9370_v50, %v9005_v52  ;;  %v9504_v10 = vmul.f32 %v3538_v8, %v9033_v18  ;;  %v2609_v38 = vpop.f32.mrf.mxu1 }
 0x2f7   : > { %vm3565_vm2 = vcmp.eq.f32.partialorder %v3564_v23, 8.507059e+37  ;;  %v3567_v56 = vor.u32 1.1754944e-38, %v3566_v11  ;;  %v3593_v52 = vsel %vm9512_vm3, %v9362_v36, %v3589_v15  ;;  %vm3595_vm14 = vcmp.eq.f32.partialorder %v3594_v62, 8.507059e+37 }
 0x2f8   : > { %v5499_v17 = vpop.eup %5498  ;;  %v3597_v18 = vor.u32 1.1754944e-38, %v3596_v5  ;;  %v9519_v50 = vadd.f32 %v2451_v1, %v2363_v47  ;;  %v3626_v23 = vand.u32 2147483648, %v9345_v25  ;;  %v4796_v11 = vmul.f32 -1.442695, %v9497_v29 }
 0x2f9   : > { %v3568_v61 = vsel %vm3565_vm2, %v3567_v56, %v3563_v12  ;;  %v9522_v51 = vadd.f32 1.0, %v5499_v17  ;;  %v9530_v8 = vadd.f32 %v9412_v35, %v3618_v53  ;;  %vm3621_vm1 = vweird.f32 %v9412_v35  ;;  %4215 = vmatmul.bf16.gmra.mxu3 %v3934_v7 }
 0x2fa   : > { %v9527_v34 = vpop.eup %5500  ;;  %v3624_v36 = vand.u32 2147483647, %v9345_v25  ;;  %v3392_v1 = vsub.f32 1.0, %v3391_v4  ;;  %v3598_v0 = vsel %vm3595_vm14, %v3597_v18, %v3593_v52  ;;  %v3646_v14 = vmul.f32 %v9493_v20, %v9429_v60 }
 0x2fb   : > { %v9534_v59 = vpop.eup %5502  ;;  %v3421_v42 = vmul.f32 %v9527_v34, %v9466_v40  ;;  %5506 = vrcp.f32 %v9522_v51  ;;  %v9542_v44 = vmul.f32 %v3568_v61, %v9093_v19  ;;  %vm3620_vm4 = vweird.f32 %v9345_v25  ;;  %v2369_v61 = vpop.f32.mrf.mxu2 }
 0x2fc   : > { %v5505_v54 = vpop.eup %5504  ;;  %v4813_v43 = vmul.f32 -1.442695, %v9519_v50  ;;  %5508 = vpow2.f32 %v4796_v11  ;;  %vm9548_vm5 = vmor %vm3620_vm4, %vm3621_vm1  ;;  %v3627_v13 = vor.u32 1.1754944e-38, %v3626_v23  ;;  %v2365_v49 = vadd.f32 %v9455_v63, %v7139_v55 }
 0x2fd   : > { %v3422_v33 = vsub.f32 1.0, %v3421_v42  ;;  %v2521_v19 = vadd.f32 %v2520_v32, %v7961_v27  ;;  %v9556_v45 = vmul.f32 %v3598_v0, %v9155_v48  ;;  %v3623_v25 = vsel %vm9548_vm5, %v9412_v35, %v9530_v8  ;;  %v9575_v35 = vpop.f32.mrf.mxu3 }
 0x2fe   : > { %v3656_v62 = vand.u32 2147483648, %v9429_v60  ;;  %v3393_v5 = vmul.f32 %v9468_v22, %v3392_v1  ;;  %vm9564_vm6 = vcmp.eq.f32.partialorder %v3624_v36, 8.507059e+37  ;;  %v3647_v63 = vsub.f32 1.0, %v3646_v14 }
 0x2ff   : > { %v3676_v15 = vmul.f32 %v9534_v59, %v9460_v28  ;;  %v9570_v48 = vadd.f32 1.0, %v5505_v54  ;;  %v3423_v41 = vmul.f32 %v9527_v34, %v3422_v33  ;;  %v3401_v47 = vand.u32 2147483648, %v9407_v9 }
 0x300   : > { %vm3426_vm8 = vweird.f32 %v9527_v34  ;;  %5510 = vpow2.f32 %v4813_v43  ;;  %v3939_v30 = vpack.c.bf16 %v9504_v10, %v9501_v21  ;;  %v3431_v4 = vand.u32 2147483648, %v9466_v40 }
 0x301   : > { %v9579_v12 = vpop.eup %5506  ;;  %v3424_v53 = vadd.f32 %v9527_v34, %v3423_v41  ;;  %v9583_v7 = vadd.f32 %v2453_v46, %v2365_v49  ;;  %v9585_v56 = vadd.f32 %v2609_v38, %v2521_v19  ;;  %v3394_v17 = vadd.f32 %v9468_v22, %v3393_v5  ;;  %v2522_v19 = vpop.f32.mrf.mxu0 }
 0x302   : > { %v5509_v31 = vpop.eup %5508  ;;  %vm3396_vm9 = vweird.f32 %v9468_v22  ;;  %vm3425_vm11 = vweird.f32 %v9466_v40  ;;  %v3429_v52 = vand.u32 2147483647, %v9466_v40  ;;  %v3677_v21 = vsub.f32 1.0, %v3676_v15  ;;  %v2611_v5 = vpop.f32.mrf.mxu1 }
 0x303   : > { %5512 = vrcp.f32 %v9570_v48  ;;  %vm9594_vm10 = vmor %vm3425_vm11, %vm3426_vm8  ;;  %v9598_v46 = vadd.f32 1.0, %v5509_v31  ;;  %v4798_v18 = vmul.f32 -1.442695, %v9585_v56  ;;  %vm3395_vm7 = vweird.f32 %v9407_v9  ;;  %4141 = vmatmul.bf16.gmra.mxu2 %v3939_v30  ;;  %v4092_v10 = vpop.f32.mrf.mxu2 }
 0x304   : > { %v3399_v23 = vand.u32 2147483647, %v9407_v9  ;;  %v3428_v40 = vsel %vm9594_vm10, %v9527_v34, %v3424_v53  ;;  %v3451_v11 = vmul.f32 %v9579_v12, %v9522_v51  ;;  %v3686_v8 = vand.u32 2147483648, %v9460_v28  ;;  %vm9611_vm13 = vmor %vm3395_vm7, %vm3396_vm9 }
 0x305   : > { %v3432_v1 = vor.u32 1.1754944e-38, %v3431_v4  ;;  %v4815_v0 = vmul.f32 -1.442695, %v9583_v7  ;;  %5514 = vrcp.f32 %v9598_v46  ;;  %v3648_v34 = vmul.f32 %v9493_v20, %v3647_v63 }
 0x306   : > { %v5511_v9 = vpop.eup %5510  ;;  %v3398_v14 = vsel %vm9611_vm13, %v9468_v22, %v3394_v17  ;;  %vm3430_vm15 = vcmp.eq.f32.partialorder %v3429_v52, 8.507059e+37  ;;  %5516 = vpow2.f32 %v4798_v18  ;;  %v3654_v42 = vand.u32 2147483647, %v9429_v60 }
 0x307   : > { %v3678_v54 = vmul.f32 %v9534_v59, %v3677_v21  ;;  %v3402_v43 = vor.u32 1.1754944e-38, %v3401_v47  ;;  %v3433_v32 = vsel %vm3430_vm15, %v3432_v1, %v3428_v40  ;;  %v9625_v2 = vsel %vm9564_vm6, %v3627_v13, %v3623_v25 }
 0x308   : > { %v9627_v33 = vor.u32 1.1754944e-38, %v3656_v62  ;;  %vm3400_vm0 = vcmp.eq.f32.partialorder %v3399_v23, 8.507059e+37  ;;  %v3452_v49 = vsub.f32 1.0, %v3451_v11  ;;  %vm3651_vm12 = vweird.f32 %v9493_v20  ;;  %v2458_v62 = vpop.f32.mrf.mxu3 }
 0x309   : > { %v9629_v38 = vpop.eup %5512  ;;  %v3684_v22 = vand.u32 2147483647, %v9460_v28  ;;  %v3403_v63 = vsel %vm3400_vm0, %v3402_v43, %v3398_v14  ;;  %v9633_v15 = vadd.f32 1.0, %v5511_v9  ;;  %5518 = vpow2.f32 %v4815_v0 }
 0x30a   : > { %v9636_v58 = vadd.f32 %v9493_v20, %v3648_v34  ;;  %v9638_v13 = vor.u32 1.1754944e-38, %v3686_v8  ;;  %v3890_v25 = vmul.f32 %v3433_v32, %v9402_v16  ;;  %v2523_v41 = vadd.f32 %v2522_v19, %v7961_v27  ;;  %v2525_v34 = vpop.f32.mrf.mxu0  ;;  %v2614_v14 = vpop.f32.mrf.mxu1 }
 0x30b   : > { %v9642_v47 = vpop.eup %5514  ;;  %vm3650_vm2 = vweird.f32 %v9429_v60  ;;  %v9646_v30 = vadd.f32 %v9534_v59, %v3678_v54  ;;  %vm3681_vm3 = vweird.f32 %v9534_v59  ;;  %v2370_v53 = vadd.f32 %v2369_v61, %v7139_v55 }
 0x30c   : > { %v3941_v4 = vpack.c.bf16 %v9556_v45, %v9542_v44  ;;  %v5517_v31 = vpop.eup %5516  ;;  %vm3680_vm14 = vweird.f32 %v9460_v28  ;;  %v3888_v16 = vmul.f32 %v3403_v63, %v9276_v37  ;;  %v9656_v17 = vmul.f32 %v9629_v38, %v9570_v48  ;;  %v9670_v37 = vld [vmem:[%s10217_s6] ss:$0 sm:$0xff]  ;;  %vm9724_vm7 = vmor %vm3650_vm2, %vm3651_vm12 }
 0x30d   : > { %v3453_v52 = vmul.f32 %v9579_v12, %v3452_v49  ;;  %v3481_v21 = vmul.f32 %v9642_v47, %v9598_v46  ;;  %5520 = vrcp.f32 %v9633_v15  ;;  %vm3455_vm1 = vweird.f32 %v9522_v51  ;;  %vm9745_vm15 = vmor %vm3680_vm14, %vm3681_vm3 }
 0x30e   : > { %v2368_v44 = vadd.f32 %v9525_v3, %v7139_v55  ;;  %v9665_v45 = vadd.f32 1.0, %v5517_v31  ;;  %v3491_v61 = vand.u32 2147483648, %v9598_v46  ;;  %v9673_v23 = vadd.f32 %v2611_v5, %v2523_v41 }
 0x30f   : > { %v3482_v18 = vsub.f32 1.0, %v3481_v21  ;;  %v3936_v40 = vpack.c.bf16 %v3890_v25, %v3888_v16  ;;  %v5519_v11 = vpop.eup %5518  ;;  %vm3456_vm4 = vweird.f32 %v9579_v12  ;;  %v3459_v8 = vand.u32 2147483647, %v9522_v51 }
 0x310   : > { %5522 = vrcp.f32 %v9665_v45  ;;  %v9678_v55 = vadd.f32 %v2458_v62, %v2370_v53  ;;  %vm9681_vm5 = vcmp.eq.f32.partialorder %v3654_v42, 8.507059e+37  ;;  %vm9685_vm6 = vcmp.eq.f32.partialorder %v3684_v22, 8.507059e+37  ;;  %vm9701_vm9 = vmor %vm3455_vm1, %vm3456_vm4  ;;  %v4181_v63 = vpop.f32.mrf.mxu3 }
 0x311   : > { %v3454_v1 = vadd.f32 %v9579_v12, %v3453_v52  ;;  %v3483_v0 = vmul.f32 %v9642_v47, %v3482_v18  ;;  %vm3486_vm8 = vweird.f32 %v9642_v47  ;;  %v3489_v9 = vand.u32 2147483647, %v9598_v46  ;;  %4220 = vmatmul.bf16.gmra.mxu3 %v3936_v40 }
 0x312   : > { %v3461_v42 = vand.u32 2147483648, %v9522_v51  ;;  %v4800_v54 = vmul.f32 -1.442695, %v9673_v23  ;;  %v4093_v43 = vadd.f32 %v9670_v37, %v4092_v10  ;;  %v2526_v32 = vadd.f32 %v2525_v34, %v7961_v27 }
 0x313   : > { %v9705_v19 = vadd.f32 1.0, %v5519_v11  ;;  %v3484_v5 = vadd.f32 %v9642_v47, %v3483_v0  ;;  %vm3485_vm11 = vweird.f32 %v9598_v46  ;;  %v3492_v22 = vor.u32 1.1754944e-38, %v3491_v61  ;;  %v9709_v25 = vpop.eup %5520  ;;  %4146 = vmatmul.bf16.gmra.mxu2 %v3941_v4  ;;  %v4094_v4 = vpop.f32.mrf.mxu2 }
 0x314   : > { %vm9713_vm10 = vmor %vm3485_vm11, %vm3486_vm8  ;;  %v4819_v51 = vmul.f32 -1.442695, %v9678_v55  ;;  %5524 = vpow2.f32 %v4800_v54  ;;  %v9718_v41 = vadd.f32 %v2614_v14, %v2526_v32  ;;  %v4182_v53 = vadd.f32 %v4181_v63, %v4093_v43 }
 0x315   : > { %v3707_v31 = vsub.f32 1.0, %v9656_v17  ;;  %v3458_v16 = vsel %vm9701_vm9, %v9579_v12, %v3454_v1  ;;  %v3488_v52 = vsel %vm9713_vm10, %v9642_v47, %v3484_v5  ;;  %vm3490_vm13 = vcmp.eq.f32.partialorder %v3489_v9, 8.507059e+37 }
 0x316   : > { %v9735_v21 = vpop.eup %5522  ;;  %v3653_v60 = vsel %vm9724_vm7, %v9493_v20, %v9636_v58  ;;  %v3462_v12 = vor.u32 1.1754944e-38, %v3461_v42  ;;  %v3493_v10 = vsel %vm3490_vm13, %v3492_v22, %v3488_v52  ;;  %v4802_v47 = vmul.f32 -1.442695, %v9718_v41  ;;  %4261 = vst [vmem:[%s9752_s11] sm:$0xff] %v4182_v53 }
 0x317   : > { %v3683_v20 = vsel %vm9745_vm15, %v9534_v59, %v9646_v30  ;;  %vm3460_vm0 = vcmp.eq.f32.partialorder %v3459_v8, 8.507059e+37  ;;  %5526 = vrcp.f32 %v9705_v19  ;;  %v3511_v28 = vmul.f32 %v9735_v21, %v9665_v45  ;;  %v2527_v30 = vpop.f32.mrf.mxu0  ;;  %v2616_v8 = vpop.f32.mrf.mxu1 }
 0x318   : > { %v3736_v58 = vmul.f32 %v9709_v25, %v9633_v15  ;;  %v3463_v18 = vsel %vm3460_vm0, %v3462_v12, %v3458_v16  ;;  %v9765_v61 = vadd.f32 %v9575_v35, %v2368_v44  ;;  %5528 = vpow2.f32 %v4819_v51  ;;  %v4183_v54 = vpop.f32.mrf.mxu3 }
 0x319   : > { %v3708_v40 = vmul.f32 %v9629_v38, %v3707_v31  ;;  %v3894_v11 = vmul.f32 %v3493_v10, %v9497_v29  ;;  %5530 = vpow2.f32 %v4802_v47  ;;  %v4095_v59 = vadd.f32 %v9670_v37, %v4094_v4 }
 0x31a   : > { %v5525_v1 = vpop.eup %5524  ;;  %v3658_v0 = vsel %vm9681_vm5, %v9627_v33, %v3653_v60  ;;  %v3688_v35 = vsel %vm9685_vm6, %v9638_v13, %v3683_v20  ;;  %v3714_v44 = vand.u32 2147483647, %v9570_v48  ;;  %v2528_v9 = vadd.f32 %v2527_v30, %v7961_v27 }
 0x31b   : > { %v3716_v29 = vand.u32 2147483648, %v9570_v48  ;;  %v3892_v34 = vmul.f32 %v3463_v18, %v9443_v26  ;;  %v3512_v14 = vsub.f32 1.0, %v3511_v28  ;;  %v9780_v42 = vadd.f32 1.0, %v5525_v1  ;;  %v4097_v51 = vpop.f32.mrf.mxu2 }
 0x31c   : > { %v3737_v43 = vsub.f32 1.0, %v3736_v58  ;;  %v4817_v33 = vmul.f32 -1.442695, %v9765_v61  ;;  %v9783_v3 = vadd.f32 %v2616_v8, %v2528_v9  ;;  %v4184_v36 = vadd.f32 %v4183_v54, %v4095_v59 }
 0x31d   : > { %v9785_v13 = vpop.eup %5526  ;;  %v3709_v32 = vadd.f32 %v9629_v38, %v3708_v40  ;;  %vm3711_vm12 = vweird.f32 %v9629_v38  ;;  %5532 = vrcp.f32 %v9780_v42  ;;  %v3938_v26 = vpack.c.bf16 %v3894_v11, %v3892_v34 }
 0x31e   : > { %v5529_v49 = vpop.eup %5528  ;;  %v3903_v5 = vmul.f32 %v9625_v2, %v9210_v24  ;;  %v3905_v22 = vmul.f32 %v3658_v0, %v9292_v39  ;;  %v3746_v63 = vand.u32 2147483648, %v9633_v15  ;;  %v4804_v62 = vmul.f32 -1.442695, %v9783_v3  ;;  %4262 = vst [vmem:[%s9752_s11 + $0x8] sm:$0xff] %v4184_v36 }
 0x31f   : > { %v5531_v53 = vpop.eup %5530  ;;  %v9797_v46 = vmul.f32 %v3688_v35, %v9347_v6  ;;  %vm3710_vm2 = vweird.f32 %v9570_v48  ;;  %vm9800_vm3 = vcmp.eq.f32.partialorder %v3714_v44, 8.507059e+37  ;;  %v3513_v24 = vmul.f32 %v9735_v21, %v3512_v14  ;;  %v2530_v17 = vpop.f32.mrf.mxu0 }
 0x320   : > { %vm9807_vm14 = vmor %vm3710_vm2, %vm3711_vm12  ;;  %v3717_v2 = vor.u32 1.1754944e-38, %v3716_v29  ;;  %v3738_v16 = vmul.f32 %v9709_v25, %v3737_v43  ;;  %5534 = vpow2.f32 %v4817_v33  ;;  %v9812_v6 = vadd.f32 1.0, %v5531_v53  ;;  %v2619_v12 = vpop.f32.mrf.mxu1  ;;  %v4186_v58 = vpop.f32.mrf.mxu3 }
 0x321   : > { %v3713_v48 = vsel %vm9807_vm14, %v9629_v38, %v3709_v32  ;;  %v3744_v52 = vand.u32 2147483647, %v9633_v15  ;;  %5536 = vpow2.f32 %v4804_v62  ;;  %4225 = vmatmul.bf16.gmra.mxu3 %v3938_v26  ;;  %v4098_v60 = vadd.f32 %v9670_v37, %v4097_v51 }
 0x322   : > { %v9819_v10 = vor.u32 1.1754944e-38, %v3746_v63  ;;  %v3766_v47 = vmul.f32 %v9785_v13, %v9705_v19  ;;  %v9823_v4 = vadd.f32 1.0, %v5529_v49  ;;  %5538 = vrcp.f32 %v9812_v6 }
 0x323   : > { %v5533_v20 = vpop.eup %5532  ;;  %v3514_v38 = vadd.f32 %v9735_v21, %v3513_v24  ;;  %vm3516_vm1 = vweird.f32 %v9735_v21  ;;  %v2531_v28 = vadd.f32 %v2530_v17, %v7961_v27  ;;  %v3943_v18 = vpack.c.bf16 %v3905_v22, %v3903_v5  ;;  %v4099_v34 = vpop.f32.mrf.mxu2 }
 0x324   : > { %v3718_v40 = vsel %vm9800_vm3, %v3717_v2, %v3713_v48  ;;  %v9832_v11 = vadd.f32 %v9709_v25, %v3738_v16  ;;  %vm3741_vm4 = vweird.f32 %v9709_v25  ;;  %v3541_v59 = vmul.f32 %v5533_v20, %v9780_v42 }
 0x325   : > { %vm3740_vm5 = vweird.f32 %v9633_v15  ;;  %vm3515_vm6 = vweird.f32 %v9665_v45  ;;  %v3521_v30 = vand.u32 2147483648, %v9665_v45  ;;  %v9839_v8 = vadd.f32 %v2619_v12, %v2531_v28  ;;  %4151 = vmatmul.bf16.gmra.mxu2 %v3943_v18 }
 0x326   : > { %v4187_v1 = vadd.f32 %v4186_v58, %v4098_v60  ;;  %v5535_v0 = vpop.eup %5534  ;;  %v3767_v35 = vsub.f32 1.0, %v3766_v47  ;;  %vm9843_vm8 = vmor %vm3515_vm6, %vm3516_vm1  ;;  %v3519_v9 = vand.u32 2147483647, %v9665_v45  ;;  %5540 = vrcp.f32 %v9823_v4 }
 0x327   : > { %v3542_v29 = vsub.f32 1.0, %v3541_v59  ;;  %v5537_v14 = vpop.eup %5536  ;;  %v3518_v54 = vsel %vm9843_vm8, %v9735_v21, %v3514_v38  ;;  %v3549_v43 = vand.u32 2147483647, %v9780_v42  ;;  %v3551_v33 = vand.u32 2147483648, %v9780_v42  ;;  %v2532_v63 = vpop.f32.mrf.mxu0  ;;  %vm9879_vm15 = vmor %vm3740_vm5, %vm3741_vm4 }
 0x328   : > { %v4806_v36 = vmul.f32 -1.442695, %v9839_v8  ;;  %4263 = vst [vmem:[%s9752_s11 + $0x10] sm:$0xff] %v4187_v1  ;;  %v9856_v32 = vpop.eup %5538  ;;  %vm3546_vm9 = vweird.f32 %v5533_v20  ;;  %v9858_v45 = vadd.f32 1.0, %v5537_v14  ;;  %v4100_v49 = vadd.f32 %v9670_v37, %v4099_v34  ;;  %v2621_v62 = vpop.f32.mrf.mxu1 }
 0x329   : > { %v3543_v26 = vmul.f32 %v5533_v20, %v3542_v29  ;;  %v9861_v5 = vadd.f32 1.0, %v5535_v0  ;;  %v3522_v22 = vor.u32 1.1754944e-38, %v3521_v30  ;;  %v3571_v21 = vmul.f32 %v9856_v32, %v9812_v6  ;;  %v4188_v2 = vpop.f32.mrf.mxu3 }
 0x32a   : > { %5542 = vpow2.f32 %v4806_v36  ;;  %vm3520_vm11 = vcmp.eq.f32.partialorder %v3519_v9, 8.507059e+37  ;;  %vm3545_vm10 = vweird.f32 %v9780_v42  ;;  %v3552_v31 = vor.u32 1.1754944e-38, %v3551_v33 }
 0x32b   : > { %v3544_v51 = vadd.f32 %v5533_v20, %v3543_v26  ;;  %5544 = vrcp.f32 %v9858_v45  ;;  %v3523_v53 = vsel %vm3520_vm11, %v3522_v22, %v3518_v54  ;;  %vm3547_vm7 = vmor %vm3545_vm10, %vm3546_vm9  ;;  %v3572_v24 = vsub.f32 1.0, %v3571_v21  ;;  %v4102_v58 = vpop.f32.mrf.mxu2 }
 0x32c   : > { %v2533_v39 = vadd.f32 %v2532_v63, %v7961_v27  ;;  %v9868_v16 = vpop.eup %5540  ;;  %v3909_v48 = vmul.f32 %v3718_v40, %v9451_v57  ;;  %vm3550_vm13 = vcmp.eq.f32.partialorder %v3549_v43, 8.507059e+37  ;;  %v4189_v17 = vadd.f32 %v4188_v2, %v4100_v49 }
 0x32d   : > { %v3548_v60 = vsel %vm3547_vm7, %v5533_v20, %v3544_v51  ;;  %v3768_v12 = vmul.f32 %v9785_v13, %v3767_v35  ;;  %5546 = vrcp.f32 %v9861_v5  ;;  %vm3770_vm0 = vweird.f32 %v9705_v19 }
 0x32e   : > { %v3553_v42 = vsel %vm3550_vm13, %v3552_v31, %v3548_v60  ;;  %v9873_v47 = vadd.f32 %v2621_v62, %v2533_v39  ;;  %v3896_v57 = vmul.f32 %v3523_v53, %v9585_v56  ;;  %v3573_v28 = vmul.f32 %v9856_v32, %v3572_v24  ;;  %4264 = vst [vmem:[%s9752_s11 + $0x18] sm:$0xff] %v4189_v17 }
 0x32f   : > { %v3898_v20 = vmul.f32 %v3553_v42, %v9673_v23  ;;  %v3743_v40 = vsel %vm9879_vm15, %v9709_v25, %v9832_v11  ;;  %v3774_v59 = vand.u32 2147483647, %v9705_v19  ;;  %v3776_v30 = vand.u32 2147483648, %v9705_v19  ;;  %v2535_v14 = vpop.f32.mrf.mxu0 }
 0x330   : > { %v5543_v18 = vpop.eup %5542  ;;  %v4808_v1 = vmul.f32 -1.442695, %v9873_v47  ;;  %vm3771_vm12 = vweird.f32 %v9785_v13  ;;  %v4103_v35 = vadd.f32 %v9670_v37, %v4102_v58  ;;  %vm9901_vm2 = vcmp.eq.f32.partialorder %v3744_v52, 8.507059e+37  ;;  %v2624_v54 = vpop.f32.mrf.mxu1 }
 0x331   : > { %v5545_v0 = vpop.eup %5544  ;;  %v9896_v56 = vadd.f32 1.0, %v5543_v18  ;;  %v3940_v23 = vpack.c.bf16 %v3898_v20, %v3896_v57  ;;  %v9906_v9 = vadd.f32 %v9785_v13, %v3768_v12  ;;  %v9910_v29 = vmul.f32 %v9868_v16, %v9823_v4  ;;  %v4191_v22 = vpop.f32.mrf.mxu3  ;;  %vm9930_vm1 = vmor %vm3770_vm0, %vm3771_vm12 }
 0x332   : > { %v3601_v34 = vmul.f32 %v5545_v0, %v9858_v45  ;;  %5548 = vpow2.f32 %v4808_v1  ;;  %v3574_v43 = vadd.f32 %v9856_v32, %v3573_v28  ;;  %vm3576_vm3 = vweird.f32 %v9856_v32 }
 0x333   : > { %v3579_v15 = vand.u32 2147483647, %v9812_v6  ;;  %5550 = vrcp.f32 %v9896_v56  ;;  %4230 = vmatmul.bf16.gmra.mxu3 %v3940_v23  ;;  %v9917_v52 = vpop.eup %5546  ;;  %vm9919_vm14 = vcmp.eq.f32.partialorder %v3774_v59, 8.507059e+37  ;;  %v3581_v36 = vand.u32 2147483648, %v9812_v6  ;;  %v4104_v2 = vpop.f32.mrf.mxu2 }
 0x334   : > { %v3602_v26 = vsub.f32 1.0, %v3601_v34  ;;  %v2536_v49 = vadd.f32 %v2535_v14, %v7961_v27  ;;  %v3945_v21 = vpack.c.bf16 %v3909_v48, %v9797_v46  ;;  %vm3575_vm4 = vweird.f32 %v9812_v6 }
 0x335   : > { %v3609_v62 = vand.u32 2147483647, %v9858_v45  ;;  %v3611_v51 = vand.u32 2147483648, %v9858_v45  ;;  %v4192_v53 = vadd.f32 %v4191_v22, %v4103_v35  ;;  %v3773_v46 = vsel %vm9930_vm1, %v9785_v13, %v9906_v9  ;;  %vm9943_vm5 = vmor %vm3575_vm4, %vm3576_vm3 }
 0x336   : > { %v3603_v31 = vmul.f32 %v5545_v0, %v3602_v26  ;;  %vm3606_vm6 = vweird.f32 %v5545_v0  ;;  %v9947_v24 = vadd.f32 %v2624_v54, %v2536_v49  ;;  %4156 = vmatmul.bf16.gmra.mxu2 %v3945_v21  ;;  %v3796_v6 = vmul.f32 %v9917_v52, %v9861_v5 }
 0x337   : > { %v3827_v39 = vsub.f32 1.0, %v9910_v29  ;;  %v3578_v13 = vsel %vm9943_vm5, %v9856_v32, %v3574_v43  ;;  %vm3580_vm8 = vcmp.eq.f32.partialorder %v3579_v15, 8.507059e+37  ;;  %4265 = vst [vmem:[%s9752_s11 + $0x20] sm:$0xff] %v4192_v53  ;;  %v3582_v60 = vor.u32 1.1754944e-38, %v3581_v36  ;;  %v2537_v59 = vpop.f32.mrf.mxu0 }
 0x338   : > { %v5549_v48 = vpop.eup %5548  ;;  %v3604_v17 = vadd.f32 %v5545_v0, %v3603_v31  ;;  %vm3605_vm9 = vweird.f32 %v9858_v45  ;;  %v4810_v12 = vmul.f32 -1.442695, %v9947_v24  ;;  %vm3610_vm10 = vcmp.eq.f32.partialorder %v3609_v62, 8.507059e+37  ;;  %v2626_v45 = vpop.f32.mrf.mxu1 }
 0x339   : > { %v9958_v42 = vpop.eup %5550  ;;  %vm3607_vm11 = vmor %vm3605_vm9, %vm3606_vm6  ;;  %v3612_v57 = vor.u32 1.1754944e-38, %v3611_v51  ;;  %v9961_v20 = vadd.f32 1.0, %v5549_v48  ;;  %v4105_v32 = vadd.f32 %v9670_v37, %v4104_v2  ;;  %v3583_v28 = vsel %vm3580_vm8, %v3582_v60, %v3578_v13  ;;  %v4193_v14 = vpop.f32.mrf.mxu3 }
 0x33a   : > { %v3608_v58 = vsel %vm3607_vm11, %v5545_v0, %v3604_v17  ;;  %v3631_v18 = vmul.f32 %v9958_v42, %v9896_v56  ;;  %5552 = vpow2.f32 %v4810_v12  ;;  %v3748_v1 = vsel %vm9901_vm2, %v9819_v10, %v3743_v40 }
 0x33b   : > { %v3777_v23 = vor.u32 1.1754944e-38, %v3776_v30  ;;  %v3613_v35 = vsel %vm3610_vm10, %v3612_v57, %v3608_v58  ;;  %5554 = vrcp.f32 %v9961_v20  ;;  %v3797_v0 = vsub.f32 1.0, %v3796_v6  ;;  %v4107_v15 = vpop.f32.mrf.mxu2 }
 0x33c   : > { %v3902_v9 = vmul.f32 %v3613_v35, %v9783_v3  ;;  %v3632_v29 = vsub.f32 1.0, %v3631_v18  ;;  %v2538_v34 = vadd.f32 %v2537_v59, %v7961_v27  ;;  %v3900_v25 = vmul.f32 %v3583_v28, %v9718_v41 }
 0x33d   : > { %v3778_v38 = vsel %vm9919_vm14, %v3777_v23, %v3773_v46  ;;  %v4194_v11 = vadd.f32 %v4193_v14, %v4105_v32  ;;  %v3911_v10 = vmul.f32 %v3748_v1, %v9519_v50  ;;  %v3828_v40 = vmul.f32 %v9868_v16, %v3827_v39 }
 0x33e   : > { %v9982_v30 = vadd.f32 %v2626_v45, %v2538_v34  ;;  %v3804_v44 = vand.u32 2147483647, %v9861_v5  ;;  %v3806_v3 = vand.u32 2147483648, %v9861_v5  ;;  %v3633_v54 = vmul.f32 %v9958_v42, %v3632_v29 }
 0x33f   : > { %4266 = vst [vmem:[%s9752_s11 + $0x28] sm:$0xff] %v4194_v11  ;;  %v3942_v43 = vpack.c.bf16 %v3902_v9, %v3900_v25  ;;  %v3913_v36 = vmul.f32 %v3778_v38, %v9583_v7  ;;  %v3798_v41 = vmul.f32 %v9917_v52, %v3797_v0  ;;  %vm3801_vm7 = vweird.f32 %v9917_v52  ;;  %v2540_v62 = vpop.f32.mrf.mxu0 }
 0x340   : > { %v5553_v33 = vpop.eup %5552  ;;  %v4812_v50 = vmul.f32 -1.442695, %v9982_v30  ;;  %vm3830_vm13 = vweird.f32 %v9823_v4  ;;  %v3834_v49 = vand.u32 2147483647, %v9823_v4  ;;  %v4108_v21 = vadd.f32 %v9670_v37, %v4107_v15  ;;  %v2629_v51 = vpop.f32.mrf.mxu1 }
 0x341   : > { %v5555_v26 = vpop.eup %5554  ;;  %v9994_v22 = vadd.f32 1.0, %v5553_v33  ;;  %vm3800_vm15 = vweird.f32 %v9861_v5  ;;  %v9999_v63 = vadd.f32 %v9868_v16, %v3828_v40  ;;  %vm3831_vm0 = vweird.f32 %v9868_v16  ;;  %v4196_v39 = vpop.f32.mrf.mxu3 }
 0x342   : > { %v3661_v7 = vmul.f32 %v5555_v26, %v9961_v20  ;;  %5556 = vpow2.f32 %v4812_v50  ;;  %v3634_v53 = vadd.f32 %v9958_v42, %v3633_v54  ;;  %vm3636_vm12 = vweird.f32 %v9958_v42  ;;  %vm10013_vm2 = vmor %vm3830_vm13, %vm3831_vm0 }
 0x343   : > { %v3639_v46 = vand.u32 2147483647, %v9896_v56  ;;  %5558 = vrcp.f32 %v9994_v22  ;;  %4235 = vmatmul.bf16.gmra.mxu3 %v3942_v43  ;;  %v3641_v19 = vand.u32 2147483648, %v9896_v56  ;;  %v2541_v6 = vadd.f32 %v2540_v62, %v7961_v27  ;;  %v4109_v18 = vpop.f32.mrf.mxu2  ;;  %vm10052_vm9 = vmor %vm3800_vm15, %vm3801_vm7 }
 0x344   : > { %v3662_v31 = vsub.f32 1.0, %v3661_v7  ;;  %v3947_v13 = vpack.c.bf16 %v3913_v36, %v3911_v10  ;;  %vm3635_vm3 = vweird.f32 %v9896_v56  ;;  %v3669_v48 = vand.u32 2147483647, %v9961_v20 }
 0x345   : > { %v3671_v60 = vand.u32 2147483648, %v9961_v20  ;;  %v4197_v17 = vadd.f32 %v4196_v39, %v4108_v21  ;;  %v3836_v12 = vand.u32 2147483648, %v9823_v4  ;;  %vm10023_vm14 = vmor %vm3635_vm3, %vm3636_vm12  ;;  %vm3666_vm1 = vweird.f32 %v5555_v26 }
 0x346   : > { %v3663_v32 = vmul.f32 %v5555_v26, %v3662_v31  ;;  %v10027_v28 = vadd.f32 %v2629_v51, %v2541_v6  ;;  %4161 = vmatmul.bf16.gmra.mxu2 %v3947_v13  ;;  %v3799_v56 = vadd.f32 %v9917_v52, %v3798_v41  ;;  %v3833_v58 = vsel %vm10013_vm2, %v9868_v16, %v9999_v63 }
 0x347   : > { %v3638_v4 = vsel %vm10023_vm14, %v9958_v42, %v3634_v53  ;;  %vm3640_vm4 = vcmp.eq.f32.partialorder %v3639_v46, 8.507059e+37  ;;  %4267 = vst [vmem:[%s9752_s11 + $0x30] sm:$0xff] %v4197_v17  ;;  %v3642_v45 = vor.u32 1.1754944e-38, %v3641_v19  ;;  %vm3665_vm5 = vweird.f32 %v9961_v20  ;;  %v2542_v14 = vpop.f32.mrf.mxu0 }
 0x348   : > { %v5557_v59 = vpop.eup %5556  ;;  %v3664_v1 = vadd.f32 %v5555_v26, %v3663_v32  ;;  %v4814_v23 = vmul.f32 -1.442695, %v10027_v28  ;;  %vm3667_vm6 = vmor %vm3665_vm5, %vm3666_vm1  ;;  %vm3670_vm8 = vcmp.eq.f32.partialorder %v3669_v48, 8.507059e+37  ;;  %v3672_v16 = vor.u32 1.1754944e-38, %v3671_v60  ;;  %v2631_v20 = vpop.f32.mrf.mxu1 }
 0x349   : > { %v10040_v35 = vpop.eup %5558  ;;  %v10043_v0 = vadd.f32 1.0, %v5557_v59  ;;  %v4110_v42 = vadd.f32 %v9670_v37, %v4109_v18  ;;  %v3643_v9 = vsel %vm3640_vm4, %v3642_v45, %v3638_v4  ;;  %vm3835_vm11 = vcmp.eq.f32.partialorder %v3834_v49, 8.507059e+37  ;;  %v4198_v15 = vpop.f32.mrf.mxu3 }
 0x34a   : > { %v3668_v29 = vsel %vm3667_vm6, %v5555_v26, %v3664_v1  ;;  %v3691_v34 = vmul.f32 %v10040_v35, %v9994_v22  ;;  %5560 = vpow2.f32 %v4814_v23  ;;  %v3837_v25 = vor.u32 1.1754944e-38, %v3836_v12 }
 0x34b   : > { %v3673_v11 = vsel %vm3670_vm8, %v3672_v16, %v3668_v29  ;;  %5562 = vrcp.f32 %v10043_v0  ;;  %v3803_v10 = vsel %vm10052_vm9, %v9917_v52, %v3799_v56  ;;  %v2543_v43 = vadd.f32 %v2542_v14, %v7961_v27  ;;  %v4112_v21 = vpop.f32.mrf.mxu2 }
 0x34c   : > { %v3906_v40 = vmul.f32 %v3673_v11, %v9873_v47  ;;  %v3692_v54 = vsub.f32 1.0, %v3691_v34  ;;  %v3807_v33 = vor.u32 1.1754944e-38, %v3806_v3  ;;  %v3838_v36 = vsel %vm3835_vm11, %v3837_v25, %v3833_v58 }
 0x34d   : > { %v3904_v41 = vmul.f32 %v3643_v9, %v9839_v8  ;;  %v4199_v50 = vadd.f32 %v4198_v15, %v4110_v42  ;;  %vm3805_vm10 = vcmp.eq.f32.partialorder %v3804_v44, 8.507059e+37  ;;  %v10067_v26 = vadd.f32 %v2631_v20, %v2543_v43 }
 0x34e   : > { %v3808_v49 = vsel %vm3805_vm10, %v3807_v33, %v3803_v10  ;;  %v3693_v52 = vmul.f32 %v10040_v35, %v3692_v54  ;;  %v3917_v7 = vmul.f32 %v3838_v36, %v9678_v55  ;;  %v4113_v8 = vadd.f32 %v9670_v37, %v4112_v21 }
 0x34f   : > { %4268 = vst [vmem:[%s9752_s11 + $0x38] sm:$0xff] %v4199_v50  ;;  %v3944_v47 = vpack.c.bf16 %v3906_v40, %v3904_v41  ;;  %v4816_v3 = vmul.f32 -1.442695, %v10067_v26  ;;  %v3915_v5 = vmul.f32 %v3808_v49, %v9765_v61  ;;  %v2545_v53 = vpop.f32.mrf.mxu0  ;;  %vm3696_vm7 = vweird.f32 %v10040_v35 }
 0x350   : > { %v5561_v63 = vpop.eup %5560  ;;  %v3694_v46 = vadd.f32 %v10040_v35, %v3693_v52  ;;  %v3699_v19 = vand.u32 2147483647, %v9994_v22  ;;  %v2634_v55 = vpop.f32.mrf.mxu1  ;;  %v3701_v31 = vand.u32 2147483648, %v9994_v22  ;;  %v2546_v61 = vadd.f32 %v2545_v53, %v7961_v27 }
 0x351   : > { %v5563_v62 = vpop.eup %5562  ;;  %v10073_v51 = vadd.f32 1.0, %v5561_v63  ;;  %5564 = vpow2.f32 %v4816_v3  ;;  %v4201_v39 = vpop.f32.mrf.mxu3  ;;  %v3949_v13 = vpack.c.bf16 %v3917_v7, %v3915_v5  ;;  %vm3695_vm13 = vweird.f32 %v9994_v22  ;;  %v10145_v7 = vld [vmem:[%s10217_s6] ss:$0 sm:$0xff] }
 0x352   : > { %v3721_v44 = vmul.f32 %v5563_v62, %v10043_v0  ;;  %v3729_v2 = vand.u32 2147483647, %v10043_v0  ;;  %v3731_v48 = vand.u32 2147483648, %v10043_v0  ;;  %v4202_v60 = vadd.f32 %v4201_v39, %v4113_v8  ;;  %vm10087_vm15 = vmor %vm3695_vm13, %vm3696_vm7 }
 0x353   : > { %5566 = vrcp.f32 %v10073_v51  ;;  %4240 = vmatmul.bf16.gmra.mxu3 %v3944_v47  ;;  %vm3726_vm0 = vweird.f32 %v5563_v62  ;;  %v10091_v57 = vadd.f32 %v2634_v55, %v2546_v61  ;;  %v3698_v32 = vsel %vm10087_vm15, %v10040_v35, %v3694_v46  ;;  %v4114_v22 = vpop.f32.mrf.mxu2 }
 0x354   : > { %v3722_v6 = vsub.f32 1.0, %v3721_v44  ;;  %vm3700_vm12 = vcmp.eq.f32.partialorder %v3699_v19, 8.507059e+37  ;;  %4269 = vst [vmem:[%s9752_s11 + $0x40] sm:$0xff] %v4202_v60  ;;  %v3702_v58 = vor.u32 1.1754944e-38, %v3701_v31  ;;  %vm3725_vm2 = vweird.f32 %v10043_v0 }
 0x355   : > { %v4818_v18 = vmul.f32 -1.442695, %v10091_v57  ;;  %vm3727_vm3 = vmor %vm3725_vm2, %vm3726_vm0  ;;  %vm3730_vm14 = vcmp.eq.f32.partialorder %v3729_v2, 8.507059e+37  ;;  %v3732_v45 = vor.u32 1.1754944e-38, %v3731_v48  ;;  %v4115_v23 = vadd.f32 %v9670_v37, %v4114_v22 }
 0x356   : > { %v3723_v12 = vmul.f32 %v5563_v62, %v3722_v6  ;;  %4166 = vmatmul.bf16.gmra.mxu2 %v3949_v13  ;;  %v3703_v16 = vsel %vm3700_vm12, %v3702_v58, %v3698_v32  ;;  %vm3755_vm4 = vweird.f32 %v10073_v51  ;;  %v3759_v47 = vand.u32 2147483647, %v10073_v51 }
 0x357   : > { %v5565_v56 = vpop.eup %5564  ;;  %5568 = vpow2.f32 %v4818_v18  ;;  %v2547_v9 = vpop.f32.mrf.mxu0  ;;  %v3908_v38 = vmul.f32 %v3703_v16, %v9947_v24  ;;  %v3761_v24 = vand.u32 2147483648, %v10073_v51 }
 0x358   : > { %v3724_v4 = vadd.f32 %v5563_v62, %v3723_v12  ;;  %v2890_v1 = vadd.f32 1.0, %v5565_v56  ;;  %v2548_v14 = vadd.f32 %v2547_v9, %v7961_v27  ;;  %v2636_v25 = vpop.f32.mrf.mxu1  ;;  %vm3760_vm9 = vcmp.eq.f32.partialorder %v3759_v47, 8.507059e+37 }
 0x359   : > { %v5567_v59 = vpop.eup %5566  ;;  %v4203_v20 = vpop.f32.mrf.mxu3  ;;  %v3762_v53 = vor.u32 1.1754944e-38, %v3761_v24 }
 0x35a   : > { %v3728_v35 = vsel %vm3727_vm3, %v5563_v62, %v3724_v4  ;;  %v3751_v42 = vmul.f32 %v5567_v59, %v10073_v51  ;;  %5570 = vrcp.f32 %v2890_v1  ;;  %v4204_v11 = vadd.f32 %v4203_v20, %v4115_v23 }
 0x35b   : > { %v3733_v29 = vsel %vm3730_vm14, %v3732_v45, %v3728_v35  ;;  %v10104_v10 = vadd.f32 %v2636_v25, %v2548_v14  ;;  %v4117_v43 = vpop.f32.mrf.mxu2  ;;  %vm3756_vm1 = vweird.f32 %v5567_v59  ;;  %v3791_v21 = vand.u32 2147483648, %v2890_v1 }
 0x35c   : > { %v3910_v0 = vmul.f32 %v3733_v29, %v9982_v30  ;;  %v3752_v34 = vsub.f32 1.0, %v3751_v42  ;;  %4270 = vst [vmem:[%s9752_s11 + $0x48] sm:$0xff] %v4204_v11  ;;  %v4118_v30 = vadd.f32 %v9670_v37, %v4117_v43  ;;  %vm10115_vm5 = vmor %vm3755_vm4, %vm3756_vm1  ;;  %v3789_v62 = vand.u32 2147483647, %v2890_v1 }
 0x35d   : > { %v5569_v15 = vpop.eup %5568  ;;  %v4820_v33 = vmul.f32 -1.442695, %v10104_v10  ;;  %vm3785_vm8 = vweird.f32 %v2890_v1  ;;  %v3792_v51 = vor.u32 1.1754944e-38, %v3791_v21 }
 0x35e   : > { %v3753_v40 = vmul.f32 %v5567_v59, %v3752_v34  ;;  %v3946_v54 = vpack.c.bf16 %v3910_v0, %v3908_v38  ;;  %v10108_v41 = vadd.f32 1.0, %v5569_v15  ;;  %vm3790_vm10 = vcmp.eq.f32.partialorder %v3789_v62, 8.507059e+37 }
 0x35f   : > { %5572 = vpow2.f32 %v4820_v33 }
 0x360   : > { %v5571_v36 = vpop.eup %5570  ;;  %v3754_v50 = vadd.f32 %v5567_v59, %v3753_v40  ;;  %5574 = vrcp.f32 %v10108_v41  ;;  %v3821_v45 = vand.u32 2147483648, %v10108_v41  ;;  %vm3815_vm13 = vweird.f32 %v10108_v41 }
 0x361   : > { %v3781_v27 = vmul.f32 %v5571_v36, %v2890_v1  ;;  %v4206_v52 = vpop.f32.mrf.mxu3  ;;  %vm3786_vm6 = vweird.f32 %v5571_v36 }
 0x362   : > { %v4207_v63 = vadd.f32 %v4206_v52, %v4118_v30  ;;  %v3758_v8 = vsel %vm10115_vm5, %v5567_v59, %v3754_v50  ;;  %vm3787_vm11 = vmor %vm3785_vm8, %vm3786_vm6  ;;  %v3822_v0 = vor.u32 1.1754944e-38, %v3821_v45 }
 0x363   : > { %4245 = vmatmul.bf16.gmra.mxu3 %v3946_v54  ;;  %v3782_v49 = vsub.f32 1.0, %v3781_v27  ;;  %v4119_v5 = vpop.f32.mrf.mxu2  ;;  %v3763_v6 = vsel %vm3760_vm9, %v3762_v53, %v3758_v8 }
 0x364   : > { %4271 = vst [vmem:[%s9752_s11 + $0x50] sm:$0xff] %v4207_v63  ;;  %v4120_v31 = vadd.f32 %v9670_v37, %v4119_v5  ;;  %v3912_v17 = vmul.f32 %v3763_v6, %v10027_v28  ;;  %v3819_v28 = vand.u32 2147483647, %v10108_v41 }
 0x365   : > { %v3783_v3 = vmul.f32 %v5571_v36, %v3782_v49  ;;  %v5573_v44 = vpop.eup %5572 }
 0x366   : > { %v5575_v19 = vpop.eup %5574  ;;  %v2894_v55 = vadd.f32 1.0, %v5573_v44  ;;  %vm3820_vm2 = vcmp.eq.f32.partialorder %v3819_v28, 8.507059e+37 }
 0x367   : > { %v3784_v46 = vadd.f32 %v5571_v36, %v3783_v3  ;;  %v3811_v39 = vmul.f32 %v5575_v19, %v10108_v41  ;;  %vm3816_vm7 = vweird.f32 %v5575_v19 }
 0x368   : > { %5576 = vrcp.f32 %v2894_v55  ;;  %v3851_v23 = vand.u32 2147483648, %v2894_v55  ;;  %vm3817_vm15 = vmor %vm3815_vm13, %vm3816_vm7  ;;  %v3849_v42 = vand.u32 2147483647, %v2894_v55  ;;  %vm3845_vm12 = vweird.f32 %v2894_v55 }
 0x369   : > { %v3788_v61 = vsel %vm3787_vm11, %v5571_v36, %v3784_v46  ;;  %v3812_v48 = vsub.f32 1.0, %v3811_v39  ;;  %v4208_v60 = vpop.f32.mrf.mxu3 }
 0x36a   : > { %v3793_v13 = vsel %vm3790_vm10, %v3792_v51, %v3788_v61  ;;  %v4209_v12 = vadd.f32 %v4208_v60, %v4120_v31  ;;  %v3852_v14 = vor.u32 1.1754944e-38, %v3851_v23  ;;  %vm3850_vm14 = vcmp.eq.f32.partialorder %v3849_v42, 8.507059e+37 }
 0x36b   : > { %v3914_v2 = vmul.f32 %v3793_v13, %v10067_v26  ;;  %v3813_v32 = vmul.f32 %v5575_v19, %v3812_v48  ;;  %v4122_v56 = vpop.f32.mrf.mxu2 }
 0x36c   : > { %4272 = vst [vmem:[%s9752_s11 + $0x58] sm:$0xff] %v4209_v12  ;;  %v4123_v4 = vadd.f32 %v9670_v37, %v4122_v56 }
 0x36d   : > { %v3948_v22 = vpack.c.bf16 %v3914_v2, %v3912_v17  ;;  %v3814_v59 = vadd.f32 %v5575_v19, %v3813_v32 }
 0x36e   : > { %v5577_v58 = vpop.eup %5576 }
 0x36f   : > { %v3841_v18 = vmul.f32 %v5577_v58, %v2894_v55  ;;  %vm3846_vm0 = vweird.f32 %v5577_v58  ;;  %v3818_v9 = vsel %vm3817_vm15, %v5575_v19, %v3814_v59 }
 0x370   : > { %vm3847_vm3 = vmor %vm3845_vm12, %vm3846_vm0  ;;  %v3823_v38 = vsel %vm3820_vm2, %v3822_v0, %v3818_v9 }
 0x371   : > { %v3842_v26 = vsub.f32 1.0, %v3841_v18  ;;  %v4211_v1 = vpop.f32.mrf.mxu3  ;;  %v3916_v43 = vmul.f32 %v3823_v38, %v10091_v57 }
 0x372   : > { %v4212_v16 = vadd.f32 %v4211_v1, %v4123_v4 }
 0x373   : > { %4250 = vmatmul.bf16.gmra.mxu3 %v3948_v22  ;;  %v3843_v35 = vmul.f32 %v5577_v58, %v3842_v26  ;;  %v4124_v29 = vpop.f32.mrf.mxu2 }
 0x374   : > { %4273 = vst [vmem:[%s9752_s11 + $0x60] sm:$0xff] %v4212_v16  ;;  %v4125_v20 = vadd.f32 %v9670_v37, %v4124_v29 }
 0x375   : > { %v3844_v34 = vadd.f32 %v5577_v58, %v3843_v35 }
 0x377   : > { %v3848_v25 = vsel %vm3847_vm3, %v5577_v58, %v3844_v34 }
 0x378   : > { %v3853_v11 = vsel %vm3850_vm14, %v3852_v14, %v3848_v25 }
 0x379   : > { %v3918_v40 = vmul.f32 %v3853_v11, %v10104_v10  ;;  %v4213_v54 = vpop.f32.mrf.mxu3 }
 0x37a   : > { %v4214_v15 = vadd.f32 %v4213_v54, %v4125_v20 }
 0x37b   : > { %v3950_v33 = vpack.c.bf16 %v3918_v40, %v3916_v43  ;;  %v4127_v36 = vpop.f32.mrf.mxu2 }
 0x37c   : > { %4274 = vst [vmem:[%s9752_s11 + $0x68] sm:$0xff] %v4214_v15  ;;  %v4128_v41 = vadd.f32 %v9670_v37, %v4127_v36 }
 0x381   : > { %v4216_v30 = vpop.f32.mrf.mxu3 }
 0x382   : > { %v4217_v27 = vadd.f32 %v4216_v30, %v4128_v41 }
 0x383   : > { %4255 = vmatmul.bf16.gmra.mxu3 %v3950_v33  ;;  %v4129_v50 = vpop.f32.mrf.mxu2 }
 0x384   : > { %4275 = vst [vmem:[%s9752_s11 + $0x70] sm:$0xff] %v4217_v27  ;;  %v4130_v24 = vadd.f32 %v9670_v37, %v4129_v50 }
 0x389   : > { %v4218_v10 = vpop.f32.mrf.mxu3 }
 0x38a   : > { %v4219_v49 = vadd.f32 %v4218_v10, %v4130_v24 }
 0x38b   : > { %v4132_v52 = vpop.f32.mrf.mxu2 }
 0x38c   : > { %4276 = vst [vmem:[%s9752_s11 + $0x78] sm:$0xff] %v4219_v49  ;;  %v4133_v57 = vadd.f32 %v9670_v37, %v4132_v52 }
 0x393   : > { %v4134_v63 = vpop.f32.mrf.mxu2 }
 0x394   : > { %v4221_v47 = vpop.f32.mrf.mxu3  ;;  %v4135_v3 = vadd.f32 %v10145_v7, %v4134_v63 }
 0x395   : > { %v4222_v21 = vadd.f32 %v4221_v47, %v4133_v57 }
 0x397   : > { %4277 = vst [vmem:[%s9752_s11 + $0x80] sm:$0xff] %v4222_v21 }
 0x39b   : > { %v4137_v5 = vpop.f32.mrf.mxu2 }
 0x39c   : > { %v4223_v62 = vpop.f32.mrf.mxu3  ;;  %v4138_v44 = vadd.f32 %v10145_v7, %v4137_v5 }
 0x39d   : > { %v4224_v8 = vadd.f32 %v4223_v62, %v4135_v3 }
 0x39f   : > { %4278 = vst [vmem:[%s9752_s11 + $0x88] sm:$0xff] %v4224_v8 }
 0x3a3   : > { %v4139_v46 = vpop.f32.mrf.mxu2 }
 0x3a4   : > { %v4226_v37 = vpop.f32.mrf.mxu3  ;;  %v4140_v19 = vadd.f32 %v10145_v7, %v4139_v46 }
 0x3a5   : > { %v4227_v53 = vadd.f32 %v4226_v37, %v4138_v44 }
 0x3a7   : > { %4279 = vst [vmem:[%s9752_s11 + $0x90] sm:$0xff] %v4227_v53 }
 0x3ab   : > { %v4142_v31 = vpop.f32.mrf.mxu2 }
 0x3ac   : > { %v4228_v51 = vpop.f32.mrf.mxu3  ;;  %v4143_v6 = vadd.f32 %v10145_v7, %v4142_v31 }
 0x3ad   : > { %v4229_v55 = vadd.f32 %v4228_v51, %v4140_v19 }
 0x3af   : > { %4280 = vst [vmem:[%s9752_s11 + $0x98] sm:$0xff] %v4229_v55 }
 0x3b3   : > { %v4144_v13 = vpop.f32.mrf.mxu2 }
 0x3b4   : > { %v4145_v2 = vadd.f32 %v10145_v7, %v4144_v13 }
 0x3b6   : > { %v4231_v61 = vpop.f32.mrf.mxu3 }
 0x3b7   : > { %v4232_v39 = vadd.f32 %v4231_v61, %v4143_v6 }
 0x3b9   : > { %4281 = vst [vmem:[%s9752_s11 + $0xa0] sm:$0xff] %v4232_v39 }
 0x3bb   : > { %v4147_v17 = vpop.f32.mrf.mxu2 }
 0x3bc   : > { %v4148_v12 = vadd.f32 %v10145_v7, %v4147_v17 }
 0x3be   : > { %v4233_v48 = vpop.f32.mrf.mxu3 }
 0x3bf   : > { %v4234_v60 = vadd.f32 %v4233_v48, %v4145_v2 }
 0x3c1   : > { %4282 = vst [vmem:[%s9752_s11 + $0xa8] sm:$0xff] %v4234_v60 }
 0x3c3   : > { %v4149_v56 = vpop.f32.mrf.mxu2 }
 0x3c4   : > { %v4150_v58 = vadd.f32 %v10145_v7, %v4149_v56 }
 0x3c6   : > { %v4236_v32 = vpop.f32.mrf.mxu3 }
 0x3c7   : > { %v4237_v22 = vadd.f32 %v4236_v32, %v4148_v12 }
 0x3c9   : > { %4283 = vst [vmem:[%s9752_s11 + $0xb0] sm:$0xff] %v4237_v22 }
 0x3cb   : > { %v4152_v59 = vpop.f32.mrf.mxu2 }
 0x3cc   : > { %v4153_v45 = vadd.f32 %v10145_v7, %v4152_v59 }
 0x3ce   : > { %v4238_v4 = vpop.f32.mrf.mxu3 }
 0x3cf   : > { %v4239_v18 = vadd.f32 %v4238_v4, %v4150_v58 }
 0x3d1   : > { %4284 = vst [vmem:[%s9752_s11 + $0xb8] sm:$0xff] %v4239_v18 }
 0x3d3   : > { %v4154_v28 = vpop.f32.mrf.mxu2 }
 0x3d4   : > { %v4155_v23 = vadd.f32 %v10145_v7, %v4154_v28 }
 0x3d6   : > { %v4241_v26 = vpop.f32.mrf.mxu3 }
 0x3d7   : > { %v4242_v1 = vadd.f32 %v4241_v26, %v4153_v45 }
 0x3d9   : > { %4285 = vst [vmem:[%s9752_s11 + $0xc0] sm:$0xff] %v4242_v1 }
 0x3db   : > { %v4157_v42 = vpop.f32.mrf.mxu2 }
 0x3dc   : > { %v4158_v9 = vadd.f32 %v10145_v7, %v4157_v42 }
 0x3de   : > { %v4243_v16 = vpop.f32.mrf.mxu3 }
 0x3df   : > { %v4244_v35 = vadd.f32 %v4243_v16, %v4155_v23 }
 0x3e1   : > { %4286 = vst [vmem:[%s9752_s11 + $0xc8] sm:$0xff] %v4244_v35 }
 0x3e3   : > { %v4159_v34 = vpop.f32.mrf.mxu2 }
 0x3e4   : > { %v4160_v14 = vadd.f32 %v10145_v7, %v4159_v34 }
 0x3e6   : > { %v4246_v29 = vpop.f32.mrf.mxu3 }
 0x3e7   : > { %v4247_v0 = vadd.f32 %v4246_v29, %v4158_v9 }
 0x3e9   : > { %4287 = vst [vmem:[%s9752_s11 + $0xd0] sm:$0xff] %v4247_v0 }
 0x3eb   : > { %v4162_v25 = vpop.f32.mrf.mxu2 }
 0x3ec   : > { %v4163_v11 = vadd.f32 %v10145_v7, %v4162_v25 }
 0x3ee   : > { %v4248_v20 = vpop.f32.mrf.mxu3 }
 0x3ef   : > { %v4249_v38 = vadd.f32 %v4248_v20, %v4160_v14 }
 0x3f1   : > { %4288 = vst [vmem:[%s9752_s11 + $0xd8] sm:$0xff] %v4249_v38 }
 0x3f3   : > { %v4164_v43 = vpop.f32.mrf.mxu2 }
 0x3f4   : > { %v4165_v15 = vadd.f32 %v10145_v7, %v4164_v43 }
 0x3f6   : > { %v4251_v40 = vpop.f32.mrf.mxu3 }
 0x3f7   : > { %v4252_v54 = vadd.f32 %v4251_v40, %v4163_v11 }
 0x3f9   : > { %4289 = vst [vmem:[%s9752_s11 + $0xe0] sm:$0xff] %v4252_v54 }
 0x3fb   : > { %v4167_v41 = vpop.f32.mrf.mxu2 }
 0x3fc   : > { %v4168_v30 = vadd.f32 %v10145_v7, %v4167_v41 }
 0x3fe   : > { %v4253_v33 = vpop.f32.mrf.mxu3 }
 0x3ff   : > { %v4254_v36 = vadd.f32 %v4253_v33, %v4165_v15 }
 0x401   : > { %4290 = vst [vmem:[%s9752_s11 + $0xe8] sm:$0xff] %v4254_v36 }
 0x403   : > { %v4169_v24 = vpop.f32.mrf.mxu2 }
 0x404   : > { %v4170_v10 = vadd.f32 %v10145_v7, %v4169_v24 }
 0x406   : > { %v4256_v27 = vpop.f32.mrf.mxu3 }
 0x407   : > { %v4257_v50 = vadd.f32 %v4256_v27, %v4168_v30 }
 0x409   : > { %4291 = vst [vmem:[%s9752_s11 + $0xf0] sm:$0xff] %v4257_v50 }
 0x40e   : > { %v4258_v49 = vpop.f32.mrf.mxu3 }
 0x40f   : > { %v4259_v52 = vadd.f32 %v4258_v49, %v4170_v10 }
 0x411   : > { %4292 = vst [vmem:[%s9752_s11 + $0xf8] sm:$0xff] %v4259_v52 }
 0x412   : > { %5757 = shalt.err (!%p5754_p10)
}
 0x413   : > { %s5814_s13 = smov 128   ;;  %s5815_s11 = smov 8  }
 0x414   : > { %4990 = dma.vmem_to_hbm [thread:$0]  (%p5946_p5), %s4307_s30, 4096, %s4309_s12, %s4294_s19, %s5814_s13, %s5814_s13, %s5815_s11  }
 0x415 PF: > { %s4323_s17 = sand.u32 1, %s5792_s24   ;;  %p10580_p12 = scmp.ge.s32.totalorder %s5804_s27, 2 }
 0x416   : > { %s4324_s20 = scalar_lea.sflag [#allocation4], %s4323_s17 }
 0x417   : > { %p5010_p13 = pnand %p10580_p12, %p5891_p6 }
 0x419   : > { %p5011_p0 = pneg %p5010_p13 }
 0x41b   : > { %5787 = dma.done.wait (%p5011_p0), %s4324_s20, 4096  }
 0x41c   : > { %5789 = vsyncadd (%p5011_p0), %s4324_s20, 4294963200  ;;  %p22_p3 = scmp.ge.s32.totalorder %s5933_s21, 4   ;;  %s10581_s24 = smov %s5796_s25 }
 0x41d   : > { %s10582_s25 = smov %s5800_s26  ;;  %s10583_s26 = smov %s5942_s29 }
 0x41e   : > { %s10584_s27 = smov %s5933_s21  ;;  %24 = sbr.rel (!%p22_p3) target bundleno = 9 (0x9), region = 109 }
 0x423   :  { %4330 = vsyncpa [#allocation3], 1 }
 0x424   :  { %4332 = vsyncpa [#allocation3 + $0x1], 1 }
 0x425   :  { %4333 = vsyncpa [#allocation6], 1 }
 0x426   :  { %4334 = vsyncpa [#allocation9], 1 }
 0x427   :  { %4335 = vsyncpa [#allocation4], 1 }
 0x428   :  { %4337 = vsyncpa [#allocation4 + $0x1], 1 }

</bundles_post_ra>
